<compile_context>
chip_gen: v7x
topology: tpu7x:2x2x1
jax: 0.10.0
libtpu: 0.0.40
codegen_flags: <defaults>
</compile_context>

<pallas_src>
import jax
import jax.numpy as jnp
from jax.experimental import pallas as pl
from jax.experimental.pallas import tpu as pltpu

BN_EPS = 1e-5


# ----------------------------- Pallas kernel -----------------------------

def _gin_mlp(h, w1, b1, gamma, beta, w2, b2):
    """Linear -> BatchNorm1d (training / batch stats) -> ReLU -> Linear -> ReLU."""
    h = jnp.dot(h, w1, preferred_element_type=jnp.float32) + b1
    mean = jnp.mean(h, axis=0, keepdims=True)
    var = jnp.mean(jnp.square(h - mean), axis=0, keepdims=True)  # biased, like PyTorch fwd
    h = (h - mean) * jax.lax.rsqrt(var + BN_EPS) * gamma + beta
    h = jnp.maximum(h, 0.0)
    h = jnp.dot(h, w2, preferred_element_type=jnp.float32) + b2
    return jnp.maximum(h, 0.0)


def molecule_encoder_kernel(x_ref, s_ref, dm_ref, p_ref, e1_ref, e2_ref,
                            wcat_ref, w1b_ref, vcat_ref, out_ref):
    D = x_ref.shape[1]

    x = x_ref[...]                          # [N, D]  f32 node embeddings
    S = s_ref[...].astype(jnp.float32)      # [E, N]  one_hot(src)     (bf16 in HBM, exact)
    Dm = dm_ref[...].astype(jnp.float32)    # [N, E]  one_hot(dst)^T   -> scatter-add
    P = p_ref[...].astype(jnp.float32)      # [G, N]  one_hot(batch)^T -> global_add_pool

    # ---- packed parameters (static, lane-aligned slices) ----
    w1a = wcat_ref[:, 0:2 * D]              # [D, 2D]
    w2a = wcat_ref[:, 2 * D:3 * D]          # [D, D]
    w2b = wcat_ref[:, 3 * D:4 * D]          # [D, D]
    w1b = w1b_ref[...]                      # [2D, D]
    b1a = vcat_ref[0:1, :]                  # [1, 2D]
    g1 = vcat_ref[1:2, :]
    be1 = vcat_ref[2:3, :]
    b1b = vcat_ref[3:4, 0:D]                # [1, D]
    b2a = vcat_ref[4:5, 0:D]
    g2 = vcat_ref[5:6, 0:D]
    be2 = vcat_ref[6:7, 0:D]
    b2b = vcat_ref[7:8, 0:D]

    # ---------------- GINConv 1 ----------------
    x_j = jnp.dot(S, x, preferred_element_type=jnp.float32)       # gather x[src]
    msg = jnp.maximum(x_j + e1_ref[...], 0.0)                     # message = relu(x_j + e)
    agg = jnp.dot(Dm, msg, preferred_element_type=jnp.float32)    # add-aggregate to dst
    x = _gin_mlp(agg + x, w1a, b1a, g1, be1, w1b, b1b)            # outer F.relu folded (idempotent)

    # ---------------- GINConv 2 ----------------
    x_j = jnp.dot(S, x, preferred_element_type=jnp.float32)
    msg = jnp.maximum(x_j + e2_ref[...], 0.0)
    agg = jnp.dot(Dm, msg, preferred_element_type=jnp.float32)
    x = _gin_mlp(agg + x, w2a, b2a, g2, be2, w2b, b2b)

    # ---------------- global_add_pool ----------------
    out_ref[...] = jnp.dot(P, x, preferred_element_type=jnp.float32)


def molecule_encoder_pallas(x_emb, src_oh, dst_scat, pool_mat, e1, e2, wcat, w1b, vcat):
    """x_emb: [B, N, D] node embeddings per batch. Returns [B, G, D] pooled graph embeddings."""
    B, N, D = x_emb.shape
    E = src_oh.shape[1]
    G = pool_mat.shape[1]

    def per_batch(shape):
        return pl.BlockSpec((None,) + shape, lambda b: (b, 0, 0))

    def shared(shape):
        return pl.BlockSpec(shape, lambda b: (0, 0))

    # Advisory cost estimate (per launch): matmul FLOPs + bytes touched.
    flops_per_step = 2 * (
        2 * E * N * D          # gather  (x2 convs)
        + 2 * N * E * D        # scatter (x2 convs)
        + N * D * 2 * D        # conv1 MLP lin1
        + N * 2 * D * D        # conv1 MLP lin2
        + 2 * N * D * D        # conv2 MLP lin1+lin2
    ) + 2 * G * N * D          # pool
    bytes_per_step = 4 * (N * D + 2 * E * D + G * D) + 2 * (E * N + N * E + G * N)
    shared_bytes = 4 * (D * 4 * D + 2 * D * D + 8 * 2 * D)
    cost = pl.CostEstimate(
        flops=B * flops_per_step,
        transcendentals=0,
        bytes_accessed=B * bytes_per_step + shared_bytes,
    )

    return pl.pallas_call(
        molecule_encoder_kernel,
        out_shape=jax.ShapeDtypeStruct((B, G, D), jnp.float32),
        grid=(B,),
        in_specs=[
            per_batch((N, D)),       # x_emb
            per_batch((E, N)),       # src one-hot (bf16)
            per_batch((N, E)),       # dst scatter (bf16)
            per_batch((G, N)),       # pool (bf16)
            per_batch((E, D)),       # e1
            per_batch((E, D)),       # e2
            shared((D, 4 * D)),      # [w1a | w2a | w2b]   (same block every step -> no re-DMA)
            shared((2 * D, D)),      # w1b
            shared((8, 2 * D)),      # packed bias / BN vectors
        ],
        out_specs=per_batch((G, D)),
        compiler_params=pltpu.CompilerParams(
            dimension_semantics=("parallel",)),
        cost_estimate=cost,
    )(x_emb, src_oh, dst_scat, pool_mat, e1, e2, wcat, w1b, vcat)


# ----------------------------- plain-JAX glue -----------------------------

def embed_sum(tables, idx):
    """tables: [F, V, D]; idx: [..., F] int32 -> sum_f tables[f][idx[..., f]] -> [..., D]."""
    out = jnp.zeros(idx.shape[:-1] + (tables.shape[-1],), jnp.float32)
    for f in range(tables.shape[0]):
        out = out + tables[f][idx[..., f]]
    return out


def init_params(key, D, node_features=9, edge_features=3, atom_vocab=16, bond_vocab=8):
    ks = jax.random.split(key, 16)
    s = 0.1
    p = {}
    p["atom_tables"] = s * jax.random.normal(ks[0], (node_features, atom_vocab, D), jnp.float32)
    p["bond_tables1"] = s * jax.random.normal(ks[1], (edge_features, bond_vocab, D), jnp.float32)
    p["bond_tables2"] = s * jax.random.normal(ks[2], (edge_features, bond_vocab, D), jnp.float32)
    # conv1 MLP: Linear(D,2D) -> BN(2D) -> ReLU -> Linear(2D,D) -> ReLU
    p["w1a"] = s * jax.random.normal(ks[3], (D, 2 * D), jnp.float32)
    p["b1a"] = s * jax.random.normal(ks[4], (2 * D,), jnp.float32)
    p["g1"] = 1.0 + s * jax.random.normal(ks[5], (2 * D,), jnp.float32)
    p["be1"] = s * jax.random.normal(ks[6], (2 * D,), jnp.float32)
    p["w1b"] = s * jax.random.normal(ks[7], (2 * D, D), jnp.float32)
    p["b1b"] = s * jax.random.normal(ks[8], (D,), jnp.float32)
    # conv2 MLP: Linear(D,D) -> BN(D) -> ReLU -> Linear(D,D) -> ReLU
    p["w2a"] = s * jax.random.normal(ks[9], (D, D), jnp.float32)
    p["b2a"] = s * jax.random.normal(ks[10], (D,), jnp.float32)
    p["g2"] = 1.0 + s * jax.random.normal(ks[11], (D,), jnp.float32)
    p["be2"] = s * jax.random.normal(ks[12], (D,), jnp.float32)
    p["w2b"] = s * jax.random.normal(ks[13], (D, D), jnp.float32)
    p["b2b"] = s * jax.random.normal(ks[14], (D,), jnp.float32)
    return p


def pack_vectors(p, D):
    """Pack all bias / BatchNorm vectors into one [8, 2D] f32 block."""
    vcat = jnp.zeros((8, 2 * D), jnp.float32)
    vcat = vcat.at[0, :].set(p["b1a"])
    vcat = vcat.at[1, :].set(p["g1"])
    vcat = vcat.at[2, :].set(p["be1"])
    vcat = vcat.at[3, :D].set(p["b1b"])
    vcat = vcat.at[4, :D].set(p["b2a"])
    vcat = vcat.at[5, :D].set(p["g2"])
    vcat = vcat.at[6, :D].set(p["be2"])
    vcat = vcat.at[7, :D].set(p["b2b"])
    return vcat


def reference_single(x, S, Dm, P, e1, e2, p):
    """Pure-JAX reference for ONE molecule batch (identical math, f32)."""
    def mlp(h, w1, b1, g, be, w2, b2):
        h = h @ w1 + b1
        m = jnp.mean(h, axis=0, keepdims=True)
        v = jnp.mean((h - m) ** 2, axis=0, keepdims=True)
        h = (h - m) * jax.lax.rsqrt(v + BN_EPS) * g + be
        h = jnp.maximum(h, 0.0)
        h = h @ w2 + b2
        return jnp.maximum(h, 0.0)

    msg = jnp.maximum(S @ x + e1, 0.0)
    x = mlp(Dm @ msg + x, p["w1a"], p["b1a"], p["g1"], p["be1"], p["w1b"], p["b1b"])
    msg = jnp.maximum(S @ x + e2, 0.0)
    x = mlp(Dm @ msg + x, p["w2a"], p["b2a"], p["g2"], p["be2"], p["w2b"], p["b2b"])
    return P @ x


# ----------------------------- main -----------------------------

if __name__ == "__main__":
    key = jax.random.PRNGKey(0)
    D = 128            # mol_dim: lane-dense feature dim (full 128-lane vregs, unmasked stores)
    B = 4              # molecule batches processed per launch (grid axis, 'parallel')
    G = 8              # graphs per batch
    N = 128            # nodes per batch (16 per graph) -> MXU-friendly contraction
    E = 256            # edges per batch (32 per graph)
    NODE_F, EDGE_F = 9, 3
    ATOM_VOCAB, BOND_VOCAB = 16, 8

    kx, ks, kd, ka, kp = jax.random.split(key, 5)

    nodes_per_graph = N // G
    edges_per_graph = E // G

    # Synthetic PyG-style batched graphs: B independent DataBatch objects, each with
    # G graphs, block-diagonal edges, and integer categorical features (OGB style).
    x_int = jax.random.randint(kx, (B, N, NODE_F), 0, ATOM_VOCAB, jnp.int32)        # data.x
    graph_of_edge = jnp.repeat(jnp.arange(G, dtype=jnp.int32), edges_per_graph)     # [E]
    src = jax.random.randint(ks, (B, E), 0, nodes_per_graph, jnp.int32) + graph_of_edge * nodes_per_graph
    dst = jax.random.randint(kd, (B, E), 0, nodes_per_graph, jnp.int32) + graph_of_edge * nodes_per_graph
    edge_attr = jax.random.randint(ka, (B, E, EDGE_F), 0, BOND_VOCAB, jnp.int32)    # data.edge_attr
    batch_vec = jnp.broadcast_to(
        jnp.repeat(jnp.arange(G, dtype=jnp.int32), nodes_per_graph), (B, N))        # data.batch

    params = init_params(kp, D, NODE_F, EDGE_F, ATOM_VOCAB, BOND_VOCAB)

    # AtomEncoder / BondEncoder lookups (integer table gathers stay in plain-JAX glue).
    x_emb = embed_sum(params["atom_tables"], x_int)            # [B, N, D]
    e1 = embed_sum(params["bond_tables1"], edge_attr)          # conv1.bond_encoder  [B, E, D]
    e2 = embed_sum(params["bond_tables2"], edge_attr)          # conv2.bond_encoder  [B, E, D]

    # Dense one-hot operators, stored bf16 (0/1 exact in bf16; halves HBM/VMEM bytes).
    src_oh = jax.nn.one_hot(src, N, dtype=jnp.bfloat16)                               # [B, E, N]
    dst_scat = jnp.swapaxes(jax.nn.one_hot(dst, N, dtype=jnp.bfloat16), 1, 2)         # [B, N, E]
    pool_mat = jnp.swapaxes(jax.nn.one_hot(batch_vec, G, dtype=jnp.bfloat16), 1, 2)   # [B, G, N]

    # Packed parameter blocks (fewer, larger DMAs instead of 12+ tiny ones).
    wcat = jnp.concatenate([params["w1a"], params["w2a"], params["w2b"]], axis=1)     # [D, 4D]
    w1b = params["w1b"]                                                               # [2D, D]
    vcat = pack_vectors(params, D)                                                    # [8, 2D]

    out = molecule_encoder_pallas(x_emb, src_oh, dst_scat, pool_mat, e1, e2, wcat, w1b, vcat)
    out = jax.block_until_ready(out)

    ref = jax.vmap(
        lambda xb, Sb, Db, Pb, e1b, e2b: reference_single(
            xb, Sb.astype(jnp.float32), Db.astype(jnp.float32), Pb.astype(jnp.float32),
            e1b, e2b, params)
    )(x_emb, src_oh, dst_scat, pool_mat, e1, e2)

    assert out.shape == (B, G, D), out.shape
    max_err = float(jnp.max(jnp.abs(out - ref)))
    assert jnp.allclose(out, ref, atol=2e-3, rtol=2e-3), max_err

    print("KERNEL_OK")
</pallas_src>

<mosaic_0001>
module attributes {stable_mosaic.version = 11 : i64} {
  func.func @molecule_encoder_kernel(%arg0: i32, %arg1: memref<1x128x128xf32, #tpu.memory_space<vmem>>, %arg2: memref<1x256x128xbf16, #tpu.memory_space<vmem>>, %arg3: memref<1x128x256xbf16, #tpu.memory_space<vmem>>, %arg4: memref<1x8x128xbf16, #tpu.memory_space<vmem>>, %arg5: memref<1x256x128xf32, #tpu.memory_space<vmem>>, %arg6: memref<1x256x128xf32, #tpu.memory_space<vmem>>, %arg7: memref<128x512xf32, #tpu.memory_space<vmem>>, %arg8: memref<256x128xf32, #tpu.memory_space<vmem>>, %arg9: memref<8x256xf32, #tpu.memory_space<vmem>>, %arg10: memref<1x8x128xf32, #tpu.memory_space<vmem>>) attributes {dimension_semantics = [#tpu.dimension_semantics<parallel>], iteration_bounds = array<i64: 4>, scalar_prefetch = 0 : i64, scratch_operands = 0 : i64, tpu.core_type = #tpu.core_type<tc>, window_params = [{transform_indices = @transform_0, window_bounds = array<i64: 1, 128, 128>}, {transform_indices = @transform_1, window_bounds = array<i64: 1, 256, 128>}, {transform_indices = @transform_2, window_bounds = array<i64: 1, 128, 256>}, {transform_indices = @transform_3, window_bounds = array<i64: 1, 8, 128>}, {transform_indices = @transform_4, window_bounds = array<i64: 1, 256, 128>}, {transform_indices = @transform_5, window_bounds = array<i64: 1, 256, 128>}, {pipeline_mode = #tpu.pipeline_mode<synchronous>, transform_indices = @transform_6, window_bounds = array<i64: 128, 512>}, {pipeline_mode = #tpu.pipeline_mode<synchronous>, transform_indices = @transform_7, window_bounds = array<i64: 256, 128>}, {pipeline_mode = #tpu.pipeline_mode<synchronous>, transform_indices = @transform_8, window_bounds = array<i64: 8, 256>}, {transform_indices = @transform_9, window_bounds = array<i64: 1, 8, 128>}]} {
    %c0 = arith.constant 0 : index
    %c0_0 = arith.constant 0 : index
    %c0_1 = arith.constant 0 : index
    %0 = vector.load %arg1[%c0, %c0_0, %c0_1] : memref<1x128x128xf32, #tpu.memory_space<vmem>>, vector<1x128x128xf32>
    %1 = vector.shape_cast %0 : vector<1x128x128xf32> to vector<128x128xf32>
    %c0_2 = arith.constant 0 : index
    %c0_3 = arith.constant 0 : index
    %c0_4 = arith.constant 0 : index
    %2 = vector.load %arg2[%c0_2, %c0_3, %c0_4] : memref<1x256x128xbf16, #tpu.memory_space<vmem>>, vector<1x256x128xbf16>
    %3 = vector.shape_cast %2 : vector<1x256x128xbf16> to vector<256x128xbf16>
    %4 = arith.extf %3 : vector<256x128xbf16> to vector<256x128xf32>
    %c0_5 = arith.constant 0 : index
    %c0_6 = arith.constant 0 : index
    %c0_7 = arith.constant 0 : index
    %5 = vector.load %arg3[%c0_5, %c0_6, %c0_7] : memref<1x128x256xbf16, #tpu.memory_space<vmem>>, vector<1x128x256xbf16>
    %6 = vector.shape_cast %5 : vector<1x128x256xbf16> to vector<128x256xbf16>
    %7 = arith.extf %6 : vector<128x256xbf16> to vector<128x256xf32>
    %c0_8 = arith.constant 0 : index
    %c0_9 = arith.constant 0 : index
    %c0_10 = arith.constant 0 : index
    %8 = vector.load %arg4[%c0_8, %c0_9, %c0_10] : memref<1x8x128xbf16, #tpu.memory_space<vmem>>, vector<1x8x128xbf16>
    %9 = vector.shape_cast %8 : vector<1x8x128xbf16> to vector<8x128xbf16>
    %10 = arith.extf %9 : vector<8x128xbf16> to vector<8x128xf32>
    %c0_11 = arith.constant 0 : index
    %c0_12 = arith.constant 0 : index
    %11 = vector.load %arg7[%c0_11, %c0_12] : memref<128x512xf32, #tpu.memory_space<vmem>>, vector<128x256xf32>
    %c0_13 = arith.constant 0 : index
    %c256 = arith.constant 256 : index
    %12 = vector.load %arg7[%c0_13, %c256] : memref<128x512xf32, #tpu.memory_space<vmem>>, vector<128x128xf32>
    %c0_14 = arith.constant 0 : index
    %c384 = arith.constant 384 : index
    %13 = vector.load %arg7[%c0_14, %c384] : memref<128x512xf32, #tpu.memory_space<vmem>>, vector<128x128xf32>
    %c0_15 = arith.constant 0 : index
    %c0_16 = arith.constant 0 : index
    %14 = vector.load %arg8[%c0_15, %c0_16] : memref<256x128xf32, #tpu.memory_space<vmem>>, vector<256x128xf32>
    %c0_17 = arith.constant 0 : index
    %c0_18 = arith.constant 0 : index
    %15 = vector.load %arg9[%c0_17, %c0_18] : memref<8x256xf32, #tpu.memory_space<vmem>>, vector<1x256xf32>
    %c1 = arith.constant 1 : index
    %c0_19 = arith.constant 0 : index
    %16 = vector.load %arg9[%c1, %c0_19] : memref<8x256xf32, #tpu.memory_space<vmem>>, vector<1x256xf32>
    %c2 = arith.constant 2 : index
    %c0_20 = arith.constant 0 : index
    %17 = vector.load %arg9[%c2, %c0_20] : memref<8x256xf32, #tpu.memory_space<vmem>>, vector<1x256xf32>
    %c3 = arith.constant 3 : index
    %c0_21 = arith.constant 0 : index
    %18 = vector.load %arg9[%c3, %c0_21] : memref<8x256xf32, #tpu.memory_space<vmem>>, vector<1x128xf32>
    %c4 = arith.constant 4 : index
    %c0_22 = arith.constant 0 : index
    %19 = vector.load %arg9[%c4, %c0_22] : memref<8x256xf32, #tpu.memory_space<vmem>>, vector<1x128xf32>
    %c5 = arith.constant 5 : index
    %c0_23 = arith.constant 0 : index
    %20 = vector.load %arg9[%c5, %c0_23] : memref<8x256xf32, #tpu.memory_space<vmem>>, vector<1x128xf32>
    %c6 = arith.constant 6 : index
    %c0_24 = arith.constant 0 : index
    %21 = vector.load %arg9[%c6, %c0_24] : memref<8x256xf32, #tpu.memory_space<vmem>>, vector<1x128xf32>
    %c7 = arith.constant 7 : index
    %c0_25 = arith.constant 0 : index
    %22 = vector.load %arg9[%c7, %c0_25] : memref<8x256xf32, #tpu.memory_space<vmem>>, vector<1x128xf32>
    %cst = arith.constant dense<0.000000e+00> : vector<256x128xf32>
    %23 = tpu.matmul %4, %1, %cst {dimension_numbers = #tpu.dot_dimension_numbers<[1], [0], [0], [1], [0, 0, 1, 1], [], []>} : vector<256x128xf32>, vector<128x128xf32>, vector<256x128xf32> -> vector<256x128xf32>
    %c0_26 = arith.constant 0 : index
    %c0_27 = arith.constant 0 : index
    %c0_28 = arith.constant 0 : index
    %24 = vector.load %arg5[%c0_26, %c0_27, %c0_28] : memref<1x256x128xf32, #tpu.memory_space<vmem>>, vector<1x256x128xf32>
    %25 = vector.shape_cast %24 : vector<1x256x128xf32> to vector<256x128xf32>
    %26 = arith.addf %23, %25 : vector<256x128xf32>
    %cst_29 = arith.constant 0.000000e+00 : f32
    %27 = vector.broadcast %cst_29 : f32 to vector<256x128xf32>
    %28 = arith.maximumf %26, %27 : vector<256x128xf32>
    %cst_30 = arith.constant dense<0.000000e+00> : vector<128x128xf32>
    %29 = tpu.matmul %7, %28, %cst_30 {dimension_numbers = #tpu.dot_dimension_numbers<[1], [0], [0], [1], [0, 0, 1, 1], [], []>} : vector<128x256xf32>, vector<256x128xf32>, vector<128x128xf32> -> vector<128x128xf32>
    %30 = arith.addf %29, %1 : vector<128x128xf32>
    %cst_31 = arith.constant dense<0.000000e+00> : vector<128x256xf32>
    %31 = tpu.matmul %30, %11, %cst_31 {dimension_numbers = #tpu.dot_dimension_numbers<[1], [0], [0], [1], [0, 0, 1, 1], [], []>} : vector<128x128xf32>, vector<128x256xf32>, vector<128x256xf32> -> vector<128x256xf32>
    %32 = vector.broadcast %15 : vector<1x256xf32> to vector<128x256xf32>
    %33 = arith.addf %31, %32 : vector<128x256xf32>
    %cst_32 = arith.constant dense<0.000000e+00> : vector<256xf32>
    %34 = vector.multi_reduction <add>, %33, %cst_32 [0] : vector<128x256xf32> to vector<256xf32>
    %35 = vector.shape_cast %34 : vector<256xf32> to vector<1x256xf32>
    %cst_33 = arith.constant 1.280000e+02 : f32
    %36 = vector.broadcast %cst_33 : f32 to vector<1x256xf32>
    %37 = arith.divf %35, %36 : vector<1x256xf32>
    %38 = vector.broadcast %37 : vector<1x256xf32> to vector<128x256xf32>
    %39 = arith.subf %33, %38 : vector<128x256xf32>
    %40 = arith.mulf %39, %39 : vector<128x256xf32>
    %cst_34 = arith.constant dense<0.000000e+00> : vector<256xf32>
    %41 = vector.multi_reduction <add>, %40, %cst_34 [0] : vector<128x256xf32> to vector<256xf32>
    %42 = vector.shape_cast %41 : vector<256xf32> to vector<1x256xf32>
    %cst_35 = arith.constant 1.280000e+02 : f32
    %43 = vector.broadcast %cst_35 : f32 to vector<1x256xf32>
    %44 = arith.divf %42, %43 : vector<1x256xf32>
    %45 = vector.broadcast %37 : vector<1x256xf32> to vector<128x256xf32>
    %46 = arith.subf %33, %45 : vector<128x256xf32>
    %cst_36 = arith.constant 9.99999974E-6 : f32
    %47 = vector.broadcast %cst_36 : f32 to vector<1x256xf32>
    %48 = arith.addf %44, %47 : vector<1x256xf32>
    %49 = math.rsqrt %48 : vector<1x256xf32>
    %50 = vector.broadcast %49 : vector<1x256xf32> to vector<128x256xf32>
    %51 = arith.mulf %46, %50 : vector<128x256xf32>
    %52 = vector.broadcast %16 : vector<1x256xf32> to vector<128x256xf32>
    %53 = arith.mulf %51, %52 : vector<128x256xf32>
    %54 = vector.broadcast %17 : vector<1x256xf32> to vector<128x256xf32>
    %55 = arith.addf %53, %54 : vector<128x256xf32>
    %cst_37 = arith.constant 0.000000e+00 : f32
    %56 = vector.broadcast %cst_37 : f32 to vector<128x256xf32>
    %57 = arith.maximumf %55, %56 : vector<128x256xf32>
    %cst_38 = arith.constant dense<0.000000e+00> : vector<128x128xf32>
    %58 = tpu.matmul %57, %14, %cst_38 {dimension_numbers = #tpu.dot_dimension_numbers<[1], [0], [0], [1], [0, 0, 1, 1], [], []>} : vector<128x256xf32>, vector<256x128xf32>, vector<128x128xf32> -> vector<128x128xf32>
    %59 = vector.broadcast %18 : vector<1x128xf32> to vector<128x128xf32>
    %60 = arith.addf %58, %59 : vector<128x128xf32>
    %cst_39 = arith.constant 0.000000e+00 : f32
    %61 = vector.broadcast %cst_39 : f32 to vector<128x128xf32>
    %62 = arith.maximumf %60, %61 : vector<128x128xf32>
    %cst_40 = arith.constant dense<0.000000e+00> : vector<256x128xf32>
    %63 = tpu.matmul %4, %62, %cst_40 {dimension_numbers = #tpu.dot_dimension_numbers<[1], [0], [0], [1], [0, 0, 1, 1], [], []>} : vector<256x128xf32>, vector<128x128xf32>, vector<256x128xf32> -> vector<256x128xf32>
    %c0_41 = arith.constant 0 : index
    %c0_42 = arith.constant 0 : index
    %c0_43 = arith.constant 0 : index
    %64 = vector.load %arg6[%c0_41, %c0_42, %c0_43] : memref<1x256x128xf32, #tpu.memory_space<vmem>>, vector<1x256x128xf32>
    %65 = vector.shape_cast %64 : vector<1x256x128xf32> to vector<256x128xf32>
    %66 = arith.addf %63, %65 : vector<256x128xf32>
    %cst_44 = arith.constant 0.000000e+00 : f32
    %67 = vector.broadcast %cst_44 : f32 to vector<256x128xf32>
    %68 = arith.maximumf %66, %67 : vector<256x128xf32>
    %cst_45 = arith.constant dense<0.000000e+00> : vector<128x128xf32>
    %69 = tpu.matmul %7, %68, %cst_45 {dimension_numbers = #tpu.dot_dimension_numbers<[1], [0], [0], [1], [0, 0, 1, 1], [], []>} : vector<128x256xf32>, vector<256x128xf32>, vector<128x128xf32> -> vector<128x128xf32>
    %70 = arith.addf %69, %62 : vector<128x128xf32>
    %cst_46 = arith.constant dense<0.000000e+00> : vector<128x128xf32>
    %71 = tpu.matmul %70, %12, %cst_46 {dimension_numbers = #tpu.dot_dimension_numbers<[1], [0], [0], [1], [0, 0, 1, 1], [], []>} : vector<128x128xf32>, vector<128x128xf32>, vector<128x128xf32> -> vector<128x128xf32>
    %72 = vector.broadcast %19 : vector<1x128xf32> to vector<128x128xf32>
    %73 = arith.addf %71, %72 : vector<128x128xf32>
    %cst_47 = arith.constant dense<0.000000e+00> : vector<128xf32>
    %74 = vector.multi_reduction <add>, %73, %cst_47 [0] : vector<128x128xf32> to vector<128xf32>
    %75 = vector.shape_cast %74 : vector<128xf32> to vector<1x128xf32>
    %cst_48 = arith.constant 1.280000e+02 : f32
    %76 = vector.broadcast %cst_48 : f32 to vector<1x128xf32>
    %77 = arith.divf %75, %76 : vector<1x128xf32>
    %78 = vector.broadcast %77 : vector<1x128xf32> to vector<128x128xf32>
    %79 = arith.subf %73, %78 : vector<128x128xf32>
    %80 = arith.mulf %79, %79 : vector<128x128xf32>
    %cst_49 = arith.constant dense<0.000000e+00> : vector<128xf32>
    %81 = vector.multi_reduction <add>, %80, %cst_49 [0] : vector<128x128xf32> to vector<128xf32>
    %82 = vector.shape_cast %81 : vector<128xf32> to vector<1x128xf32>
    %cst_50 = arith.constant 1.280000e+02 : f32
    %83 = vector.broadcast %cst_50 : f32 to vector<1x128xf32>
    %84 = arith.divf %82, %83 : vector<1x128xf32>
    %85 = vector.broadcast %77 : vector<1x128xf32> to vector<128x128xf32>
    %86 = arith.subf %73, %85 : vector<128x128xf32>
    %cst_51 = arith.constant 9.99999974E-6 : f32
    %87 = vector.broadcast %cst_51 : f32 to vector<1x128xf32>
    %88 = arith.addf %84, %87 : vector<1x128xf32>
    %89 = math.rsqrt %88 : vector<1x128xf32>
    %90 = vector.broadcast %89 : vector<1x128xf32> to vector<128x128xf32>
    %91 = arith.mulf %86, %90 : vector<128x128xf32>
    %92 = vector.broadcast %20 : vector<1x128xf32> to vector<128x128xf32>
    %93 = arith.mulf %91, %92 : vector<128x128xf32>
    %94 = vector.broadcast %21 : vector<1x128xf32> to vector<128x128xf32>
    %95 = arith.addf %93, %94 : vector<128x128xf32>
    %cst_52 = arith.constant 0.000000e+00 : f32
    %96 = vector.broadcast %cst_52 : f32 to vector<128x128xf32>
    %97 = arith.maximumf %95, %96 : vector<128x128xf32>
    %cst_53 = arith.constant dense<0.000000e+00> : vector<128x128xf32>
    %98 = tpu.matmul %97, %13, %cst_53 {dimension_numbers = #tpu.dot_dimension_numbers<[1], [0], [0], [1], [0, 0, 1, 1], [], []>} : vector<128x128xf32>, vector<128x128xf32>, vector<128x128xf32> -> vector<128x128xf32>
    %99 = vector.broadcast %22 : vector<1x128xf32> to vector<128x128xf32>
    %100 = arith.addf %98, %99 : vector<128x128xf32>
    %cst_54 = arith.constant 0.000000e+00 : f32
    %101 = vector.broadcast %cst_54 : f32 to vector<128x128xf32>
    %102 = arith.maximumf %100, %101 : vector<128x128xf32>
    %cst_55 = arith.constant dense<0.000000e+00> : vector<8x128xf32>
    %103 = tpu.matmul %10, %102, %cst_55 {dimension_numbers = #tpu.dot_dimension_numbers<[1], [0], [0], [1], [0, 0, 1, 1], [], []>} : vector<8x128xf32>, vector<128x128xf32>, vector<8x128xf32> -> vector<8x128xf32>
    %c0_56 = arith.constant 0 : index
    %c0_57 = arith.constant 0 : index
    %c0_58 = arith.constant 0 : index
    %104 = vector.load %arg10[%c0_56, %c0_57, %c0_58] : memref<1x8x128xf32, #tpu.memory_space<vmem>>, vector<1x8x128xf32>
    %105 = vector.shape_cast %104 : vector<1x8x128xf32> to vector<8x128xf32>
    %106 = vector.shape_cast %103 : vector<8x128xf32> to vector<1x8x128xf32>
    tpu.vector_store %arg10[%c0_56, %c0_57, %c0_58], %106 {strides = array<i32>} : memref<1x8x128xf32, #tpu.memory_space<vmem>>, vector<1x8x128xf32>,
    return
  }
  func.func @transform_0(%arg0: i32) -> (i32, i32, i32) {
    %c0_i32 = arith.constant 0 : i32
    %c0_i32_0 = arith.constant 0 : i32
    %c0_i32_1 = arith.constant 0 : i32
    return %arg0, %c0_i32, %c0_i32_0 : i32, i32, i32
  }
  func.func @transform_1(%arg0: i32) -> (i32, i32, i32) {
    %c0_i32 = arith.constant 0 : i32
    %c0_i32_0 = arith.constant 0 : i32
    %c0_i32_1 = arith.constant 0 : i32
    return %arg0, %c0_i32, %c0_i32_0 : i32, i32, i32
  }
  func.func @transform_2(%arg0: i32) -> (i32, i32, i32) {
    %c0_i32 = arith.constant 0 : i32
    %c0_i32_0 = arith.constant 0 : i32
    %c0_i32_1 = arith.constant 0 : i32
    return %arg0, %c0_i32, %c0_i32_0 : i32, i32, i32
  }
  func.func @transform_3(%arg0: i32) -> (i32, i32, i32) {
    %c0_i32 = arith.constant 0 : i32
    %c0_i32_0 = arith.constant 0 : i32
    %c0_i32_1 = arith.constant 0 : i32
    return %arg0, %c0_i32, %c0_i32_0 : i32, i32, i32
  }
  func.func @transform_4(%arg0: i32) -> (i32, i32, i32) {
    %c0_i32 = arith.constant 0 : i32
    %c0_i32_0 = arith.constant 0 : i32
    %c0_i32_1 = arith.constant 0 : i32
    return %arg0, %c0_i32, %c0_i32_0 : i32, i32, i32
  }
  func.func @transform_5(%arg0: i32) -> (i32, i32, i32) {
    %c0_i32 = arith.constant 0 : i32
    %c0_i32_0 = arith.constant 0 : i32
    %c0_i32_1 = arith.constant 0 : i32
    return %arg0, %c0_i32, %c0_i32_0 : i32, i32, i32
  }
  func.func @transform_6(%arg0: i32) -> (i32, i32) {
    %c0_i32 = arith.constant 0 : i32
    %c0_i32_0 = arith.constant 0 : i32
    %c0_i32_1 = arith.constant 0 : i32
    return %c0_i32, %c0_i32_0 : i32, i32
  }
  func.func @transform_7(%arg0: i32) -> (i32, i32) {
    %c0_i32 = arith.constant 0 : i32
    %c0_i32_0 = arith.constant 0 : i32
    %c0_i32_1 = arith.constant 0 : i32
    return %c0_i32, %c0_i32_0 : i32, i32
  }
  func.func @transform_8(%arg0: i32) -> (i32, i32) {
    %c0_i32 = arith.constant 0 : i32
    %c0_i32_0 = arith.constant 0 : i32
    %c0_i32_1 = arith.constant 0 : i32
    return %c0_i32, %c0_i32_0 : i32, i32
  }
  func.func @transform_9(%arg0: i32) -> (i32, i32, i32) {
    %c0_i32 = arith.constant 0 : i32
    %c0_i32_0 = arith.constant 0 : i32
    %c0_i32_1 = arith.constant 0 : i32
    return %arg0, %c0_i32, %c0_i32_0 : i32, i32, i32
  }
}

</mosaic_0001>

<bundles_post_ra>
// kernel: tpu_custom_call.1
= control target key start
LH: loop header
LB: loop body
LE: loop exit
PB: predicated region body
PF: predicated region fallthrough
CT: control target
= control target key end

     0   :  { %s6464_s0 = inlined_call_operand.hbm [shape: f32[4,128,128], index: 0, kind: input, shape index: {}]   ;;  %s6465_s1 = inlined_call_operand.hbm [shape: bf16[4,256,128], index: 1, kind: input, shape index: {}]   ;;  %s6466_s2 = inlined_call_operand.hbm [shape: bf16[4,128,256], index: 2, kind: input, shape index: {}]   ;;  %s6467_s3 = inlined_call_operand.hbm [shape: bf16[4,8,128], index: 3, kind: input, shape index: {}]   ;;  %s6468_s4 = inlined_call_operand.hbm [shape: f32[4,256,128], index: 4, kind: input, shape index: {}]   ;;  %s6469_s5 = inlined_call_operand.hbm [shape: f32[4,256,128], index: 5, kind: input, shape index: {}]   ;;  %s6470_s6 = inlined_call_operand.hbm [shape: f32[128,512], index: 6, kind: input, shape index: {}]   ;;  %s6471_s7 = inlined_call_operand.hbm [shape: f32[256,128], index: 7, kind: input, shape index: {}]   ;;  %s6472_s8 = inlined_call_operand.vmem [shape: f32[8,256], index: 8, kind: input, shape index: {}]   ;;  %s6473_s9 = inlined_call_operand.hbm [shape: f32[4,8,128], index: 9, kind: output, shape index: {}]  }
   0x1   :  { %6608 = sst [smem:[#allocation55_spill]] %s6465_s1 }
   0x2   :  { %6609 = sst [smem:[#allocation56_spill]] %s6470_s6 }
   0x3   :  { %6610 = sst [smem:[#allocation57_spill]] %s6472_s8 }
   0x4   :  { %6611 = sst [smem:[#allocation58_spill]] %s6473_s9 }
   0x5   :  { %14 = vsyncpa [#allocation3], 0 }
   0x6   :  { %16 = vsyncpa [#allocation3 + $0x1], 0 }
   0x7   :  { %17 = vsyncpa [#allocation6], 0 }
   0x8   :  { %19 = vsyncpa [#allocation6 + $0x1], 0 }
   0x9   :  { %20 = vsyncpa [#allocation9], 0 }
   0xa   :  { %22 = vsyncpa [#allocation9 + $0x1], 0 }
   0xb   :  { %23 = vsyncpa [#allocation12], 0 }
   0xc   :  { %25 = vsyncpa [#allocation12 + $0x1], 0 }
   0xd   :  { %26 = vsyncpa [#allocation15], 0 }
   0xe   :  { %27 = vsyncpa [#allocation4], 0 }
   0xf   :  { %29 = vsyncpa [#allocation4 + $0x1], 0  ;;  %s4671_s30 = smov 0   ;;  %s4673_s10 = smov 0  }
  0x10   :  { %s4675_s11 = smov 0   ;;  %s4677_s12 = smov 0  }
  0x11 LB: > { %6612 = sst [smem:[#allocation24_spill]] %s4589_s30  ;;  %s4692_s13 = sadd.s32 4294967295, %s4601_s12   ;;  %s4601_s12 = sphi %s4677_s12, %s6764_s12   ;;  %s4597_s11 = sphi %s4675_s11, %s6766_s11   ;;  %s4593_s10 = sphi %s4673_s10, %s6768_s10   ;;  %s4589_s30 = sphi %s4671_s30, %s6767_s30  }
  0x12   : > { %6613 = sst [smem:[#allocation25_spill]] %s4597_s11  ;;  %s3046_s14 = sadd.s32 4294967294, %s4601_s12  }
  0x13   : > { %6614 = sst [smem:[#allocation26_spill]] %s4692_s13  ;;  %s4696_s15 = sadd.s32 1, %s4601_s12  }
  0x14   : > { %6615 = sst [smem:[#allocation27_spill]] %s4696_s15  ;;  %s42_s16 = sadd.s32 1, %s4597_s11 }
  0x15   : > { %s39_s17 = ssub.s32 %s4601_s12, %s4696_s15  ;;  %p49_p0 = scmp.ne.s32.totalorder %s4597_s11, %s4593_s10 }
  0x16   : > { %p40_p1 = scmp.eq.s32.totalorder %s39_s17, 0  ;;  %p50_p2 = scmp.eq.s32.totalorder %s4601_s12, 0 }
  0x17   : > { %p55_p3 = scmp.ne.s32.totalorder %s4593_s10, %s4589_s30  ;;  %p6477_p4 = scmp.eq.s32.totalorder %s4692_s13, 0 }
  0x18   : > { %s4708_s18 = scalar_select %p40_p1, %s4597_s11, %s42_s16  }
  0x19   : > { %p4710_p5 = por %p50_p2, %p49_p0  ;;  %p4716_p6 = por %p6477_p4, %p55_p3 }
  0x1a   : > { %6616 = sst [smem:[#allocation28_spill]] %s4708_s18  ;;  %p272_p7 = scmp.eq.s32.totalorder %s4692_s13, 3 }
  0x1b   : > { %s6617_s19 = scalar_select %p4710_p5, 1, 0 }
  0x1c   : > { %s6618_s20 = scalar_select %p4716_p6, 1, 0 }
  0x1d   : > { %p278_p8 = scmp.eq.s32.totalorder %s3046_s14, 3  ;;  %p3047_p9 = scmp.ge.s32.totalorder %s4601_s12, 1 }
  0x1e   : > { %6619 = sst [smem:[#allocation29_spill]] %s6618_s20  ;;  %p285_p10 = scmp.lt.s32.totalorder %s4601_s12, 5 }
  0x1f   : > { %p4723_p11 = por %p272_p7, %p49_p0  ;;  %p4727_p12 = por %p278_p8, %p55_p3 }
  0x20   : > { %p4731_p13 = pnand %p3047_p9, %p285_p10  ;;  %s4603_s24 = smov [#allocation13]  }
  0x21   : > { %s6620_s21 = scalar_select %p4723_p11, 1, 0 }
  0x22   : > { %s6622_s22 = scalar_select %p4727_p12, 1, 0 }
  0x23   : > { %6621 = sst [smem:[#allocation30_spill]] %s6620_s21  ;;  %p4194_p1 = pneg %p4731_p13 }
  0x24   : > { %6623 = sst [smem:[#allocation31_spill]] %s6622_s22  ;;  %s297_s25 = sshll.u32 %s4603_s24, 4  ;;  %s298_s25 = int_to_ptr.vmem [resolvable:$true] %s297_s25 }
  0x25   : > { %s6624_s23 = scalar_select %p4731_p13, 1, 0 }
  0x26   : > { %p4739_p2 = pnand %p4194_p1, %p6477_p4  ;;  %s4745_s27 = sand.u32 1, %s4597_s11  }
  0x27   : > { %s4748_s28 = sshll.u32 %s4745_s27, 7  ;;  %s6626_s6 = sld [smem:[#allocation56_spill]] }
  0x28   : > { %s6625_s26 = scalar_select %p4739_p2, 1, 0 }
  0x29   : > { %p6483_p7 = pneg %p4739_p2 }
  0x2d   : > { %s4279_s16 = scalar_lea.hbm %s6626_s6, 8192 }
  0x2e   : > { %p4280_p3 = scmp.ne.s32.totalorder %s6626_s6, %s4279_s16  ;;  %p4286_p10 = scmp.lt.u32.totalorder %s4279_s16, %s6626_s6 }
  0x30   : > { %p4282_p8 = pnand %p6483_p7, %p4280_p3 }
  0x32   : > { %p4283_p9 = pneg %p4282_p8 }
  0x34   : > { %p4288_p1 = pnand %p4286_p10, %p4283_p9 }
  0x36   : > { %4291 = shalt.err (!%p4288_p1)
}
  0x37   : > { %s4292_s15 = scalar_lea.vmem %s298_s25, 8192  ;;  %p4300_p11 = scmp.lt.s32.totalorder %s298_s25, %s298_s25 }
  0x38   : > { %p4293_p4 = scmp.ne.s32.totalorder %s298_s25, %s4292_s15  ;;  %p4301_p6 = scmp.lt.s32.totalorder %s4292_s15, %s4292_s15 }
  0x3a   : > { %p4295_p0 = pnand %p4293_p4, %p6483_p7  ;;  %p4302_p13 = por %p4301_p6, %p4300_p11 }
  0x3c   : > { %p4296_p12 = pneg %p4295_p0 }
  0x3e   : > { %p4303_p5 = pnand %p4302_p13, %p4296_p12 }
  0x40   : > { %4306 = shalt.err (!%p4303_p5)
}
  0x41   : > { %s4604_s29 = smov 512   ;;  %s4605_s11 = smov 32  }
  0x42   : > { %4197 = dma.hbm_to_vmem [thread:$0]  (!%p4739_p2), %s6626_s6, 8192, %s298_s25, [#allocation12], %s4604_s29, %s4604_s29, %s4605_s11  }
  0x43   : > { %p6627_p4 = scmp.ne.s32.totalorder %s6617_s19, 0  ;;  %p6628_p0 = scmp.lt.s32.totalorder %s4601_s12, 4 }
  0x44   : > { %s4781_s16 = sshll.u32 %s4601_s12, 11  ;;  %s4784_s17 = sand.u32 1, %s4601_s12  }
  0x45   : > { %p4776_p3 = pnand %p6628_p0, %p6627_p4  ;;  %s6630_s1 = sld [smem:[#allocation55_spill]] }
  0x46   : > { %s352_s19 = scalar_lea.vmem [#allocation5], %s4748_s28 }
  0x47   : > { %s6629_s15 = scalar_select %p4776_p3, 1, 0 }
  0x48   : > { %s359_s25 = sshll.u32 %s352_s19, 4  ;;  %p4800_p6 = pneg %p4776_p3  ;;  %s4793_s25 = int_to_ptr.vmem [resolvable:$true] %s359_s25 }
  0x4a   : > { %s6631_s18 = scalar_select %p4800_p6, 1, 0 }
  0x4b   : > { %s4790_s30 = scalar_lea.hbm %s6630_s1, %s4781_s16  ;;  %s4312_s24 = scalar_lea.hbm %s6630_s1, 8192 }
  0x4c   : > { %s4307_s11 = scalar_lea.hbm %s4790_s30, 2048  ;;  %p4313_p13 = scmp.lt.u32.totalorder %s4790_s30, %s6630_s1 }
  0x4d   : > { %p4308_p5 = scmp.ne.s32.totalorder %s4790_s30, %s4307_s11  ;;  %p4314_p8 = scmp.lt.u32.totalorder %s4312_s24, %s4307_s11 }
  0x4e   : > { %p4316_p10 = scmp.lt.u32.totalorder %s4307_s11, %s4790_s30 }
  0x4f   : > { %p4310_p11 = pnand %p4800_p6, %p4308_p5  ;;  %p4315_p9 = por %p4314_p8, %p4313_p13 }
  0x51   : > { %p4311_p12 = pneg %p4310_p11  ;;  %p4317_p1 = por %p4316_p10, %p4315_p9 }
  0x53   : > { %p4318_p4 = pnand %p4317_p1, %p4311_p12 }
  0x55   : > { %4321 = shalt.err (!%p4318_p4)
}
  0x56   : > { %s4322_s29 = scalar_lea.vmem %s4793_s25, 2048  ;;  %s4606_s22 = smov [#allocation5]  }
  0x57   : > { %p4323_p0 = scmp.ne.s32.totalorder %s4793_s25, %s4322_s29  ;;  %s4327_s14 = sshll.u32 %s4606_s22, 4  ;;  %s4328_s14 = int_to_ptr.vmem [resolvable:$false] %s4327_s14 }
  0x58   : > { %s4329_s6 = scalar_lea.vmem %s4328_s14, 4096  ;;  %p4330_p7 = scmp.lt.s32.totalorder %s4793_s25, %s4328_s14 }
  0x59   : > { %p4325_p5 = pnand %p4323_p0, %p4800_p6  ;;  %p4331_p2 = scmp.lt.s32.totalorder %s4329_s6, %s4322_s29 }
  0x5b   : > { %p4326_p11 = pneg %p4325_p5  ;;  %p4332_p13 = por %p4331_p2, %p4330_p7 }
  0x5d   : > { %p4333_p8 = pnand %p4332_p13, %p4326_p11 }
  0x5f   : > { %4336 = shalt.err (!%p4333_p8)
}
  0x60   : > { %s4607_s11 = smov 64   ;;  %s4608_s24 = smov 4  }
  0x61   : > { %s6632_s19 = scalar_lea.sflag [#allocation6], %s4784_s17  ;;  %s3060_s22 = sshll.u32 %s4745_s27, 2 }
  0x62   : > { %4207 = dma.hbm_to_vmem [thread:$0]  (!%p4776_p3), %s4790_s30, 2048, %s4793_s25, %s6632_s19, %s4607_s11, %s4607_s11, %s4608_s24  }
  0x63   : > { %s3061_s1 = sshll.u32 %s4601_s12, 6  ;;  %s394_s9 = scalar_lea.vmem [#allocation8], %s3060_s22 }
  0x64   : > { %s4830_s6 = scalar_lea.hbm %s6467_s3, %s3061_s1  ;;  %s401_s21 = sshll.u32 %s394_s9, 4  ;;  %s4832_s21 = int_to_ptr.vmem [resolvable:$true] %s401_s21 }
  0x65   : > { %s4609_s8 = smov [#allocation14]   ;;  %s391_s20 = scalar_lea.sflag [#allocation9], %s4784_s17 }
  0x66   : > { %s4834_s13 = sshll.u32 %s4609_s8, 4  ;;  %s4337_s30 = scalar_lea.hbm %s4830_s6, 64  ;;  %s311_s13 = int_to_ptr.vmem [resolvable:$true] %s4834_s13 }
  0x67   : > { %p4338_p2 = scmp.ne.s32.totalorder %s4830_s6, %s4337_s30  ;;  %s4342_s11 = scalar_lea.hbm %s6467_s3, 256 }
  0x68   : > { %p4343_p9 = scmp.lt.u32.totalorder %s4830_s6, %s6467_s3  ;;  %p4344_p10 = scmp.lt.u32.totalorder %s4342_s11, %s4337_s30 }
  0x69   : > { %p4340_p7 = pnand %p4338_p2, %p4800_p6  ;;  %p4346_p4 = scmp.lt.u32.totalorder %s4337_s30, %s4830_s6 }
  0x6a   : > { %p4345_p1 = por %p4344_p10, %p4343_p9 }
  0x6b   : > { %p4341_p12 = pneg %p4340_p7 }
  0x6c   : > { %p4347_p0 = por %p4346_p4, %p4345_p1 }
  0x6e   : > { %p4348_p5 = pnand %p4347_p0, %p4341_p12 }
  0x70   : > { %4351 = shalt.err (!%p4348_p5)
}
  0x71   : > { %s4352_s8 = scalar_lea.vmem %s4832_s21, 64  ;;  %s4610_s9 = smov [#allocation8]  }
  0x72   : > { %p4353_p11 = scmp.ne.s32.totalorder %s4832_s21, %s4352_s8  ;;  %s4357_s22 = sshll.u32 %s4610_s9, 4  ;;  %s4358_s22 = int_to_ptr.vmem [resolvable:$false] %s4357_s22 }
  0x73   : > { %s4359_s14 = scalar_lea.vmem %s4358_s22, 128  ;;  %p4360_p2 = scmp.lt.s32.totalorder %s4832_s21, %s4358_s22 }
  0x74   : > { %p4355_p13 = pnand %p4353_p11, %p4800_p6  ;;  %p4361_p7 = scmp.lt.s32.totalorder %s4359_s14, %s4352_s8 }
  0x76   : > { %p4356_p8 = pneg %p4355_p13  ;;  %p4362_p9 = por %p4361_p7, %p4360_p2 }
  0x78   : > { %p4363_p10 = pnand %p4362_p9, %p4356_p8 }
  0x7a   : > { %4366 = shalt.err (!%p4363_p10)
}
  0x7b   : > { %4213 = dma.hbm_to_vmem [thread:$0]  (!%p4776_p3), %s4830_s6, 64, %s4832_s21, %s391_s20  }
  0x7c   : > { %s4367_s25 = scalar_lea.hbm %s6471_s7, 4096  ;;  %p6633_p1 = scmp.ne.s32.totalorder %s6625_s26, 0 }
  0x7d   : > { %p4368_p12 = scmp.ne.s32.totalorder %s6471_s7, %s4367_s25  ;;  %p4374_p11 = scmp.lt.u32.totalorder %s4367_s25, %s6471_s7 }
  0x7e   : > { %p6634_p4 = pneg %p6633_p1 }
  0x80   : > { %p4370_p0 = pnand %p4368_p12, %p6634_p4 }
  0x82   : > { %p4371_p5 = pneg %p4370_p0 }
  0x84   : > { %p4376_p13 = pnand %p4374_p11, %p4371_p5 }
  0x86   : > { %4379 = shalt.err (!%p4376_p13)
}
  0x87   : > { %s4380_s21 = scalar_lea.vmem %s311_s13, 4096  ;;  %p6635_p2 = pmov %p6634_p4 }
  0x88   : > { %p4381_p8 = scmp.ne.s32.totalorder %s311_s13, %s4380_s21  ;;  %p4388_p10 = scmp.lt.s32.totalorder %s311_s13, %s311_s13 }
  0x89   : > { %p4389_p3 = scmp.lt.s32.totalorder %s4380_s21, %s4380_s21 }
  0x8a   : > { %p4383_p7 = pnand %p4381_p8, %p6635_p2 }
  0x8b   : > { %p4390_p6 = por %p4389_p3, %p4388_p10 }
  0x8c   : > { %p4384_p9 = pneg %p4383_p7 }
  0x8e   : > { %p4391_p4 = pnand %p4390_p6, %p4384_p9 }
  0x90   : > { %4394 = shalt.err (!%p4391_p4)
}
  0x91   : > { %s4611_s6 = smov 128   ;;  %s4612_s8 = smov 8  }
  0x92   : > { %4200 = dma.hbm_to_vmem [thread:$0]  (!%p6633_p1), %s6471_s7, 4096, %s311_s13, [#allocation15], %s4611_s6, %s4611_s6, %s4612_s8  }
  0x93   : > { %s4888_s30 = scalar_lea.hbm %s6464_s0, %s4781_s16  ;;  %s331_s25 = scalar_lea.vmem [#allocation2], %s4748_s28 }
  0x94   : > { %s338_s1 = sshll.u32 %s331_s25, 4  ;;  %s4897_s24 = scalar_lea.hbm %s6466_s2, %s4781_s16  ;;  %s4891_s1 = int_to_ptr.vmem [resolvable:$true] %s338_s1 }
  0x95   : > { %s328_s19 = scalar_lea.sflag [#allocation3], %s4745_s27  ;;  %s4395_s13 = scalar_lea.hbm %s4888_s30, 2048 }
  0x96   : > { %p4396_p3 = scmp.ne.s32.totalorder %s4888_s30, %s4395_s13  ;;  %p6636_p6 = scmp.ne.s32.totalorder %s6631_s18, 0 }
  0x97   : > { %s4400_s22 = scalar_lea.hbm %s6464_s0, 8192  ;;  %p4401_p0 = scmp.lt.u32.totalorder %s4888_s30, %s6464_s0 }
  0x98   : > { %p4398_p12 = pnand %p4396_p3, %p6636_p6  ;;  %p4402_p5 = scmp.lt.u32.totalorder %s4400_s22, %s4395_s13 }
  0x99   : > { %p4404_p13 = scmp.lt.u32.totalorder %s4395_s13, %s4888_s30 }
  0x9a   : > { %p4399_p1 = pneg %p4398_p12  ;;  %p4403_p11 = por %p4402_p5, %p4401_p0 }
  0x9c   : > { %p4405_p8 = por %p4404_p13, %p4403_p11 }
  0x9e   : > { %p4406_p2 = pnand %p4405_p8, %p4399_p1 }
  0xa0   : > { %4409 = shalt.err (!%p4406_p2)
}
  0xa1   : > { %s4410_s16 = scalar_lea.vmem %s4891_s1, 2048  ;;  %s4613_s25 = smov [#allocation2]  }
  0xa2   : > { %p4411_p7 = scmp.ne.s32.totalorder %s4891_s1, %s4410_s16  ;;  %s4415_s26 = sshll.u32 %s4613_s25, 4  ;;  %s4416_s26 = int_to_ptr.vmem [resolvable:$false] %s4415_s26 }
  0xa3   : > { %s4417_s11 = scalar_lea.vmem %s4416_s26, 4096  ;;  %p4418_p4 = scmp.lt.s32.totalorder %s4891_s1, %s4416_s26 }
  0xa4   : > { %p4413_p9 = pnand %p4411_p7, %p6636_p6  ;;  %p4419_p3 = scmp.lt.s32.totalorder %s4417_s11, %s4410_s16 }
  0xa6   : > { %p4414_p10 = pneg %p4413_p9  ;;  %p4420_p12 = por %p4419_p3, %p4418_p4 }
  0xa8   : > { %p4421_p0 = pnand %p4420_p12, %p4414_p10 }
  0xaa   : > { %4424 = shalt.err (!%p4421_p0)
}
  0xab   : > { %p6637_p1 = scmp.ne.s32.totalorder %s6629_s15, 0  ;;  %s373_s13 = scalar_lea.vmem [#allocation7], %s4748_s28 }
  0xac   : > { %s380_s21 = sshll.u32 %s373_s13, 4  ;;  %s3062_s9 = sshll.u32 %s4745_s27, 8  ;;  %s4928_s21 = int_to_ptr.vmem [resolvable:$true] %s380_s21 }
  0xad   : > { %4204 = dma.hbm_to_vmem [thread:$0]  (!%p6637_p1), %s4888_s30, 2048, %s4891_s1, %s328_s19, %s4611_s6, %s4611_s6, %s4612_s8  }
  0xae   : > { %s4425_s22 = scalar_lea.hbm %s4897_s24, 2048  ;;  %s4430_s16 = scalar_lea.hbm %s6466_s2, 8192 }
  0xaf   : > { %p4426_p5 = scmp.ne.s32.totalorder %s4897_s24, %s4425_s22  ;;  %p4431_p8 = scmp.lt.u32.totalorder %s4897_s24, %s6466_s2 }
  0xb0   : > { %p4432_p2 = scmp.lt.u32.totalorder %s4430_s16, %s4425_s22  ;;  %p4434_p9 = scmp.lt.u32.totalorder %s4425_s22, %s4897_s24 }
  0xb1   : > { %p4428_p11 = pnand %p4426_p5, %p6636_p6 }
  0xb2   : > { %p4433_p7 = por %p4432_p2, %p4431_p8 }
  0xb3   : > { %p4429_p13 = pneg %p4428_p11 }
  0xb4   : > { %p4435_p10 = por %p4434_p9, %p4433_p7 }
  0xb6   : > { %p4436_p4 = pnand %p4435_p10, %p4429_p13 }
  0xb8   : > { %4439 = shalt.err (!%p4436_p4)
}
  0xb9   : > { %s4440_s28 = scalar_lea.vmem %s4928_s21, 2048  ;;  %s4614_s30 = smov [#allocation7]  }
  0xba   : > { %p4441_p3 = scmp.ne.s32.totalorder %s4928_s21, %s4440_s28  ;;  %s4445_s1 = sshll.u32 %s4614_s30, 4  ;;  %s4446_s1 = int_to_ptr.vmem [resolvable:$false] %s4445_s1 }
  0xbb   : > { %s4447_s19 = scalar_lea.vmem %s4446_s1, 4096  ;;  %p4448_p5 = scmp.lt.s32.totalorder %s4928_s21, %s4446_s1 }
  0xbc   : > { %p4443_p12 = pnand %p4441_p3, %p6636_p6  ;;  %p4449_p11 = scmp.lt.s32.totalorder %s4447_s19, %s4440_s28 }
  0xbe   : > { %p4444_p0 = pneg %p4443_p12  ;;  %p4450_p8 = por %p4449_p11, %p4448_p5 }
  0xc0   : > { %p4451_p2 = pnand %p4450_p8, %p4444_p0 }
  0xc2   : > { %4454 = shalt.err (!%p4451_p2)
}
  0xc3   : > { %s6638_s11 = scalar_lea.sflag [#allocation6], %s4784_s17  ;;  %s3087_s13 = sshll.u32 %s4601_s12, 12 }
  0xc4   : > { %4210 = dma.hbm_to_vmem [thread:$0]  (!%p6637_p1), %s4897_s24, 2048, %s4928_s21, %s6638_s11, %s4611_s6, %s4611_s6, %s4612_s8  }
  0xc5   : > { %s412_s22 = scalar_lea.vmem [#allocation10], %s3062_s9  ;;  %s4964_s25 = scalar_lea.hbm %s6468_s4, %s3087_s13 }
  0xc6   : > { %s419_s14 = sshll.u32 %s412_s22, 4  ;;  %s4455_s26 = scalar_lea.hbm %s4964_s25, 4096  ;;  %s4966_s14 = int_to_ptr.vmem [resolvable:$true] %s419_s14 }
  0xc7   : > { %p4456_p13 = scmp.ne.s32.totalorder %s4964_s25, %s4455_s26  ;;  %s4460_s28 = scalar_lea.hbm %s6468_s4, 16384 }
  0xc8   : > { %p4461_p10 = scmp.lt.u32.totalorder %s4964_s25, %s6468_s4  ;;  %p4462_p4 = scmp.lt.u32.totalorder %s4460_s28, %s4455_s26 }
  0xc9   : > { %p4458_p7 = pnand %p4456_p13, %p6636_p6  ;;  %p4464_p12 = scmp.lt.u32.totalorder %s4455_s26, %s4964_s25 }
  0xca   : > { %p4463_p3 = por %p4462_p4, %p4461_p10 }
  0xcb   : > { %p4459_p9 = pneg %p4458_p7 }
  0xcc   : > { %p4465_p0 = por %p4464_p12, %p4463_p3 }
  0xce   : > { %p4466_p5 = pnand %p4465_p0, %p4459_p9 }
  0xd0   : > { %4469 = shalt.err (!%p4466_p5)
}
  0xd1   : > { %s4470_s19 = scalar_lea.vmem %s4966_s14, 4096  ;;  %s4615_s11 = smov [#allocation10]  }
  0xd2   : > { %p4471_p11 = scmp.ne.s32.totalorder %s4966_s14, %s4470_s19  ;;  %s4475_s22 = sshll.u32 %s4615_s11, 4  ;;  %s4476_s22 = int_to_ptr.vmem [resolvable:$false] %s4475_s22 }
  0xd3   : > { %s4477_s29 = scalar_lea.vmem %s4476_s22, 8192  ;;  %p4478_p13 = scmp.lt.s32.totalorder %s4966_s14, %s4476_s22 }
  0xd4   : > { %p4473_p8 = pnand %p4471_p11, %p6636_p6  ;;  %p4479_p7 = scmp.lt.s32.totalorder %s4477_s29, %s4470_s19 }
  0xd6   : > { %p4474_p2 = pneg %p4473_p8  ;;  %p4480_p10 = por %p4479_p7, %p4478_p13 }
  0xd8   : > { %p4481_p4 = pnand %p4480_p10, %p4474_p2 }
  0xda   : > { %4484 = shalt.err (!%p4481_p4)
}
  0xdb   : > { %4216 = dma.hbm_to_vmem [thread:$0]  (!%p6637_p1), %s4964_s25, 4096, %s4966_s14, %s391_s20, %s4611_s6, %s4611_s6, %s4612_s8  }
  0xdc   : > { %s4999_s24 = scalar_lea.hbm %s6469_s5, %s3087_s13  ;;  %s433_s21 = scalar_lea.vmem [#allocation11], %s3062_s9 }
  0xdd   : > { %s440_s28 = sshll.u32 %s433_s21, 4  ;;  %s430_s30 = scalar_lea.sflag [#allocation12], %s4784_s17  ;;  %s5003_s28 = int_to_ptr.vmem [resolvable:$true] %s440_s28 }
  0xde   : > { %s4485_s1 = scalar_lea.hbm %s4999_s24, 4096  ;;  %s4490_s13 = scalar_lea.hbm %s6469_s5, 16384 }
  0xdf   : > { %p4486_p9 = scmp.ne.s32.totalorder %s4999_s24, %s4485_s1  ;;  %p4491_p0 = scmp.lt.u32.totalorder %s4999_s24, %s6469_s5 }
  0xe0   : > { %p4492_p5 = scmp.lt.u32.totalorder %s4490_s13, %s4485_s1  ;;  %p4494_p8 = scmp.lt.u32.totalorder %s4485_s1, %s4999_s24 }
  0xe1   : > { %p4488_p3 = pnand %p4486_p9, %p6636_p6 }
  0xe2   : > { %p4493_p11 = por %p4492_p5, %p4491_p0 }
  0xe3   : > { %p4489_p12 = pneg %p4488_p3 }
  0xe4   : > { %p4495_p2 = por %p4494_p8, %p4493_p11 }
  0xe6   : > { %p4496_p13 = pnand %p4495_p2, %p4489_p12 }
  0xe8   : > { %4499 = shalt.err (!%p4496_p13)
}
  0xe9   : > { %s4500_s9 = scalar_lea.vmem %s5003_s28, 4096  ;;  %s4616_s19 = smov [#allocation11]  }
  0xea   : > { %p4501_p7 = scmp.ne.s32.totalorder %s5003_s28, %s4500_s9  ;;  %s4505_s11 = sshll.u32 %s4616_s19, 4  ;;  %s4506_s11 = int_to_ptr.vmem [resolvable:$false] %s4505_s11 }
  0xeb   : > { %s4507_s22 = scalar_lea.vmem %s4506_s11, 8192  ;;  %p4508_p9 = scmp.lt.s32.totalorder %s5003_s28, %s4506_s11 }
  0xec   : > { %p4503_p10 = pnand %p4501_p7, %p6636_p6  ;;  %p4509_p3 = scmp.lt.s32.totalorder %s4507_s22, %s4500_s9 }
  0xee   : > { %p4504_p4 = pneg %p4503_p10  ;;  %p4510_p0 = por %p4509_p3, %p4508_p9 }
  0xf0   : > { %p4511_p5 = pnand %p4510_p0, %p4504_p4 }
  0xf2   : > { %4514 = shalt.err (!%p4511_p5)
}
  0xf3   : > { %4219 = dma.hbm_to_vmem [thread:$0]  (!%p6637_p1), %s4999_s24, 4096, %s5003_s28, %s430_s30, %s4611_s6, %s4611_s6, %s4612_s8  }
  0xf4   : > { %p6639_p6 = scmp.ne.s32.totalorder %s6624_s23, 0 }
  0xf6   : > { %452 = sbr.rel (%p6639_p6) target bundleno = 2813 (0xafd), region = 56 }
  0xfd   : > { %s6640_s18 = sld [smem:[#allocation29_spill]]  ;;  %s5035_s29 = sand.u32 1, %s4593_s10  }
  0xfe   : > { %s3069_s16 = sshll.u32 %s5035_s29, 7  ;;  %s455_s26 = scalar_lea.sflag [#allocation3], %s5035_s29 }
  0xff   : > { %s5039_s15 = scalar_lea.vmem [#allocation2], %s3069_s16 }
 0x103   : > { %p6641_p12 = scmp.ne.s32.totalorder %s6640_s18, 0 }
 0x105   : > { %4560 = dma.done.wait (%p6641_p12), %s455_s26, 2048  }
 0x106   : > { %4562 = vsyncadd (%p6641_p12), %s455_s26, 4294965248  ;;  %s6642_s17 = sld [smem:[#allocation26_spill]]  ;;  %s5046_s8 = scalar_lea.vmem [#allocation5], %s3069_s16 }
 0x10c   : > { %s463_s6 = sand.u32 1, %s6642_s17  }
 0x10d   : > { %s464_s23 = scalar_lea.sflag [#allocation6], %s463_s6 }
 0x10e   : > { %4564 = dma.done.wait (%p6641_p12), %s464_s23, 4096  }
 0x10f   : > { %4566 = vsyncadd (%p6641_p12), %s464_s23, 4294963200  ;;  %s3072_s24 = sshll.u32 %s5035_s29, 2  ;;  %s5053_s21 = scalar_lea.vmem [#allocation7], %s3069_s16 }
 0x110   : > { %s482_s28 = scalar_lea.sflag [#allocation9], %s463_s6  ;;  %s5055_s30 = scalar_lea.vmem [#allocation8], %s3072_s24 }
 0x111   : > { %4568 = dma.done.wait (%p6641_p12), %s482_s28, 4160  }
 0x112   : > { %4570 = vsyncadd (%p6641_p12), %s482_s28, 4294963136  ;;  %s3073_s1 = sshll.u32 %s5035_s29, 8  ;;  %s500_s14 = scalar_lea.sflag [#allocation12], %s463_s6 }
 0x113   : > { %s5062_s20 = scalar_lea.vmem [#allocation10], %s3073_s1  ;;  %s5064_s13 = scalar_lea.vmem [#allocation11], %s3073_s1 }
 0x114   : > { %4572 = dma.done.wait (%p6641_p12), %s500_s14, 4096  }
 0x115   : > { %4574 = vsyncadd (%p6641_p12), %s500_s14, 4294963200  ;;  %p6643_p1 = scmp.eq.s32.totalorder %s6642_s17, 0 }
 0x117   : > { %4576 = dma.done.wait (%p6643_p1), [#allocation12], 8192   ;;  %p6644_p11 = pmov %p6643_p1 }
 0x118   : > { %p6645_p8 = pmov %p6643_p1 }
 0x119   : > { %4578 = vsyncadd (%p6644_p11), [#allocation12], 4294959104 }
 0x11a   : > { %4580 = dma.done.wait (%p6645_p8), [#allocation15], 4096   ;;  %p6646_p2 = pmov %p6643_p1 }
 0x11b   : > { %v5079_v0 = vld [vmem:[%s5039_s15] sm:$0xff]  ;;  %v5082_v1 = vld [vmem:[%s5039_s15 + $0x8] sm:$0xff]  ;;  %v5085_v2 = vld [vmem:[%s5039_s15 + $0x10] sm:$0xff]  ;;  %s6670_s9 = sld [smem:[#allocation57_spill]]  ;;  %vm4619_vm0 = vmmov 0   ;;  %s3077_s14 = sshll.u32 %s5035_s29, 3 }
 0x11c   : > { %4582 = vsyncadd (%p6646_p2), [#allocation15], 4294963200  ;;  %v3892_v3 = vpack.c.bf16 %v5082_v1, %v5079_v0  ;;  %v5090_v4 = vld [vmem:[%s5039_s15 + $0x18] sm:$0xff]  ;;  %v5095_v6 = vld [vmem:[%s5039_s15 + $0x20] sm:$0xff]  ;;  %s3081_s27 = sshll.u32 %s6642_s17, 7  ;;  %s6759_s22 = sld [smem:[#allocation58_spill]] }
 0x11d   : > { %v3896_v5 = vpack.c.bf16 %v5090_v4, %v5085_v2  ;;  %v5098_v7 = vld [vmem:[%s5039_s15 + $0x28] sm:$0xff]  ;;  %v5103_v9 = vld [vmem:[%s5046_s8] sm:$0xff]   ;;  %v5106_v10 = vld [vmem:[%s5039_s15 + $0x30] sm:$0xff]  ;;  %s2835_s18 = scalar_lea.sflag [#allocation4], %s5035_s29  ;;  %s4620_s17 = smov [#allocation16]  }
 0x11e   : > { %3893 = vmatprep.subr.bf16.mxu0 %v3892_v3  ;;  %v3900_v8 = vpack.c.bf16 %v5098_v7, %v5095_v6  ;;  %v5109_v11 = vld [vmem:[%s5039_s15 + $0x38] sm:$0xff]  ;;  %v3091_v12 = vunpack.c.l.bf16 %v5103_v9  ;;  %v5117_v14 = vld [vmem:[%s5039_s15 + $0x40] sm:$0xff]  ;;  %v5120_v15 = vld [vmem:[%s5039_s15 + $0x48] sm:$0xff]  ;;  %v6528_v27 = vunpack.c.h.bf16 %v5103_v9  ;;  %s4519_s26 = sshll.u32 %s4620_s17, 4  ;;  %s4520_s26 = int_to_ptr.vmem [resolvable:$false] %s4519_s26 }
 0x11f   : > { %3895 = vmatpush3.bf16.msra.mxu0 %v3892_v3  ;;  %v3904_v13 = vpack.c.bf16 %v5109_v11, %v5106_v10  ;;  %v3908_v16 = vpack.c.bf16 %v5120_v15, %v5117_v14  ;;  %v5125_v17 = vld [vmem:[%s5039_s15 + $0x50] sm:$0xff]  ;;  %v5128_v18 = vld [vmem:[%s5039_s15 + $0x58] sm:$0xff]  ;;  %v5133_v20 = vld [vmem:[%s5039_s15 + $0x60] sm:$0xff] }
 0x120   : > { %3897 = vmatprep.subr.bf16.mxu0 %v3896_v5  ;;  %3617 = vmatprep.mubr.f32.mxu0 %v3091_v12  ;;  %v3912_v19 = vpack.c.bf16 %v5128_v18, %v5125_v17  ;;  %v5136_v21 = vld [vmem:[%s5039_s15 + $0x68] sm:$0xff]  ;;  %v5141_v23 = vld [vmem:[%s5039_s15 + $0x70] sm:$0xff]  ;;  %v5144_v24 = vld [vmem:[%s5039_s15 + $0x78] sm:$0xff]  ;;  %s4521_s15 = scalar_lea.vmem %s4520_s26, 256 }
 0x121   : > { %v3916_v22 = vpack.c.bf16 %v5136_v21, %v5133_v20  ;;  %v3920_v25 = vpack.c.bf16 %v5144_v24, %v5141_v23  ;;  %v5149_v26 = vld [vmem:[%s5046_s8 + $0x8] sm:$0xff]   ;;  %v5154_v29 = vld [vmem:[%s5046_s8 + $0x10] sm:$0xff]   ;;  %v5163_v32 = vld [vmem:[%s5046_s8 + $0x18] sm:$0xff]  }
 0x122   : > { %v6527_v28 = vunpack.c.l.bf16 %v5149_v26  ;;  %v6526_v30 = vunpack.c.h.bf16 %v5149_v26  ;;  %v6525_v31 = vunpack.c.l.bf16 %v5154_v29  ;;  %v6524_v33 = vunpack.c.h.bf16 %v5154_v29  ;;  %v5172_v35 = vld [vmem:[%s5046_s8 + $0x20] sm:$0xff]   ;;  %v5181_v38 = vld [vmem:[%s5046_s8 + $0x28] sm:$0xff]   ;;  %v5190_v41 = vld [vmem:[%s5046_s8 + $0x30] sm:$0xff]  }
 0x123   : > { %3899 = vmatpush3.bf16.msra.mxu0 %v3896_v5  ;;  %v6523_v34 = vunpack.c.l.bf16 %v5163_v32  ;;  %v6522_v36 = vunpack.c.h.bf16 %v5163_v32  ;;  %v6521_v37 = vunpack.c.l.bf16 %v5172_v35  ;;  %v6520_v39 = vunpack.c.h.bf16 %v5172_v35  ;;  %v5199_v44 = vld [vmem:[%s5046_s8 + $0x38] sm:$0xff]   ;;  %v5208_v47 = vld [vmem:[%s5046_s8 + $0x40] sm:$0xff]   ;;  %v5217_v50 = vld [vmem:[%s5046_s8 + $0x48] sm:$0xff]  }
 0x124   : > { %3901 = vmatprep.subr.bf16.mxu0 %v3900_v8  ;;  %v6519_v40 = vunpack.c.l.bf16 %v5181_v38  ;;  %v6518_v42 = vunpack.c.h.bf16 %v5181_v38  ;;  %v6517_v43 = vunpack.c.l.bf16 %v5190_v41  ;;  %v6516_v45 = vunpack.c.h.bf16 %v5190_v41  ;;  %6647 = vst [vmem:[#allocation32_spill] sm:$0xff] %v5208_v47  ;;  %6648 = vst [vmem:[#allocation33_spill] sm:$0xff] %v5217_v50  ;;  %v5226_v53 = vld [vmem:[%s5046_s8 + $0x50] sm:$0xff]   ;;  %v5235_v56 = vld [vmem:[%s5046_s8 + $0x58] sm:$0xff]  }
 0x125   : > { %v6515_v46 = vunpack.c.l.bf16 %v5199_v44  ;;  %v6514_v48 = vunpack.c.h.bf16 %v5199_v44  ;;  %v6513_v49 = vunpack.c.l.bf16 %v5208_v47  ;;  %v6511_v51 = vunpack.c.h.bf16 %v5208_v47  ;;  %6649 = vst [vmem:[#allocation34_spill] sm:$0xff] %v5226_v53  ;;  %6650 = vst [vmem:[#allocation35_spill] sm:$0xff] %v5235_v56  ;;  %v5244_v59 = vld [vmem:[%s5046_s8 + $0x60] sm:$0xff]   ;;  %v5253_v62 = vld [vmem:[%s5046_s8 + $0x68] sm:$0xff]  }
 0x126   : > { %v6510_v52 = vunpack.c.l.bf16 %v5217_v50  ;;  %v6509_v54 = vunpack.c.h.bf16 %v5217_v50  ;;  %v6507_v55 = vunpack.c.l.bf16 %v5226_v53  ;;  %v6506_v57 = vunpack.c.h.bf16 %v5226_v53  ;;  %6651 = vst [vmem:[#allocation36_spill] sm:$0xff] %v5244_v59  ;;  %6652 = vst [vmem:[#allocation37_spill] sm:$0xff] %v5253_v62  ;;  %v5262_v5 = vld [vmem:[%s5046_s8 + $0x70] sm:$0xff]  }
 0x127   : > { %3903 = vmatpush3.bf16.msra.mxu0 %v3900_v8  ;;  %v6505_v58 = vunpack.c.l.bf16 %v5235_v56  ;;  %v6504_v60 = vunpack.c.h.bf16 %v5235_v56  ;;  %v6502_v61 = vunpack.c.l.bf16 %v5244_v59  ;;  %v6501_v63 = vunpack.c.h.bf16 %v5244_v59  ;;  %6653 = vst [vmem:[#allocation38_spill] sm:$0xff] %v5262_v5 }
 0x128   : > { %3905 = vmatprep.subr.bf16.mxu0 %v3904_v13  ;;  %v6499_v3 = vunpack.c.l.bf16 %v5253_v62  ;;  %v6498_v8 = vunpack.c.h.bf16 %v5253_v62 }
 0x12b   : > { %3907 = vmatpush3.bf16.msra.mxu0 %v3904_v13  ;;  %v6500_v13 = vunpack.c.l.bf16 %v5262_v5 }
 0x12c   : > { %3909 = vmatprep.subr.bf16.mxu0 %v3908_v16 }
 0x12f   : > { %3911 = vmatpush3.bf16.msra.mxu0 %v3908_v16  ;;  %v5271_v16 = vld [vmem:[%s5046_s8 + $0x78] sm:$0xff]  }
 0x130   : > { %3913 = vmatprep.subr.bf16.mxu0 %v3912_v19  ;;  %6654 = vst [vmem:[#allocation39_spill] sm:$0xff] %v5271_v16 }
 0x133   : > { %3915 = vmatpush3.bf16.msra.mxu0 %v3912_v19  ;;  %v6503_v19 = vunpack.c.h.bf16 %v5262_v5 }
 0x134   : > { %3917 = vmatprep.subr.bf16.mxu0 %v3916_v22 }
 0x137   : > { %3919 = vmatpush3.bf16.msra.mxu0 %v3916_v22  ;;  %v6508_v22 = vunpack.c.l.bf16 %v5271_v16 }
 0x138   : > { %3921 = vmatprep.subr.bf16.mxu0 %v3920_v25 }
 0x13b   : > { %3923 = vmatpush3.bf16.msra.mxu0 %v3920_v25  ;;  %v6512_v25 = vunpack.c.h.bf16 %v5271_v16 }
 0x13e   : > { %3618 = vmatmul.mubr.f32.vlgmr.msra.gmra.mrb[0].mxu0 %v6528_v27 }
 0x13f   : > { %3620 = vmatprep.mubr.f32.mxu0 %v6527_v28 }
 0x142   : > { %3621 = vmatmul.mubr.f32.gmra.mrb[2].mxu0 %v6526_v30 }
 0x143   : > { %3623 = vmatprep.mubr.f32.mxu0 %v6525_v31 }
 0x146   : > { %3624 = vmatmul.mubr.f32.gmra.mrb[4].mxu0 %v6524_v33  ;;  %v712_v33 = vld [vmem:[#allocation13 + $0xa8] sm:$0xff] }
 0x147   : > { %3626 = vmatprep.mubr.f32.mxu0 %v6523_v34  ;;  %v811_v34 = vld [vmem:[%s5062_s20 + $0x20] sm:$0xff] }
 0x14a   : > { %3627 = vmatmul.mubr.f32.gmra.mrb[6].mxu0 %v6522_v36 }
 0x14b   : > { %3629 = vmatprep.mubr.f32.mxu0 %v6521_v37 }
 0x14e   : > { %3630 = vmatmul.mubr.f32.gmra.mrb[8].mxu0 %v6520_v39  ;;  %v708_v39 = vld [vmem:[#allocation13 + $0x68] sm:$0xff] }
 0x14f   : > { %3632 = vmatprep.mubr.f32.mxu0 %v6519_v40  ;;  %v706_v40 = vld [vmem:[#allocation13 + $0x48] sm:$0xff] }
 0x152   : > { %3633 = vmatmul.mubr.f32.gmra.mrb[10].mxu0 %v6518_v42  ;;  %v703_v42 = vld [vmem:[#allocation13 + $0x20] sm:$0xff] }
 0x153   : > { %3635 = vmatprep.mubr.f32.mxu0 %v6517_v43 }
 0x156   : > { %3636 = vmatmul.mubr.f32.gmra.mrb[12].mxu0 %v6516_v45 }
 0x157   : > { %3638 = vmatprep.mubr.f32.mxu0 %v6515_v46 }
 0x15a   : > { %3639 = vmatmul.mubr.f32.gmra.mrb[14].mxu0 %v6514_v48  ;;  %v701_v48 = vld [vmem:[#allocation13] sm:$0xff] }
 0x15b   : > { %3641 = vmatprep.mubr.f32.mxu0 %v6513_v49  ;;  %v704_v49 = vld [vmem:[#allocation13 + $0x28] sm:$0xff] }
 0x15e   : > { %3642 = vmatmul.mubr.f32.gmra.mrb[16].mxu0 %v6511_v51  ;;  %v812_v51 = vld [vmem:[%s5062_s20 + $0x28] sm:$0xff] }
 0x15f   : > { %3644 = vmatprep.mubr.f32.mxu0 %v6510_v52 }
 0x162   : > { %3645 = vmatmul.mubr.f32.gmra.mrb[18].mxu0 %v6509_v54 }
 0x163   : > { %3647 = vmatprep.mubr.f32.mxu0 %v6507_v55 }
 0x166   : > { %3648 = vmatmul.mubr.f32.gmra.mrb[20].mxu0 %v6506_v57  ;;  %v810_v57 = vld [vmem:[%s5062_s20 + $0x18] sm:$0xff] }
 0x167   : > { %3650 = vmatprep.mubr.f32.mxu0 %v6505_v58 }
 0x16a   : > { %3651 = vmatmul.mubr.f32.gmra.mrb[22].mxu0 %v6504_v60 }
 0x16b   : > { %3653 = vmatprep.mubr.f32.mxu0 %v6502_v61 }
 0x16e   : > { %3654 = vmatmul.mubr.f32.gmra.mrb[24].mxu0 %v6501_v63  ;;  %v807_v63 = vld [vmem:[%s5062_s20] sm:$0xff] }
 0x16f   : > { %3656 = vmatprep.mubr.f32.mxu0 %v6499_v3 }
 0x172   : > { %3657 = vmatmul.mubr.f32.gmra.mrb[26].mxu0 %v6498_v8  ;;  %v5287_v8 = vld [vmem:[%s5053_s21] sm:$0xff] }
 0x173   : > { %3659 = vmatprep.mubr.f32.mxu0 %v6500_v13  ;;  %v6529_v3 = vunpack.c.h.bf16 %v5287_v8  ;;  %v808_v13 = vld [vmem:[%s5062_s20 + $0x8] sm:$0xff] }
 0x175   : > { %1160 = vmatprep.mubr.f32.mxu1 %v6529_v3 }
 0x176   : > { %3660 = vmatmul.mubr.f32.gmra.mrb[28].mxu0 %v6503_v19 }
 0x177   : > { %3662 = vmatprep.mubr.f32.mxu0 %v6508_v22  ;;  %v809_v22 = vld [vmem:[%s5062_s20 + $0x10] sm:$0xff] }
 0x17a   : > { %3663 = vmatmul.mubr.f32.gmra.mrb[30].mxu0 %v6512_v25  ;;  %v702_v25 = vld [vmem:[#allocation13 + $0x8] sm:$0xff] }
 0x17b   : > { %v3956_v43 = vpack.c.bf16 %v704_v49, %v702_v25 }
 0x17d   : > { %3957 = vmatprep.subr.bf16.mxu0 %v3956_v43 }
 0x211   : > { %v3619_v61 = vpop.f32.mrb[0].mxu0 }
 0x212   : > { %v911_v19 = vadd.f32 %v3619_v61, %v808_v13  ;;  %v905_v60 = vpop.f32.mrb[1].mxu0  ;;  %v705_v13 = vld [vmem:[#allocation13 + $0x40] sm:$0xff] }
 0x213   : > { %v906_v58 = vadd.f32 %v905_v60, %v807_v63  ;;  %v3958_v60 = vpack.c.bf16 %v703_v42, %v701_v48  ;;  %v3960_v63 = vpack.c.bf16 %v708_v39, %v706_v40  ;;  %v711_v42 = vld [vmem:[#allocation13 + $0xa0] sm:$0xff]  ;;  %v814_v48 = vld [vmem:[%s5062_s20 + $0x38] sm:$0xff] }
 0x214   : > { %v1065_v55 = vmax.f32 %v911_v19, 0.0  ;;  %v707_v19 = vld [vmem:[#allocation13 + $0x60] sm:$0xff] }
 0x215   : > { %v1064_v54 = vmax.f32 %v906_v58, 0.0  ;;  %v3622_v52 = vpop.f32.mrb[2].mxu0  ;;  %v710_v58 = vld [vmem:[#allocation13 + $0x88] sm:$0xff]  ;;  %3959 = vmatpush1.bf16.msra.mxu0 %v3958_v60  ;;  %v3962_v49 = vpack.c.bf16 %v707_v19, %v705_v13  ;;  %v715_v19 = vld [vmem:[#allocation13 + $0xe0] sm:$0xff] }
 0x216   : > { %v921_v46 = vadd.f32 %v3622_v52, %v810_v57  ;;  %v915_v45 = vpop.f32.mrb[3].mxu0  ;;  %3961 = vmatprep.subr.bf16.mxu0 %v3960_v63  ;;  %v713_v63 = vld [vmem:[#allocation13 + $0xc0] sm:$0xff] }
 0x217   : > { %v916_v37 = vadd.f32 %v915_v45, %v809_v22  ;;  %v5297_v61 = vpack.c.bf16 %v1065_v55, %v1064_v54  ;;  %v3964_v45 = vpack.c.bf16 %v712_v33, %v710_v58  ;;  %v709_v54 = vld [vmem:[#allocation13 + $0x80] sm:$0xff]  ;;  %v716_v55 = vld [vmem:[#allocation13 + $0xe8] sm:$0xff]  ;;  %v813_v22 = vld [vmem:[%s5062_s20 + $0x30] sm:$0xff] }
 0x218   : > { %v1067_v36 = vmax.f32 %v921_v46, 0.0  ;;  %v714_v46 = vld [vmem:[#allocation13 + $0xc8] sm:$0xff]  ;;  %v3966_v60 = vpack.c.bf16 %v711_v42, %v709_v54  ;;  %v717_v42 = vld [vmem:[#allocation13 + $0x100] sm:$0xff] }
 0x219   : > { %v1066_v31 = vmax.f32 %v916_v37, 0.0  ;;  %v3625_v52 = vpop.f32.mrb[4].mxu0  ;;  %3963 = vmatpush1.bf16.msra.mxu0 %v3962_v49  ;;  %v3968_v33 = vpack.c.bf16 %v716_v55, %v714_v46  ;;  %v718_v58 = vld [vmem:[#allocation13 + $0x108] sm:$0xff]  ;;  %v3970_v49 = vpack.c.bf16 %v715_v19, %v713_v63  ;;  %v721_v19 = vld [vmem:[#allocation13 + $0x140] sm:$0xff] }
 0x21a   : > { %v931_v57 = vadd.f32 %v3625_v52, %v812_v51  ;;  %v925_v25 = vpop.f32.mrb[5].mxu0  ;;  %3965 = vmatprep.subr.bf16.mxu0 %v3964_v45  ;;  %v720_v52 = vld [vmem:[#allocation13 + $0x128] sm:$0xff] }
 0x21b   : > { %v5300_v39 = vpack.c.bf16 %v1067_v36, %v1066_v31  ;;  %v926_v40 = vadd.f32 %v925_v25, %v811_v34  ;;  %v816_v36 = vld [vmem:[%s5062_s20 + $0x48] sm:$0xff]  ;;  %v815_v25 = vld [vmem:[%s5062_s20 + $0x40] sm:$0xff]  ;;  %v3972_v45 = vpack.c.bf16 %v720_v52, %v718_v58 }
 0x21c   : > { %v1069_v43 = vmax.f32 %v931_v57, 0.0 }
 0x21d   : > { %v1068_v37 = vmax.f32 %v926_v40, 0.0  ;;  %v3628_v30 = vpop.f32.mrb[6].mxu0  ;;  %3967 = vmatpush1.bf16.msra.mxu0 %v3966_v60 }
 0x21e   : > { %v941_v51 = vadd.f32 %v3628_v30, %v814_v48  ;;  %v935_v13 = vpop.f32.mrb[7].mxu0  ;;  %3969 = vmatprep.subr.bf16.mxu0 %v3968_v33  ;;  %v719_v48 = vld [vmem:[#allocation13 + $0x120] sm:$0xff] }
 0x21f   : > { %v5304_v31 = vpack.c.bf16 %v1069_v43, %v1068_v37  ;;  %v936_v34 = vadd.f32 %v935_v13, %v813_v22  ;;  %v818_v43 = vld [vmem:[%s5062_s20 + $0x58] sm:$0xff]  ;;  %v722_v22 = vld [vmem:[#allocation13 + $0x148] sm:$0xff]  ;;  %v817_v13 = vld [vmem:[%s5062_s20 + $0x50] sm:$0xff]  ;;  %v3974_v60 = vpack.c.bf16 %v719_v48, %v717_v42 }
 0x220   : > { %v1071_v57 = vmax.f32 %v941_v51, 0.0  ;;  %v724_v37 = vld [vmem:[#allocation13 + $0x168] sm:$0xff]  ;;  %v725_v48 = vld [vmem:[#allocation13 + $0x180] sm:$0xff] }
 0x221   : > { %v1070_v40 = vmax.f32 %v936_v34, 0.0  ;;  %v3631_v28 = vpop.f32.mrb[8].mxu0  ;;  %3971 = vmatpush1.bf16.msra.mxu0 %v3970_v49  ;;  %v3976_v33 = vpack.c.bf16 %v724_v37, %v722_v22 }
 0x222   : > { %v951_v30 = vadd.f32 %v3631_v28, %v816_v36  ;;  %v945_v54 = vpop.f32.mrb[9].mxu0  ;;  %3973 = vmatprep.subr.bf16.mxu0 %v3972_v45  ;;  %v723_v36 = vld [vmem:[#allocation13 + $0x160] sm:$0xff] }
 0x223   : > { %v5308_v46 = vpack.c.bf16 %v1071_v57, %v1070_v40  ;;  %v946_v55 = vadd.f32 %v945_v54, %v815_v25  ;;  %v820_v57 = vld [vmem:[%s5062_s20 + $0x68] sm:$0xff]  ;;  %v819_v54 = vld [vmem:[%s5062_s20 + $0x60] sm:$0xff]  ;;  %v3978_v49 = vpack.c.bf16 %v723_v36, %v721_v19 }
 0x224   : > { %v1073_v51 = vmax.f32 %v951_v30, 0.0  ;;  %v726_v25 = vld [vmem:[#allocation13 + $0x188] sm:$0xff] }
 0x225   : > { %v1072_v34 = vmax.f32 %v946_v55, 0.0  ;;  %v3634_v27 = vpop.f32.mrb[10].mxu0  ;;  %v728_v40 = vld [vmem:[#allocation13 + $0x1a8] sm:$0xff]  ;;  %3975 = vmatpush1.bf16.msra.mxu0 %v3974_v60 }
 0x226   : > { %v961_v28 = vadd.f32 %v3634_v27, %v818_v43  ;;  %v955_v63 = vpop.f32.mrb[11].mxu0  ;;  %3977 = vmatprep.subr.bf16.mxu0 %v3976_v33  ;;  %v3980_v45 = vpack.c.bf16 %v728_v40, %v726_v25  ;;  %v727_v43 = vld [vmem:[#allocation13 + $0x1a0] sm:$0xff]  ;;  %v824_v36 = vld [vmem:[%s5062_s20 + $0x88] sm:$0xff] }
 0x227   : > { %v5312_v58 = vpack.c.bf16 %v1073_v51, %v1072_v34  ;;  %v956_v52 = vadd.f32 %v955_v63, %v817_v13  ;;  %v822_v51 = vld [vmem:[%s5062_s20 + $0x78] sm:$0xff]  ;;  %v821_v34 = vld [vmem:[%s5062_s20 + $0x70] sm:$0xff]  ;;  %v823_v25 = vld [vmem:[%s5062_s20 + $0x80] sm:$0xff] }
 0x228   : > { %v1075_v30 = vmax.f32 %v961_v28, 0.0 }
 0x229   : > { %v1074_v55 = vmax.f32 %v956_v52, 0.0  ;;  %v3637_v3 = vpop.f32.mrb[12].mxu0  ;;  %3979 = vmatpush1.bf16.msra.mxu0 %v3978_v49  ;;  %v3982_v52 = vpack.c.bf16 %v727_v43, %v725_v48  ;;  %v825_v43 = vld [vmem:[%s5062_s20 + $0x90] sm:$0xff] }
 0x22a   : > { %v971_v27 = vadd.f32 %v3637_v3, %v820_v57  ;;  %v965_v42 = vpop.f32.mrb[13].mxu0  ;;  %3981 = vmatprep.subr.bf16.mxu0 %v3980_v45 }
 0x22b   : > { %v5316_v22 = vpack.c.bf16 %v1075_v30, %v1074_v55  ;;  %v966_v37 = vadd.f32 %v965_v42, %v819_v54  ;;  %v826_v42 = vld [vmem:[%s5062_s20 + $0x98] sm:$0xff] }
 0x22c   : > { %v1077_v13 = vmax.f32 %v971_v27, 0.0 }
 0x22d   : > { %v1076_v28 = vmax.f32 %v966_v37, 0.0  ;;  %v3640_v63 = vpop.f32.mrb[14].mxu0  ;;  %3983 = vmatpush1.bf16.msra.mxu0 %v3982_v52  ;;  %v827_v52 = vld [vmem:[%s5062_s20 + $0xa0] sm:$0xff] }
 0x22e   : > { %v981_v60 = vadd.f32 %v3640_v63, %v822_v51  ;;  %v975_v3 = vpop.f32.mrb[15].mxu0 }
 0x22f   : > { %v5320_v33 = vpack.c.bf16 %v1077_v13, %v1076_v28  ;;  %v976_v19 = vadd.f32 %v975_v3, %v821_v34  ;;  %v828_v28 = vld [vmem:[%s5062_s20 + $0xa8] sm:$0xff] }
 0x230   : > { %v1079_v57 = vmax.f32 %v981_v60, 0.0 }
 0x231   : > { %v1078_v40 = vmax.f32 %v976_v19, 0.0  ;;  %v3643_v30 = vpop.f32.mrb[16].mxu0 }
 0x232   : > { %v991_v54 = vadd.f32 %v3643_v30, %v824_v36  ;;  %v985_v55 = vpop.f32.mrb[17].mxu0  ;;  %v830_v30 = vld [vmem:[%s5062_s20 + $0xb8] sm:$0xff] }
 0x233   : > { %v5324_v49 = vpack.c.bf16 %v1079_v57, %v1078_v40  ;;  %v986_v27 = vadd.f32 %v985_v55, %v823_v25  ;;  %v829_v55 = vld [vmem:[%s5062_s20 + $0xb0] sm:$0xff] }
 0x234   : > { %v1081_v48 = vmax.f32 %v991_v54, 0.0 }
 0x235   : > { %v1080_v45 = vmax.f32 %v986_v27, 0.0  ;;  %v3646_v37 = vpop.f32.mrb[18].mxu0 }
 0x236   : > { %v1001_v51 = vadd.f32 %v3646_v37, %v826_v42  ;;  %v995_v13 = vpop.f32.mrb[19].mxu0 }
 0x237   : > { %v996_v34 = vadd.f32 %v995_v13, %v825_v43  ;;  %v3924_v63 = vpack.c.bf16 %v1081_v48, %v1080_v45 }
 0x238   : > { %v1083_v60 = vmax.f32 %v1001_v51, 0.0  ;;  %v832_v51 = vld [vmem:[%s5062_s20 + $0xc8] sm:$0xff] }
 0x239   : > { %v1082_v3 = vmax.f32 %v996_v34, 0.0  ;;  %v3649_v19 = vpop.f32.mrb[20].mxu0  ;;  %3925 = vmatprep.subr.bf16.mxu1 %v3924_v63 }
 0x23a   : > { %v1011_v36 = vadd.f32 %v3649_v19, %v828_v28  ;;  %v1005_v57 = vpop.f32.mrb[21].mxu0  ;;  %3927 = vmatpush3.bf16.msra.mxu1 %v5297_v61  ;;  %v831_v61 = vld [vmem:[%s5062_s20 + $0xc0] sm:$0xff]  ;;  %v834_v19 = vld [vmem:[%s5062_s20 + $0xd8] sm:$0xff] }
 0x23b   : > { %v3928_v25 = vpack.c.bf16 %v1083_v60, %v1082_v3  ;;  %v1006_v40 = vadd.f32 %v1005_v57, %v827_v52 }
 0x23c   : > { %v1085_v54 = vmax.f32 %v1011_v36, 0.0 }
 0x23d   : > { %v1084_v27 = vmax.f32 %v1006_v40, 0.0  ;;  %v3652_v42 = vpop.f32.mrb[22].mxu0  ;;  %3929 = vmatprep.subr.bf16.mxu1 %v3928_v25 }
 0x23e   : > { %v1021_v48 = vadd.f32 %v3652_v42, %v830_v30  ;;  %v1015_v43 = vpop.f32.mrb[23].mxu0  ;;  %3931 = vmatpush3.bf16.msra.mxu1 %v5300_v39  ;;  %v833_v39 = vld [vmem:[%s5062_s20 + $0xd0] sm:$0xff] }
 0x23f   : > { %v3932_v45 = vpack.c.bf16 %v1085_v54, %v1084_v27  ;;  %v1016_v37 = vadd.f32 %v1015_v43, %v829_v55  ;;  %v836_v27 = vld [vmem:[%s5062_s20 + $0xe8] sm:$0xff] }
 0x240   : > { %v1087_v13 = vmax.f32 %v1021_v48, 0.0 }
 0x241   : > { %v1086_v34 = vmax.f32 %v1016_v37, 0.0  ;;  %v3655_v28 = vpop.f32.mrb[24].mxu0  ;;  %3933 = vmatprep.subr.bf16.mxu1 %v3932_v45 }
 0x242   : > { %v1031_v63 = vadd.f32 %v3655_v28, %v832_v51  ;;  %v1025_v60 = vpop.f32.mrb[25].mxu0  ;;  %3935 = vmatpush3.bf16.msra.mxu1 %v5304_v31  ;;  %v835_v31 = vld [vmem:[%s5062_s20 + $0xe0] sm:$0xff]  ;;  %v837_v28 = vld [vmem:[%s5062_s20 + $0xf0] sm:$0xff] }
 0x243   : > { %v3936_v52 = vpack.c.bf16 %v1087_v13, %v1086_v34  ;;  %v1026_v3 = vadd.f32 %v1025_v60, %v831_v61  ;;  %v838_v61 = vld [vmem:[%s5062_s20 + $0xf8] sm:$0xff]  ;;  %s6758_s20 = sld [smem:[#allocation30_spill]] }
 0x244   : > { %v1089_v36 = vmax.f32 %v1031_v63, 0.0 }
 0x245   : > { %v1088_v57 = vmax.f32 %v1026_v3, 0.0  ;;  %v3658_v25 = vpop.f32.mrb[26].mxu0  ;;  %3937 = vmatprep.subr.bf16.mxu1 %v3936_v52 }
 0x246   : > { %v1041_v40 = vadd.f32 %v3658_v25, %v834_v19  ;;  %v1035_v30 = vpop.f32.mrb[27].mxu0  ;;  %3939 = vmatpush3.bf16.msra.mxu1 %v5308_v46  ;;  %v6559_v25 = vunpack.c.l.bf16 %v5287_v8 }
 0x247   : > { %v3940_v54 = vpack.c.bf16 %v1089_v36, %v1088_v57  ;;  %v1036_v55 = vadd.f32 %v1035_v30, %v833_v39  ;;  %v5348_v57 = vld [vmem:[%s5053_s21 + $0x8] sm:$0xff] }
 0x248   : > { %v1091_v42 = vmax.f32 %v1041_v40, 0.0  ;;  %6655 = vst [vmem:[#allocation40_spill] sm:$0xff] %v5348_v57  ;;  %v6558_v40 = vunpack.c.h.bf16 %v5348_v57  ;;  %v6556_v30 = vunpack.c.l.bf16 %v5348_v57 }
 0x249   : > { %v1090_v48 = vmax.f32 %v1036_v55, 0.0  ;;  %v3661_v43 = vpop.f32.mrb[28].mxu0  ;;  %3941 = vmatprep.subr.bf16.mxu1 %v3940_v54  ;;  %v5363_v54 = vld [vmem:[%s5053_s21 + $0x18] sm:$0xff]  ;;  %p6760_p7 = scmp.ne.s32.totalorder %s6758_s20, 0 }
 0x24a   : > { %v1051_v45 = vadd.f32 %v3661_v43, %v836_v27  ;;  %v1045_v37 = vpop.f32.mrb[29].mxu0  ;;  %3943 = vmatpush3.bf16.msra.mxu1 %v5312_v58  ;;  %6657 = vst [vmem:[#allocation42_spill] sm:$0xff] %v5363_v54  ;;  %v6551_v55 = vunpack.c.h.bf16 %v5363_v54  ;;  %v5372_v27 = vld [vmem:[%s5053_s21 + $0x20] sm:$0xff] }
 0x24b   : > { %v3944_v51 = vpack.c.bf16 %v1091_v42, %v1090_v48  ;;  %v1046_v13 = vadd.f32 %v1045_v37, %v835_v31  ;;  %6658 = vst [vmem:[#allocation43_spill] sm:$0xff] %v5372_v27  ;;  %v6550_v42 = vunpack.c.l.bf16 %v5363_v54  ;;  %v6549_v31 = vunpack.c.h.bf16 %v5372_v27  ;;  %v5381_v48 = vld [vmem:[%s5053_s21 + $0x28] sm:$0xff]  ;;  %v5390_v37 = vld [vmem:[%s5053_s21 + $0x30] sm:$0xff] }
 0x24c   : > { %v1093_v34 = vmax.f32 %v1051_v45, 0.0  ;;  %6659 = vst [vmem:[#allocation44_spill] sm:$0xff] %v5381_v48  ;;  %v6548_v43 = vunpack.c.l.bf16 %v5372_v27  ;;  %v6544_v45 = vunpack.c.h.bf16 %v5381_v48  ;;  %6660 = vst [vmem:[#allocation45_spill] sm:$0xff] %v5390_v37 }
 0x24d   : > { %v1092_v46 = vmax.f32 %v1046_v13, 0.0  ;;  %v3664_v63 = vpop.f32.mrb[30].mxu0  ;;  %3945 = vmatprep.subr.bf16.mxu1 %v3944_v51  ;;  %v6541_v51 = vunpack.c.l.bf16 %v5381_v48  ;;  %v6538_v13 = vunpack.c.h.bf16 %v5390_v37 }
 0x24e   : > { %v1061_v60 = vadd.f32 %v3664_v63, %v838_v61  ;;  %v1055_v52 = vpop.f32.mrb[31].mxu0  ;;  %3947 = vmatpush3.bf16.msra.mxu1 %v5316_v22  ;;  %v5354_v22 = vld [vmem:[%s5053_s21 + $0x10] sm:$0xff]  ;;  %v5399_v61 = vld [vmem:[%s5053_s21 + $0x38] sm:$0xff] }
 0x24f   : > { %v3948_v3 = vpack.c.bf16 %v1093_v34, %v1092_v46  ;;  %v1056_v19 = vadd.f32 %v1055_v52, %v837_v28  ;;  %6656 = vst [vmem:[#allocation41_spill] sm:$0xff] %v5354_v22  ;;  %6661 = vst [vmem:[#allocation46_spill] sm:$0xff] %v5399_v61  ;;  %v6536_v34 = vunpack.c.l.bf16 %v5390_v37  ;;  %v6533_v28 = vunpack.c.h.bf16 %v5399_v61  ;;  %v5408_v46 = vld [vmem:[%s5053_s21 + $0x40] sm:$0xff]  ;;  %v5417_v52 = vld [vmem:[%s5053_s21 + $0x48] sm:$0xff] }
 0x250   : > { %v1095_v36 = vmax.f32 %v1061_v60, 0.0  ;;  %6662 = vst [vmem:[#allocation47_spill] sm:$0xff] %v5408_v46  ;;  %v6530_v63 = vunpack.c.l.bf16 %v5399_v61  ;;  %v6531_v60 = vunpack.c.h.bf16 %v5408_v46  ;;  %6663 = vst [vmem:[#allocation48_spill] sm:$0xff] %v5417_v52 }
 0x251   : > { %v1094_v39 = vmax.f32 %v1056_v19, 0.0  ;;  %3949 = vmatprep.subr.bf16.mxu1 %v3948_v3  ;;  %v6532_v3 = vunpack.c.l.bf16 %v5408_v46  ;;  %v6534_v19 = vunpack.c.h.bf16 %v5417_v52 }
 0x252   : > { %3951 = vmatpush3.bf16.msra.mxu1 %v5320_v33  ;;  %v6555_v33 = vunpack.c.h.bf16 %v5354_v22 }
 0x253   : > { %v3952_v58 = vpack.c.bf16 %v1095_v36, %v1094_v39  ;;  %v5426_v36 = vld [vmem:[%s5053_s21 + $0x50] sm:$0xff]  ;;  %v6535_v39 = vunpack.c.l.bf16 %v5417_v52 }
 0x254   : > { %6664 = vst [vmem:[#allocation49_spill] sm:$0xff] %v5426_v36 }
 0x255   : > { %3953 = vmatprep.subr.bf16.mxu1 %v3952_v58  ;;  %v6537_v58 = vunpack.c.h.bf16 %v5426_v36 }
 0x256   : > { %3955 = vmatpush3.bf16.msra.mxu1 %v5324_v49  ;;  %v6554_v49 = vunpack.c.l.bf16 %v5354_v22 }
 0x259   : > { %1161 = vmatmul.mubr.f32.vlgmr.msra.gmra.mrb[0].mxu1 %v6559_v25 }
 0x25a   : > { %1165 = vmatprep.mubr.f32.mxu1 %v6558_v40 }
 0x25d   : > { %1166 = vmatmul.mubr.f32.gmra.mrb[2].mxu1 %v6556_v30 }
 0x25e   : > { %1170 = vmatprep.mubr.f32.mxu1 %v6555_v33 }
 0x261   : > { %1171 = vmatmul.mubr.f32.gmra.mrb[4].mxu1 %v6554_v49 }
 0x262   : > { %1175 = vmatprep.mubr.f32.mxu1 %v6551_v55 }
 0x265   : > { %1176 = vmatmul.mubr.f32.gmra.mrb[6].mxu1 %v6550_v42  ;;  %v731_v42 = vld [vmem:[#allocation13 + $0x1e0] sm:$0xff] }
 0x266   : > { %1180 = vmatprep.mubr.f32.mxu1 %v6549_v31  ;;  %v729_v31 = vld [vmem:[#allocation13 + $0x1c0] sm:$0xff] }
 0x267   : > { %v3986_v55 = vpack.c.bf16 %v731_v42, %v729_v31 }
 0x269   : > { %1181 = vmatmul.mubr.f32.gmra.mrb[8].mxu1 %v6548_v43 }
 0x26a   : > { %1185 = vmatprep.mubr.f32.mxu1 %v6544_v45 }
 0x26d   : > { %1186 = vmatmul.mubr.f32.gmra.mrb[10].mxu1 %v6541_v51 }
 0x26e   : > { %1190 = vmatprep.mubr.f32.mxu1 %v6538_v13 }
 0x271   : > { %1191 = vmatmul.mubr.f32.gmra.mrb[12].mxu1 %v6536_v34  ;;  %v5453_v34 = vld [vmem:[%s5053_s21 + $0x68] sm:$0xff] }
 0x272   : > { %1195 = vmatprep.mubr.f32.mxu1 %v6533_v28  ;;  %v5444_v28 = vld [vmem:[%s5053_s21 + $0x60] sm:$0xff]  ;;  %6667 = vst [vmem:[#allocation52_spill] sm:$0xff] %v5453_v34  ;;  %v6546_v13 = vunpack.c.h.bf16 %v5453_v34 }
 0x273   : > { %6666 = vst [vmem:[#allocation51_spill] sm:$0xff] %v5444_v28 }
 0x275   : > { %1196 = vmatmul.mubr.f32.gmra.mrb[14].mxu1 %v6530_v63  ;;  %v5435_v63 = vld [vmem:[%s5053_s21 + $0x58] sm:$0xff] }
 0x276   : > { %1200 = vmatprep.mubr.f32.mxu1 %v6531_v60  ;;  %6665 = vst [vmem:[#allocation50_spill] sm:$0xff] %v5435_v63  ;;  %v6539_v60 = vunpack.c.l.bf16 %v5426_v36 }
 0x279   : > { %1201 = vmatmul.mubr.f32.gmra.mrb[16].mxu1 %v6532_v3  ;;  %v6540_v3 = vunpack.c.h.bf16 %v5435_v63 }
 0x27a   : > { %1205 = vmatprep.mubr.f32.mxu1 %v6534_v19  ;;  %v6542_v19 = vunpack.c.l.bf16 %v5435_v63 }
 0x27d   : > { %1206 = vmatmul.mubr.f32.gmra.mrb[18].mxu1 %v6535_v39  ;;  %v6543_v39 = vunpack.c.h.bf16 %v5444_v28 }
 0x27e   : > { %1210 = vmatprep.mubr.f32.mxu1 %v6537_v58  ;;  %v6545_v58 = vunpack.c.l.bf16 %v5444_v28 }
 0x281   : > { %1211 = vmatmul.mubr.f32.gmra.mrb[20].mxu1 %v6539_v60  ;;  %v5462_v60 = vld [vmem:[%s5053_s21 + $0x70] sm:$0xff] }
 0x282   : > { %1215 = vmatprep.mubr.f32.mxu1 %v6540_v3  ;;  %6668 = vst [vmem:[#allocation53_spill] sm:$0xff] %v5462_v60  ;;  %v6547_v3 = vunpack.c.l.bf16 %v5453_v34  ;;  %v6552_v51 = vunpack.c.h.bf16 %v5462_v60  ;;  %v780_v34 = vld [vmem:[#allocation14 + $0x78] sm:$0xff] }
 0x285   : > { %1216 = vmatmul.mubr.f32.gmra.mrb[22].mxu1 %v6542_v19  ;;  %v5471_v19 = vld [vmem:[%s5053_s21 + $0x78] sm:$0xff] }
 0x286   : > { %1220 = vmatprep.mubr.f32.mxu1 %v6543_v39  ;;  %6669 = vst [vmem:[#allocation54_spill] sm:$0xff] %v5471_v19  ;;  %v6553_v39 = vunpack.c.l.bf16 %v5462_v60  ;;  %v6557_v45 = vunpack.c.h.bf16 %v5471_v19  ;;  %v795_v60 = vld [vmem:[#allocation14 + $0xf0] sm:$0xff] }
 0x289   : > { %1221 = vmatmul.mubr.f32.gmra.mrb[24].mxu1 %v6545_v58  ;;  %v6561_v58 = vunpack.c.l.bf16 %v5471_v19  ;;  %v777_v19 = vld [vmem:[#allocation14 + $0x60] sm:$0xff] }
 0x28a   : > { %1225 = vmatprep.mubr.f32.mxu1 %v6546_v13  ;;  %v730_v13 = vld [vmem:[#allocation13 + $0x1c8] sm:$0xff] }
 0x28d   : > { %1226 = vmatmul.mubr.f32.gmra.mrb[26].mxu1 %v6547_v3  ;;  %v732_v3 = vld [vmem:[#allocation13 + $0x1e8] sm:$0xff] }
 0x28e   : > { %1230 = vmatprep.mubr.f32.mxu1 %v6552_v51  ;;  %v3984_v43 = vpack.c.bf16 %v732_v3, %v730_v13  ;;  %v6560_v51 = vmov 0.0  }
 0x28f   : > { %1316 = vmatprep.mubr.f32.mxu0 %v6560_v51 }
 0x290   : > { %3985 = vmatprep.subr.bf16.mxu0 %v3984_v43 }
 0x291   : > { %1231 = vmatmul.mubr.f32.gmra.mrb[28].mxu1 %v6553_v39  ;;  %3987 = vmatpush1.bf16.msra.mxu0 %v3986_v55 }
 0x292   : > { %1235 = vmatprep.mubr.f32.mxu1 %v6557_v45 }
 0x295   : > { %1236 = vmatmul.mubr.f32.gmra.mrb[30].mxu1 %v6561_v58  ;;  %v794_v58 = vld [vmem:[#allocation14 + $0xe8] sm:$0xff] }
 0x32c   : > { %v3248_v39 = vpop.f32.mrb[0].mxu1 }
 0x32d   : > { %v3249_v49 = vpop.f32.mrb[1].mxu1 }
 0x32e   : > { %v3250_v33 = vadd.f32 %v3249_v49, %v3248_v39 }
 0x330   : > { %v1163_v30 = vadd.f32 %v3250_v33, %v5079_v0  ;;  %v3251_v45 = vpop.f32.mrb[2].mxu1 }
 0x331   : > { %v3252_v40 = vpop.f32.mrb[3].mxu1 }
 0x332   : > { %v3253_v25 = vadd.f32 %v3252_v40, %v3251_v45  ;;  %1317 = vmatmul.mubr.f32.vlgmr.msra.gmra.mrb[32].mxu0 %v1163_v30 }
 0x333   : > { %1322 = vmatprep.mubr.f32.mxu0 %v6560_v51 }
 0x334   : > { %v1168_v13 = vadd.f32 %v3253_v25, %v5082_v1  ;;  %v3254_v3 = vpop.f32.mrb[4].mxu1 }
 0x335   : > { %v3255_v42 = vpop.f32.mrb[5].mxu1 }
 0x336   : > { %v3256_v31 = vadd.f32 %v3255_v42, %v3254_v3  ;;  %1323 = vmatmul.mubr.f32.gmra.mrb[34].mxu0 %v1168_v13 }
 0x337   : > { %1328 = vmatprep.mubr.f32.mxu0 %v6560_v51 }
 0x338   : > { %v1173_v55 = vadd.f32 %v3256_v31, %v5085_v2  ;;  %v3257_v43 = vpop.f32.mrb[6].mxu1 }
 0x339   : > { %v3258_v49 = vpop.f32.mrb[7].mxu1 }
 0x33a   : > { %v3259_v39 = vadd.f32 %v3258_v49, %v3257_v43  ;;  %1329 = vmatmul.mubr.f32.gmra.mrb[36].mxu0 %v1173_v55 }
 0x33b   : > { %1334 = vmatprep.mubr.f32.mxu0 %v6560_v51 }
 0x33c   : > { %v1178_v0 = vadd.f32 %v3259_v39, %v5090_v4  ;;  %v3260_v40 = vpop.f32.mrb[8].mxu1 }
 0x33d   : > { %v3261_v30 = vpop.f32.mrb[9].mxu1 }
 0x33e   : > { %v3262_v33 = vadd.f32 %v3261_v30, %v3260_v40  ;;  %1335 = vmatmul.mubr.f32.gmra.mrb[38].mxu0 %v1178_v0 }
 0x33f   : > { %1340 = vmatprep.mubr.f32.mxu0 %v6560_v51 }
 0x340   : > { %v1183_v1 = vadd.f32 %v3262_v33, %v5095_v6  ;;  %v3263_v25 = vpop.f32.mrb[10].mxu1 }
 0x341   : > { %v3264_v45 = vpop.f32.mrb[11].mxu1 }
 0x342   : > { %v3265_v13 = vadd.f32 %v3264_v45, %v3263_v25  ;;  %1341 = vmatmul.mubr.f32.gmra.mrb[40].mxu0 %v1183_v1 }
 0x343   : > { %1346 = vmatprep.mubr.f32.mxu0 %v6560_v51 }
 0x344   : > { %v1188_v2 = vadd.f32 %v3265_v13, %v5098_v7  ;;  %v3266_v3 = vpop.f32.mrb[12].mxu1 }
 0x345   : > { %v3267_v42 = vpop.f32.mrb[13].mxu1 }
 0x346   : > { %v3268_v31 = vadd.f32 %v3267_v42, %v3266_v3  ;;  %1347 = vmatmul.mubr.f32.gmra.mrb[42].mxu0 %v1188_v2 }
 0x347   : > { %1352 = vmatprep.mubr.f32.mxu0 %v6560_v51 }
 0x348   : > { %v1193_v4 = vadd.f32 %v3268_v31, %v5106_v10  ;;  %v3269_v55 = vpop.f32.mrb[14].mxu1 }
 0x349   : > { %v3270_v43 = vpop.f32.mrb[15].mxu1 }
 0x34a   : > { %v3271_v49 = vadd.f32 %v3270_v43, %v3269_v55  ;;  %1353 = vmatmul.mubr.f32.gmra.mrb[44].mxu0 %v1193_v4 }
 0x34b   : > { %1358 = vmatprep.mubr.f32.mxu0 %v6560_v51 }
 0x34c   : > { %v1198_v6 = vadd.f32 %v3271_v49, %v5109_v11  ;;  %v3272_v39 = vpop.f32.mrb[16].mxu1 }
 0x34d   : > { %v3273_v0 = vpop.f32.mrb[17].mxu1 }
 0x34e   : > { %v3274_v40 = vadd.f32 %v3273_v0, %v3272_v39  ;;  %1359 = vmatmul.mubr.f32.gmra.mrb[46].mxu0 %v1198_v6 }
 0x34f   : > { %1364 = vmatprep.mubr.f32.mxu0 %v6560_v51 }
 0x350   : > { %v1203_v7 = vadd.f32 %v3274_v40, %v5117_v14  ;;  %v3275_v30 = vpop.f32.mrb[18].mxu1 }
 0x351   : > { %v3276_v33 = vpop.f32.mrb[19].mxu1 }
 0x352   : > { %v3277_v1 = vadd.f32 %v3276_v33, %v3275_v30  ;;  %1365 = vmatmul.mubr.f32.gmra.mrb[48].mxu0 %v1203_v7 }
 0x353   : > { %1370 = vmatprep.mubr.f32.mxu0 %v6560_v51 }
 0x354   : > { %v1208_v10 = vadd.f32 %v3277_v1, %v5120_v15  ;;  %v3278_v25 = vpop.f32.mrb[20].mxu1 }
 0x355   : > { %v3279_v45 = vpop.f32.mrb[21].mxu1 }
 0x356   : > { %v3280_v13 = vadd.f32 %v3279_v45, %v3278_v25  ;;  %1371 = vmatmul.mubr.f32.gmra.mrb[50].mxu0 %v1208_v10 }
 0x357   : > { %1376 = vmatprep.mubr.f32.mxu0 %v6560_v51 }
 0x358   : > { %v1213_v11 = vadd.f32 %v3280_v13, %v5125_v17  ;;  %v3281_v2 = vpop.f32.mrb[22].mxu1 }
 0x359   : > { %v3282_v3 = vpop.f32.mrb[23].mxu1 }
 0x35a   : > { %v3283_v42 = vadd.f32 %v3282_v3, %v3281_v2  ;;  %1377 = vmatmul.mubr.f32.gmra.mrb[52].mxu0 %v1213_v11  ;;  %v782_v2 = vld [vmem:[#allocation14 + $0x88] sm:$0xff] }
 0x35b   : > { %1382 = vmatprep.mubr.f32.mxu0 %v6560_v51 }
 0x35c   : > { %v1218_v14 = vadd.f32 %v3283_v42, %v5128_v18  ;;  %v3284_v31 = vpop.f32.mrb[24].mxu1  ;;  %v765_v42 = vld [vmem:[#allocation14] sm:$0xff] }
 0x35d   : > { %v3285_v4 = vpop.f32.mrb[25].mxu1 }
 0x35e   : > { %v3286_v55 = vadd.f32 %v3285_v4, %v3284_v31  ;;  %1383 = vmatmul.mubr.f32.gmra.mrb[54].mxu0 %v1218_v14  ;;  %v766_v14 = vld [vmem:[#allocation14 + $0x8] sm:$0xff] }
 0x35f   : > { %1388 = vmatprep.mubr.f32.mxu0 %v6560_v51  ;;  %v3990_v31 = vpack.c.bf16 %v766_v14, %v765_v42 }
 0x360   : > { %v1223_v15 = vadd.f32 %v3286_v55, %v5133_v20  ;;  %v3287_v43 = vpop.f32.mrb[26].mxu1 }
 0x361   : > { %v3288_v49 = vpop.f32.mrb[27].mxu1 }
 0x362   : > { %v3289_v6 = vadd.f32 %v3288_v49, %v3287_v43  ;;  %1389 = vmatmul.mubr.f32.gmra.mrb[56].mxu0 %v1223_v15  ;;  %v783_v49 = vld [vmem:[#allocation14 + $0x90] sm:$0xff] }
 0x363   : > { %1394 = vmatprep.mubr.f32.mxu0 %v6560_v51 }
 0x364   : > { %v1228_v17 = vadd.f32 %v3289_v6, %v5136_v21  ;;  %v3290_v39 = vpop.f32.mrb[28].mxu1  ;;  %v1242_v21 = vlaneseq  ;;  %v784_v6 = vld [vmem:[#allocation14 + $0x98] sm:$0xff] }
 0x365   : > { %v3291_v0 = vpop.f32.mrb[29].mxu1 }
 0x366   : > { %v3292_v40 = vadd.f32 %v3291_v0, %v3290_v39  ;;  %1395 = vmatmul.mubr.f32.gmra.mrb[58].mxu0 %v1228_v17  ;;  %v1243_v1 = vshrl.u32 %v1242_v21, 7  ;;  %v3992_v0 = vpack.c.bf16 %v784_v6, %v783_v49  ;;  %v787_v6 = vld [vmem:[#allocation14 + $0xb0] sm:$0xff] }
 0x367   : > { %1400 = vmatprep.mubr.f32.mxu0 %v6560_v51 }
 0x368   : > { %v1233_v18 = vadd.f32 %v3292_v40, %v5141_v23  ;;  %v3293_v7 = vpop.f32.mrb[30].mxu1  ;;  %v5520_v10 = vsub.s32 0, %v1243_v1  ;;  %v797_v23 = vld [vmem:[%s6670_s9] ss:$8 sm:$0x3]  ;;  %v5525_v25 = vsub.s32 1, %v1243_v1 }
 0x369   : > { %v3294_v30 = vpop.f32.mrb[31].mxu1  ;;  %v767_v40 = vld [vmem:[#allocation14 + $0x10] sm:$0xff] }
 0x36a   : > { %v3295_v33 = vadd.f32 %v3294_v30, %v3293_v7  ;;  %1401 = vmatmul.mubr.f32.gmra.mrb[60].mxu0 %v1233_v18  ;;  %v5528_v13 = vrot.slane %v797_v23, %v5520_v10  ;;  %v5531_v3 = vrot.slane %v797_v23, %v5525_v25  ;;  %v768_v18 = vld [vmem:[#allocation14 + $0x18] sm:$0xff]  ;;  %v785_v23 = vld [vmem:[#allocation14 + $0xa0] sm:$0xff] }
 0x36b   : > { %1406 = vmatprep.mubr.f32.mxu0 %v6560_v51  ;;  %v3994_v30 = vpack.c.bf16 %v768_v18, %v767_v40  ;;  %v776_v51 = vld [vmem:[#allocation14 + $0x58] sm:$0xff] }
 0x36c   : > { %v1238_v20 = vadd.f32 %v3295_v33, %v5144_v24  ;;  %v781_v24 = vld [vmem:[#allocation14 + $0x80] sm:$0xff] }
 0x36e   : > { %1407 = vmatmul.mubr.f32.gmra.mrb[62].mxu0 %v1238_v20 }
 0x36f   : > { %3697 = vmatprep.mubr.f32.mxu0 %v3091_v12  ;;  %v3988_v12 = vpack.c.bf16 %v782_v2, %v781_v24  ;;  %v769_v2 = vld [vmem:[#allocation14 + $0x20] sm:$0xff] }
 0x371   : > { %3989 = vmatprep.subr.bf16.mxu1 %v3988_v12  ;;  %v770_v12 = vld [vmem:[#allocation14 + $0x28] sm:$0xff] }
 0x372   : > { %3991 = vmatpush3.bf16.msra.mxu1 %v3990_v31  ;;  %v3998_v14 = vpack.c.bf16 %v770_v12, %v769_v2  ;;  %v789_v2 = vld [vmem:[#allocation14 + $0xc0] sm:$0xff]  ;;  %v790_v12 = vld [vmem:[#allocation14 + $0xc8] sm:$0xff] }
 0x373   : > { %3993 = vmatprep.subr.bf16.mxu1 %v3992_v0  ;;  %v788_v0 = vld [vmem:[#allocation14 + $0xb8] sm:$0xff] }
 0x374   : > { %v4000_v18 = vpack.c.bf16 %v788_v0, %v787_v6  ;;  %v774_v6 = vld [vmem:[#allocation14 + $0x48] sm:$0xff] }
 0x376   : > { %3995 = vmatpush3.bf16.msra.mxu1 %v3994_v30  ;;  %v771_v30 = vld [vmem:[#allocation14 + $0x30] sm:$0xff] }
 0x405   : > { %v1318_v45 = vpop.f32.mrb[32].mxu0 }
 0x406   : > { %v1320_v11 = vpop.f32.mrb[33].mxu0  ;;  %v5534_v55 = vadd.f32 %v1318_v45, %v5528_v13  ;;  %v786_v45 = vld [vmem:[#allocation14 + $0xa8] sm:$0xff] }
 0x407   : > { %v5540_v17 = vadd.f32 %v1320_v11, %v5531_v3  ;;  %v3996_v24 = vpack.c.bf16 %v786_v45, %v785_v23 }
 0x409   : > { %v1324_v4 = vpop.f32.mrb[34].mxu0  ;;  %3997 = vmatprep.subr.bf16.mxu1 %v3996_v24 }
 0x40a   : > { %v5537_v15 = vadd.f32 %v1324_v4, %v5528_v13  ;;  %v1326_v43 = vpop.f32.mrb[35].mxu0  ;;  %3999 = vmatpush3.bf16.msra.mxu1 %v3998_v14 }
 0x40b   : > { %v5543_v39 = vadd.f32 %v1326_v43, %v5531_v3  ;;  %4001 = vmatprep.subr.bf16.mxu1 %v4000_v18 }
 0x40c   : > { %v1413_v7 = vadd.f32 %v5537_v15, %v5534_v55 }
 0x40d   : > { %v1434_v33 = vadd.f32 %v5543_v39, %v5540_v17  ;;  %v1330_v20 = vpop.f32.mrb[36].mxu0 }
 0x40e   : > { %v5550_v21 = vadd.f32 %v1330_v20, %v5528_v13  ;;  %v1332_v1 = vpop.f32.mrb[37].mxu0  ;;  %v772_v20 = vld [vmem:[#allocation14 + $0x38] sm:$0xff] }
 0x40f   : > { %v5553_v11 = vadd.f32 %v1332_v1, %v5531_v3  ;;  %v4002_v1 = vpack.c.bf16 %v772_v20, %v771_v30 }
 0x410   : > { %v1414_v42 = vadd.f32 %v1413_v7, %v5550_v21 }
 0x411   : > { %v1435_v31 = vadd.f32 %v1434_v33, %v5553_v11  ;;  %v1336_v4 = vpop.f32.mrb[38].mxu0  ;;  %4003 = vmatpush3.bf16.msra.mxu1 %v4002_v1  ;;  %v791_v1 = vld [vmem:[#allocation14 + $0xd0] sm:$0xff] }
 0x412   : > { %v5558_v43 = vadd.f32 %v1336_v4, %v5528_v13  ;;  %v1338_v49 = vpop.f32.mrb[39].mxu0  ;;  %v4004_v4 = vpack.c.bf16 %v790_v12, %v789_v2  ;;  %v775_v12 = vld [vmem:[#allocation14 + $0x50] sm:$0xff] }
 0x413   : > { %v5561_v40 = vadd.f32 %v1338_v49, %v5531_v3  ;;  %v773_v49 = vld [vmem:[#allocation14 + $0x40] sm:$0xff] }
 0x414   : > { %v1415_v7 = vadd.f32 %v1414_v42, %v5558_v43  ;;  %v4006_v0 = vpack.c.bf16 %v774_v6, %v773_v49  ;;  %4005 = vmatprep.subr.bf16.mxu1 %v4004_v4  ;;  %v4010_v49 = vpack.c.bf16 %v776_v51, %v775_v12 }
 0x415   : > { %v1436_v33 = vadd.f32 %v1435_v31, %v5561_v40  ;;  %v1342_v23 = vpop.f32.mrb[40].mxu0 }
 0x416   : > { %v5566_v45 = vadd.f32 %v1342_v23, %v5528_v13  ;;  %v1344_v24 = vpop.f32.mrb[41].mxu0  ;;  %4007 = vmatpush3.bf16.msra.mxu1 %v4006_v0  ;;  %v792_v23 = vld [vmem:[#allocation14 + $0xd8] sm:$0xff]  ;;  %v793_v0 = vld [vmem:[#allocation14 + $0xe0] sm:$0xff] }
 0x417   : > { %v5569_v14 = vadd.f32 %v1344_v24, %v5531_v3  ;;  %v4008_v2 = vpack.c.bf16 %v792_v23, %v791_v1  ;;  %v4012_v1 = vpack.c.bf16 %v794_v58, %v793_v0  ;;  %v778_v23 = vld [vmem:[#allocation14 + $0x68] sm:$0xff] }
 0x418   : > { %v1416_v42 = vadd.f32 %v1415_v7, %v5566_v45 }
 0x419   : > { %v1437_v31 = vadd.f32 %v1436_v33, %v5569_v14  ;;  %v1348_v30 = vpop.f32.mrb[42].mxu0  ;;  %4009 = vmatprep.subr.bf16.mxu1 %v4008_v2  ;;  %v779_v2 = vld [vmem:[#allocation14 + $0x70] sm:$0xff] }
 0x41a   : > { %v5574_v18 = vadd.f32 %v1348_v30, %v5528_v13  ;;  %v1350_v20 = vpop.f32.mrb[43].mxu0  ;;  %4011 = vmatpush3.bf16.msra.mxu1 %v4010_v49 }
 0x41b   : > { %v5577_v24 = vadd.f32 %v1350_v20, %v5531_v3  ;;  %4013 = vmatprep.subr.bf16.mxu1 %v4012_v1 }
 0x41c   : > { %v1417_v7 = vadd.f32 %v1416_v42, %v5574_v18  ;;  %v796_v42 = vld [vmem:[#allocation14 + $0xf8] sm:$0xff] }
 0x41d   : > { %v1438_v33 = vadd.f32 %v1437_v31, %v5577_v24  ;;  %v1354_v6 = vpop.f32.mrb[44].mxu0  ;;  %v4014_v31 = vpack.c.bf16 %v778_v23, %v777_v19  ;;  %v4016_v12 = vpack.c.bf16 %v796_v42, %v795_v60 }
 0x41e   : > { %v5582_v4 = vadd.f32 %v1354_v6, %v5528_v13  ;;  %v1356_v30 = vpop.f32.mrb[45].mxu0 }
 0x41f   : > { %v5585_v20 = vadd.f32 %v1356_v30, %v5531_v3  ;;  %4015 = vmatpush3.bf16.msra.mxu1 %v4014_v31  ;;  %v4018_v30 = vpack.c.bf16 %v780_v34, %v779_v2 }
 0x420   : > { %v1418_v51 = vadd.f32 %v1417_v7, %v5582_v4  ;;  %4017 = vmatprep.subr.bf16.mxu1 %v4016_v12 }
 0x421   : > { %v1439_v6 = vadd.f32 %v1438_v33, %v5585_v20  ;;  %v1360_v28 = vpop.f32.mrb[46].mxu0 }
 0x422   : > { %v5590_v49 = vadd.f32 %v1360_v28, %v5528_v13  ;;  %v1362_v63 = vpop.f32.mrb[47].mxu0 }
 0x423   : > { %v5593_v58 = vadd.f32 %v1362_v63, %v5531_v3  ;;  %4019 = vmatpush3.bf16.msra.mxu1 %v4018_v30 }
 0x424   : > { %v1419_v7 = vadd.f32 %v1418_v51, %v5590_v49 }
 0x425   : > { %v1440_v60 = vadd.f32 %v1439_v6, %v5593_v58  ;;  %v1366_v19 = vpop.f32.mrb[48].mxu0 }
 0x426   : > { %v5598_v0 = vadd.f32 %v1366_v19, %v5528_v13  ;;  %v1368_v33 = vpop.f32.mrb[49].mxu0 }
 0x427   : > { %v5601_v28 = vadd.f32 %v1368_v33, %v5531_v3 }
 0x428   : > { %v1420_v1 = vadd.f32 %v1419_v7, %v5598_v0 }
 0x429   : > { %v1441_v34 = vadd.f32 %v1440_v60, %v5601_v28  ;;  %v1372_v63 = vpop.f32.mrb[50].mxu0 }
 0x42a   : > { %v5606_v23 = vadd.f32 %v1372_v63, %v5528_v13  ;;  %v1374_v42 = vpop.f32.mrb[51].mxu0 }
 0x42b   : > { %v5609_v51 = vadd.f32 %v1374_v42, %v5531_v3 }
 0x42c   : > { %v1421_v31 = vadd.f32 %v1420_v1, %v5606_v23 }
 0x42d   : > { %v1442_v12 = vadd.f32 %v1441_v34, %v5609_v51  ;;  %v1378_v2 = vpop.f32.mrb[52].mxu0 }
 0x42e   : > { %v1379_v6 = vadd.f32 %v1378_v2, %v5528_v13  ;;  %v1380_v30 = vpop.f32.mrb[53].mxu0 }
 0x42f   : > { %v5615_v7 = vadd.f32 %v1380_v30, %v5531_v3 }
 0x430   : > { %v1422_v60 = vadd.f32 %v1421_v31, %v1379_v6 }
 0x431   : > { %v1443_v19 = vadd.f32 %v1442_v12, %v5615_v7  ;;  %v1384_v33 = vpop.f32.mrb[54].mxu0 }
 0x432   : > { %v1385_v63 = vadd.f32 %v1384_v33, %v5528_v13  ;;  %v1386_v36 = vpop.f32.mrb[55].mxu0 }
 0x433   : > { %v5620_v42 = vadd.f32 %v1386_v36, %v5531_v3 }
 0x434   : > { %v1423_v1 = vadd.f32 %v1422_v60, %v1385_v63 }
 0x435   : > { %v1444_v34 = vadd.f32 %v1443_v19, %v5620_v42  ;;  %v1390_v52 = vpop.f32.mrb[56].mxu0 }
 0x436   : > { %v1391_v2 = vadd.f32 %v1390_v52, %v5528_v13  ;;  %v1392_v46 = vpop.f32.mrb[57].mxu0 }
 0x437   : > { %v5625_v30 = vadd.f32 %v1392_v46, %v5531_v3 }
 0x438   : > { %v1424_v31 = vadd.f32 %v1423_v1, %v1391_v2 }
 0x439   : > { %v1445_v12 = vadd.f32 %v1444_v34, %v5625_v30  ;;  %v1396_v61 = vpop.f32.mrb[58].mxu0 }
 0x43a   : > { %v1397_v33 = vadd.f32 %v1396_v61, %v5528_v13  ;;  %v1398_v37 = vpop.f32.mrb[59].mxu0 }
 0x43b   : > { %v5630_v36 = vadd.f32 %v1398_v37, %v5531_v3 }
 0x43c   : > { %v1425_v60 = vadd.f32 %v1424_v31, %v1397_v33 }
 0x43d   : > { %v1446_v19 = vadd.f32 %v1445_v12, %v5630_v36  ;;  %v1402_v48 = vpop.f32.mrb[60].mxu0 }
 0x43e   : > { %v1403_v52 = vadd.f32 %v1402_v48, %v5528_v13  ;;  %v1404_v27 = vpop.f32.mrb[61].mxu0 }
 0x43f   : > { %v1405_v46 = vadd.f32 %v1404_v27, %v5531_v3 }
 0x440   : > { %v1426_v54 = vadd.f32 %v1425_v60, %v1403_v52 }
 0x441   : > { %v1447_v1 = vadd.f32 %v1446_v19, %v1405_v46  ;;  %v1408_v22 = vpop.f32.mrb[62].mxu0 }
 0x442   : > { %v1409_v34 = vadd.f32 %v1408_v22, %v5528_v13  ;;  %v1410_v57 = vpop.f32.mrb[63].mxu0 }
 0x443   : > { %v1411_v61 = vadd.f32 %v1410_v57, %v5531_v3 }
 0x444   : > { %v1427_v16 = vadd.f32 %v1426_v54, %v1409_v34 }
 0x445   : > { %v1448_v37 = vadd.f32 %v1447_v1, %v1411_v61 }
 0x446   : > { %v1428_v5 = vrot.slane %v1427_v16, 4 }
 0x447   : > { %v1449_v31 = vrot.slane %v1448_v37, 4 }
 0x448   : > { %v1429_v62 = vadd.f32 %v1428_v5, %v1427_v16 }
 0x449   : > { %v1450_v12 = vadd.f32 %v1449_v31, %v1448_v37 }
 0x44a   : > { %v1430_v59 = vrot.slane %v1429_v62, 2 }
 0x44b   : > { %v1451_v56 = vrot.slane %v1450_v12, 2 }
 0x44c   : > { %v1431_v48 = vadd.f32 %v1430_v59, %v1429_v62 }
 0x44d   : > { %v1452_v53 = vadd.f32 %v1451_v56, %v1450_v12 }
 0x44e   : > { %v1432_v50 = vrot.slane %v1431_v48, 1 }
 0x44f   : > { %v1453_v27 = vrot.slane %v1452_v53, 1 }
 0x450   : > { %v1433_v60 = vadd.f32 %v1432_v50, %v1431_v48 }
 0x451   : > { %v1454_v47 = vadd.f32 %v1453_v27, %v1452_v53 }
 0x452   : > { %v1456_v19 = vmul.f32 0.0078125, %v1433_v60 }
 0x454   : > { %v5638_v22 = vsub.f32 %v5534_v55, %v1456_v19  ;;  %v5641_v57 = vsub.f32 %v5537_v15, %v1456_v19  ;;  %v5644_v54 = vsub.f32 %v5550_v21, %v1456_v19  ;;  %v5647_v5 = vsub.f32 %v5558_v43, %v1456_v19 }
 0x455   : > { %v5650_v59 = vsub.f32 %v5566_v45, %v1456_v19  ;;  %v5653_v56 = vsub.f32 %v5574_v18, %v1456_v19  ;;  %v5656_v50 = vsub.f32 %v5582_v4, %v1456_v19  ;;  %v5659_v53 = vsub.f32 %v5590_v49, %v1456_v19 }
 0x456   : > { %v5662_v62 = vsub.f32 %v5598_v0, %v1456_v19  ;;  %v5665_v16 = vsub.f32 %v5606_v23, %v1456_v19  ;;  %v5667_v13 = vsub.f32 %v1379_v6, %v1456_v19  ;;  %v5669_v3 = vsub.f32 %v1385_v63, %v1456_v19 }
 0x457   : > { %v5671_v55 = vsub.f32 %v1391_v2, %v1456_v19  ;;  %v5673_v15 = vsub.f32 %v1397_v33, %v1456_v19  ;;  %v5675_v21 = vsub.f32 %v1403_v52, %v1456_v19  ;;  %v5677_v43 = vsub.f32 %v1409_v34, %v1456_v19 }
 0x458   : > { %v1490_v45 = vmul.f32 %v5638_v22, %v5638_v22  ;;  %v1492_v18 = vmul.f32 %v5641_v57, %v5641_v57  ;;  %v1457_v4 = vmul.f32 0.0078125, %v1454_v47  ;;  %v1494_v49 = vmul.f32 %v5644_v54, %v5644_v54 }
 0x459   : > { %v1496_v0 = vmul.f32 %v5647_v5, %v5647_v5 }
 0x45a   : > { %v1522_v23 = vadd.f32 %v1492_v18, %v1490_v45  ;;  %v5688_v6 = vsub.f32 %v5540_v17, %v1457_v4  ;;  %v5691_v63 = vsub.f32 %v5543_v39, %v1457_v4  ;;  %v5694_v2 = vsub.f32 %v5553_v11, %v1457_v4 }
 0x45b   : > { %v5697_v33 = vsub.f32 %v5561_v40, %v1457_v4  ;;  %v5700_v47 = vsub.f32 %v5569_v14, %v1457_v4  ;;  %v5703_v52 = vsub.f32 %v5577_v24, %v1457_v4  ;;  %v5706_v1 = vsub.f32 %v5585_v20, %v1457_v4 }
 0x45c   : > { %v1523_v17 = vadd.f32 %v1522_v23, %v1494_v49  ;;  %v5709_v34 = vsub.f32 %v5593_v58, %v1457_v4  ;;  %v5712_v39 = vsub.f32 %v5601_v28, %v1457_v4  ;;  %v5715_v11 = vsub.f32 %v5609_v51, %v1457_v4 }
 0x45d   : > { %v5718_v40 = vsub.f32 %v5615_v7, %v1457_v4  ;;  %v5721_v14 = vsub.f32 %v5620_v42, %v1457_v4  ;;  %v5724_v24 = vsub.f32 %v5625_v30, %v1457_v4  ;;  %v5727_v20 = vsub.f32 %v5630_v36, %v1457_v4 }
 0x45e   : > { %v1498_v58 = vmul.f32 %v5650_v59, %v5650_v59  ;;  %v1524_v28 = vadd.f32 %v1523_v17, %v1496_v0  ;;  %v5731_v37 = vsub.f32 %v1405_v46, %v1457_v4  ;;  %v5733_v51 = vsub.f32 %v1411_v61, %v1457_v4 }
 0x45f   : > { %v1491_v7 = vmul.f32 %v5688_v6, %v5688_v6  ;;  %v1493_v42 = vmul.f32 %v5691_v63, %v5691_v63  ;;  %v1500_v30 = vmul.f32 %v5653_v56, %v5653_v56  ;;  %v1502_v36 = vmul.f32 %v5656_v50, %v5656_v50 }
 0x460   : > { %v1525_v31 = vadd.f32 %v1524_v28, %v1498_v58  ;;  %v1495_v46 = vmul.f32 %v5694_v2, %v5694_v2  ;;  %v1504_v61 = vmul.f32 %v5659_v53, %v5659_v53  ;;  %v1497_v60 = vmul.f32 %v5697_v33, %v5697_v33 }
 0x461   : > { %v1543_v48 = vadd.f32 %v1493_v42, %v1491_v7  ;;  %v1506_v45 = vmul.f32 %v5662_v62, %v5662_v62  ;;  %v1499_v4 = vmul.f32 %v5700_v47, %v5700_v47  ;;  %v1508_v0 = vmul.f32 %v5665_v16, %v5665_v16 }
 0x462   : > { %v1526_v12 = vadd.f32 %v1525_v31, %v1500_v30  ;;  %v1501_v17 = vmul.f32 %v5703_v52, %v5703_v52  ;;  %v1510_v28 = vmul.f32 %v5667_v13, %v5667_v13  ;;  %v1503_v42 = vmul.f32 %v5706_v1, %v5706_v1 }
 0x463   : > { %v1544_v19 = vadd.f32 %v1543_v48, %v1495_v46  ;;  %v1512_v31 = vmul.f32 %v5669_v3, %v5669_v3  ;;  %v1514_v48 = vmul.f32 %v5671_v55, %v5671_v55 }
 0x464   : > { %v1527_v27 = vadd.f32 %v1526_v12, %v1502_v36  ;;  %v1505_v12 = vmul.f32 %v5709_v34, %v5709_v34 }
 0x465   : > { %v1545_v49 = vadd.f32 %v1544_v19, %v1497_v60  ;;  %v1516_v19 = vmul.f32 %v5673_v15, %v5673_v15 }
 0x466   : > { %v1528_v18 = vadd.f32 %v1527_v27, %v1504_v61  ;;  %v1507_v27 = vmul.f32 %v5712_v39, %v5712_v39 }
 0x467   : > { %v1546_v58 = vadd.f32 %v1545_v49, %v1499_v4  ;;  %v1518_v49 = vmul.f32 %v5675_v21, %v5675_v21 }
 0x468   : > { %v1529_v23 = vadd.f32 %v1528_v18, %v1506_v45  ;;  %v1509_v18 = vmul.f32 %v5715_v11, %v5715_v11 }
 0x469   : > { %v1547_v30 = vadd.f32 %v1546_v58, %v1501_v17  ;;  %v1520_v58 = vmul.f32 %v5677_v43, %v5677_v43 }
 0x46a   : > { %v1530_v7 = vadd.f32 %v1529_v23, %v1508_v0  ;;  %v1511_v23 = vmul.f32 %v5718_v40, %v5718_v40 }
 0x46b   : > { %v1548_v46 = vadd.f32 %v1547_v30, %v1503_v42 }
 0x46c   : > { %v1531_v36 = vadd.f32 %v1530_v7, %v1510_v28  ;;  %v1513_v7 = vmul.f32 %v5721_v14, %v5721_v14 }
 0x46d   : > { %v1549_v60 = vadd.f32 %v1548_v46, %v1505_v12  ;;  %v1517_v46 = vmul.f32 %v5727_v20, %v5727_v20 }
 0x46e   : > { %v1532_v61 = vadd.f32 %v1531_v36, %v1512_v31  ;;  %v1515_v31 = vmul.f32 %v5724_v24, %v5724_v24 }
 0x46f   : > { %v1550_v4 = vadd.f32 %v1549_v60, %v1507_v27  ;;  %v1519_v27 = vmul.f32 %v5731_v37, %v5731_v37 }
 0x470   : > { %v1533_v45 = vadd.f32 %v1532_v61, %v1514_v48 }
 0x471   : > { %v1551_v17 = vadd.f32 %v1550_v4, %v1509_v18 }
 0x472   : > { %v1534_v0 = vadd.f32 %v1533_v45, %v1516_v19  ;;  %v1521_v45 = vmul.f32 %v5733_v51, %v5733_v51 }
 0x473   : > { %v1552_v42 = vadd.f32 %v1551_v17, %v1511_v23 }
 0x474   : > { %v1535_v28 = vadd.f32 %v1534_v0, %v1518_v49 }
 0x475   : > { %v1553_v36 = vadd.f32 %v1552_v42, %v1513_v7 }
 0x476   : > { %v1536_v30 = vadd.f32 %v1535_v28, %v1520_v58 }
 0x477   : > { %v1554_v48 = vadd.f32 %v1553_v36, %v1515_v31 }
 0x478   : > { %v1537_v12 = vrot.slane %v1536_v30, 4 }
 0x479   : > { %v1555_v60 = vadd.f32 %v1554_v48, %v1517_v46 }
 0x47a   : > { %v1538_v61 = vadd.f32 %v1537_v12, %v1536_v30 }
 0x47b   : > { %v1556_v18 = vadd.f32 %v1555_v60, %v1519_v27 }
 0x47c   : > { %v1539_v19 = vrot.slane %v1538_v61, 2 }
 0x47d   : > { %v1557_v49 = vadd.f32 %v1556_v18, %v1521_v45  ;;  %v3078_v45 = vld [vmem:[%s6670_s9 + $0x1] ss:$8 sm:$0x3] }
 0x47e   : > { %v1540_v4 = vadd.f32 %v1539_v19, %v1538_v61 }
 0x47f   : > { %v1558_v23 = vrot.slane %v1557_v49, 4 }
 0x480   : > { %v1541_v0 = vrot.slane %v1540_v4, 1 }
 0x481   : > { %v1559_v58 = vadd.f32 %v1558_v23, %v1557_v49  ;;  %v5823_v49 = vrot.slane %v3078_v45, %v5525_v25 }
 0x482   : > { %v1542_v17 = vadd.f32 %v1541_v0, %v1540_v4 }
 0x483   : > { %v1560_v7 = vrot.slane %v1559_v58, 2 }
 0x484   : > { %v1564_v28 = vmul.f32 0.0078125, %v1542_v17 }
 0x485   : > { %v1561_v31 = vadd.f32 %v1560_v7, %v1559_v58 }
 0x486   : > { %v1566_v42 = vadd.f32 1e-05, %v1564_v28 }
 0x487   : > { %v1562_v30 = vrot.slane %v1561_v31, 1 }
 0x488   : > { %4273 = vrsqrt.f32 %v1566_v42 }
 0x489   : > { %v1563_v36 = vadd.f32 %v1562_v30, %v1561_v31 }
 0x48b   : > { %v1565_v12 = vmul.f32 0.0078125, %v1563_v36 }
 0x48d   : > { %v1567_v46 = vadd.f32 1e-05, %v1565_v12 }
 0x48f   : > { %4275 = vrsqrt.f32 %v1567_v46 }
 0x492   : > { %v5789_v48 = vpop.eup %4273 }
 0x493   : > { %v5793_v61 = vmul.f32 %v5789_v48, %v5677_v43  ;;  %v1570_v27 = vmul.f32 %v5789_v48, %v5638_v22  ;;  %v1572_v60 = vmul.f32 %v5789_v48, %v5641_v57  ;;  %v1574_v19 = vmul.f32 %v5789_v48, %v5644_v54 }
 0x494   : > { %v1576_v18 = vmul.f32 %v5789_v48, %v5647_v5  ;;  %v1578_v43 = vmul.f32 %v5789_v48, %v5650_v59  ;;  %v1580_v4 = vmul.f32 %v5789_v48, %v5653_v56  ;;  %v1582_v22 = vmul.f32 %v5789_v48, %v5656_v50  ;;  %v3079_v5 = vld [vmem:[%s6670_s9 + $0x2] ss:$8 sm:$0x3] }
 0x495   : > { %v5814_v57 = vmul.f32 %v5789_v48, %v5659_v53  ;;  %v5817_v54 = vrot.slane %v3078_v45, %v5520_v10  ;;  %v5828_v56 = vrot.slane %v3079_v5, %v5520_v10  ;;  %v5831_v50 = vrot.slane %v3079_v5, %v5525_v25 }
 0x497   : > { %v1613_v53 = vmul.f32 %v5817_v54, %v1570_v27  ;;  %v1617_v36 = vmul.f32 %v5817_v54, %v1574_v19  ;;  %v1619_v45 = vmul.f32 %v5817_v54, %v1576_v18 }
 0x499   : > { %v5825_v59 = vpop.eup %4275 }
 0x49a   : > { %v5836_v0 = vmul.f32 %v5825_v59, %v5733_v51  ;;  %v1571_v23 = vmul.f32 %v5825_v59, %v5688_v6  ;;  %v1573_v17 = vmul.f32 %v5825_v59, %v5691_v63  ;;  %v1575_v58 = vmul.f32 %v5825_v59, %v5694_v2 }
 0x49b   : > { %v1577_v10 = vmul.f32 %v5825_v59, %v5697_v33  ;;  %v1579_v25 = vmul.f32 %v5825_v59, %v5700_v47  ;;  %v1581_v28 = vmul.f32 %v5825_v59, %v5703_v52  ;;  %v1583_v51 = vmul.f32 %v5825_v59, %v5706_v1 }
 0x49c   : > { %v1614_v6 = vmul.f32 %v5823_v49, %v1571_v23  ;;  %v1616_v7 = vmul.f32 %v5823_v49, %v1573_v17  ;;  %v1585_v63 = vmul.f32 %v5825_v59, %v5709_v34  ;;  %v1656_v2 = vadd.f32 %v5828_v56, %v1613_v53 }
 0x49d   : > { %v1615_v33 = vmul.f32 %v5817_v54, %v1572_v60  ;;  %v1618_v52 = vmul.f32 %v5823_v49, %v1575_v58  ;;  %v1620_v46 = vmul.f32 %v5823_v49, %v1577_v10  ;;  %v1660_v60 = vadd.f32 %v5828_v56, %v1617_v36 }
 0x49e   : > { %v1657_v42 = vadd.f32 %v5831_v50, %v1614_v6  ;;  %v1659_v47 = vadd.f32 %v5831_v50, %v1616_v7  ;;  %v1688_v30 = vmax.f32 %v1656_v2, 0.0  ;;  %v1622_v23 = vmul.f32 %v5823_v49, %v1579_v25 }
 0x49f   : > { %v1658_v1 = vadd.f32 %v5828_v56, %v1615_v33  ;;  %v1661_v34 = vadd.f32 %v5831_v50, %v1618_v52  ;;  %v1663_v53 = vadd.f32 %v5831_v50, %v1620_v46  ;;  %v1692_v19 = vmax.f32 %v1660_v60, 0.0 }
 0x4a0   : > { %v1689_v31 = vmax.f32 %v1657_v42, 0.0  ;;  %v1691_v12 = vmax.f32 %v1659_v47, 0.0  ;;  %v1662_v17 = vadd.f32 %v5828_v56, %v1619_v45  ;;  %v1621_v58 = vmul.f32 %v5817_v54, %v1578_v43 }
 0x4a1   : > { %v1690_v27 = vmax.f32 %v1658_v1, 0.0  ;;  %v1693_v5 = vmax.f32 %v1661_v34, 0.0  ;;  %v1695_v10 = vmax.f32 %v1663_v53, 0.0  ;;  %v1665_v6 = vadd.f32 %v5831_v50, %v1622_v23 }
 0x4a2   : > { %1784 = vmatprep.mubr.f32.mxu1 %v1689_v31  ;;  %v1624_v7 = vmul.f32 %v5823_v49, %v1581_v28  ;;  %v1694_v18 = vmax.f32 %v1662_v17, 0.0  ;;  %v1664_v2 = vadd.f32 %v5828_v56, %v1621_v58  ;;  %v1623_v33 = vmul.f32 %v5817_v54, %v1580_v4 }
 0x4a3   : > { %1785 = vmatmul.mubr.f32.vlgmr.msra.gmra.mrb[32].mxu1 %v1688_v30  ;;  %v1697_v25 = vmax.f32 %v1665_v6, 0.0  ;;  %v1626_v47 = vmul.f32 %v5823_v49, %v1583_v51  ;;  %v1625_v31 = vmul.f32 %v5817_v54, %v1582_v22  ;;  %v1628_v1 = vmul.f32 %v5823_v49, %v1585_v63 }
 0x4a4   : > { %1789 = vmatprep.mubr.f32.mxu1 %v1691_v12  ;;  %v1667_v42 = vadd.f32 %v5831_v50, %v1624_v7  ;;  %v1696_v43 = vmax.f32 %v1664_v2, 0.0  ;;  %v1666_v52 = vadd.f32 %v5828_v56, %v1623_v33  ;;  %v1587_v4 = vmul.f32 %v5825_v59, %v5712_v39 }
 0x4a5   : > { %v1669_v30 = vadd.f32 %v5831_v50, %v1626_v47  ;;  %v1668_v51 = vadd.f32 %v5828_v56, %v1625_v31  ;;  %v1627_v12 = vmul.f32 %v5817_v54, %v5814_v57  ;;  %v1586_v34 = vmul.f32 %v5789_v48, %v5662_v62 }
 0x4a6   : > { %v1699_v28 = vmax.f32 %v1667_v42, 0.0  ;;  %v1698_v36 = vmax.f32 %v1666_v52, 0.0  ;;  %v1671_v46 = vadd.f32 %v5831_v50, %v1628_v1  ;;  %v1589_v63 = vmul.f32 %v5825_v59, %v5715_v11 }
 0x4a7   : > { %1790 = vmatmul.mubr.f32.gmra.mrb[34].mxu1 %v1690_v27  ;;  %v1701_v22 = vmax.f32 %v1669_v30, 0.0  ;;  %v1630_v27 = vmul.f32 %v5823_v49, %v1587_v4  ;;  %v1700_v39 = vmax.f32 %v1668_v51, 0.0  ;;  %v1670_v60 = vadd.f32 %v5828_v56, %v1627_v12 }
 0x4a8   : > { %1794 = vmatprep.mubr.f32.mxu1 %v1693_v5  ;;  %v1629_v45 = vmul.f32 %v5817_v54, %v1586_v34  ;;  %v1588_v57 = vmul.f32 %v5789_v48, %v5665_v16  ;;  %v1703_v5 = vmax.f32 %v1671_v46, 0.0  ;;  %v1632_v53 = vmul.f32 %v5823_v49, %v1589_v63 }
 0x4a9   : > { %v1673_v62 = vadd.f32 %v5831_v50, %v1630_v27  ;;  %v1591_v23 = vmul.f32 %v5825_v59, %v5718_v40  ;;  %v1702_v11 = vmax.f32 %v1670_v60, 0.0  ;;  %v1590_v58 = vmul.f32 %v5789_v48, %v5667_v13 }
 0x4aa   : > { %v1631_v17 = vmul.f32 %v5817_v54, %v1588_v57  ;;  %v1675_v16 = vadd.f32 %v5831_v50, %v1632_v53  ;;  %v1593_v7 = vmul.f32 %v5825_v59, %v5721_v14  ;;  %v1592_v33 = vmul.f32 %v5789_v48, %v5669_v3 }
 0x4ab   : > { %1795 = vmatmul.mubr.f32.gmra.mrb[36].mxu1 %v1692_v19  ;;  %v1672_v19 = vadd.f32 %v5828_v56, %v1629_v45  ;;  %v1634_v6 = vmul.f32 %v5823_v49, %v1591_v23  ;;  %v1633_v2 = vmul.f32 %v5817_v54, %v1590_v58  ;;  %v1595_v47 = vmul.f32 %v5825_v59, %v5724_v24 }
 0x4ac   : > { %1799 = vmatprep.mubr.f32.mxu1 %v1695_v10  ;;  %v1705_v10 = vmax.f32 %v1673_v62, 0.0  ;;  %v1636_v42 = vmul.f32 %v5823_v49, %v1593_v7  ;;  %v1635_v52 = vmul.f32 %v5817_v54, %v1592_v33  ;;  %v1594_v31 = vmul.f32 %v5789_v48, %v5671_v55 }
 0x4ad   : > { %v1704_v40 = vmax.f32 %v1672_v19, 0.0  ;;  %v1677_v13 = vadd.f32 %v5831_v50, %v1634_v6  ;;  %v1638_v30 = vmul.f32 %v5823_v49, %v1595_v47  ;;  %v1597_v1 = vmul.f32 %v5825_v59, %v5727_v20 }
 0x4ae   : > { %v1679_v3 = vadd.f32 %v5831_v50, %v1636_v42  ;;  %v1678_v4 = vadd.f32 %v5828_v56, %v1635_v52  ;;  %v1596_v51 = vmul.f32 %v5789_v48, %v5673_v15  ;;  %v1598_v63 = vmul.f32 %v5789_v48, %v5675_v21 }
 0x4af   : > { %1800 = vmatmul.mubr.f32.gmra.mrb[38].mxu1 %v1694_v18  ;;  %v1674_v18 = vadd.f32 %v5828_v56, %v1631_v17  ;;  %v1681_v55 = vadd.f32 %v5831_v50, %v1638_v30  ;;  %v1640_v34 = vmul.f32 %v5823_v49, %v1597_v1  ;;  %v1644_v62 = vmul.f32 %v5823_v49, %v5836_v0 }
 0x4b0   : > { %1804 = vmatprep.mubr.f32.mxu1 %v1697_v25  ;;  %v1707_v25 = vmax.f32 %v1675_v16, 0.0  ;;  %v1711_v12 = vmax.f32 %v1679_v3, 0.0  ;;  %v1710_v20 = vmax.f32 %v1678_v4, 0.0  ;;  %v1639_v27 = vmul.f32 %v5817_v54, %v1596_v51 }
 0x4b1   : > { %v1706_v14 = vmax.f32 %v1674_v18, 0.0  ;;  %v1683_v15 = vadd.f32 %v5831_v50, %v1640_v34  ;;  %v1643_v53 = vmul.f32 %v5817_v54, %v5793_v61  ;;  %v6671_v0 = vunpack.c.h.bf16 %v5287_v8  ;;  %v5953_v61 = vld [vmem:[%s6670_s9 + $0x3] ss:$0 sm:$0xff] }
 0x4b3   : > { %1805 = vmatmul.mubr.f32.gmra.mrb[40].mxu1 %v1696_v43  ;;  %v1676_v43 = vadd.f32 %v5828_v56, %v1633_v2  ;;  %v1715_v57 = vmax.f32 %v1683_v15, 0.0  ;;  %v1686_v17 = vadd.f32 %v5828_v56, %v1643_v53 }
 0x4b4   : > { %1809 = vmatprep.mubr.f32.mxu1 %v1699_v28  ;;  %v1709_v28 = vmax.f32 %v1677_v13, 0.0 }
 0x4b5   : > { %v1708_v24 = vmax.f32 %v1676_v43, 0.0 }
 0x4b7   : > { %1810 = vmatmul.mubr.f32.gmra.mrb[42].mxu1 %v1698_v36  ;;  %v1637_v36 = vmul.f32 %v5817_v54, %v1594_v31 }
 0x4b8   : > { %1814 = vmatprep.mubr.f32.mxu1 %v1701_v22  ;;  %v1599_v22 = vmul.f32 %v5825_v59, %v5731_v37  ;;  %v1682_v37 = vadd.f32 %v5828_v56, %v1639_v27  ;;  %v1641_v59 = vmul.f32 %v5817_v54, %v1598_v63 }
 0x4b9   : > { %v1680_v46 = vadd.f32 %v5828_v56, %v1637_v36 }
 0x4ba   : > { %v1642_v60 = vmul.f32 %v5823_v49, %v1599_v22  ;;  %v1714_v21 = vmax.f32 %v1682_v37, 0.0  ;;  %v1684_v48 = vadd.f32 %v5828_v56, %v1641_v59  ;;  %v1718_v49 = vmax.f32 %v1686_v17, 0.0 }
 0x4bb   : > { %1815 = vmatmul.mubr.f32.gmra.mrb[44].mxu1 %v1700_v39  ;;  %v1713_v39 = vmax.f32 %v1681_v55, 0.0  ;;  %v1712_v45 = vmax.f32 %v1680_v46, 0.0 }
 0x4bc   : > { %1819 = vmatprep.mubr.f32.mxu1 %v1703_v5  ;;  %v1685_v5 = vadd.f32 %v5831_v50, %v1642_v60  ;;  %v1716_v19 = vmax.f32 %v1684_v48, 0.0 }
 0x4be   : > { %v1717_v23 = vmax.f32 %v1685_v5, 0.0 }
 0x4bf   : > { %1820 = vmatmul.mubr.f32.gmra.mrb[46].mxu1 %v1702_v11  ;;  %v1687_v11 = vadd.f32 %v5831_v50, %v1644_v62 }
 0x4c0   : > { %1824 = vmatprep.mubr.f32.mxu1 %v1705_v10 }
 0x4c1   : > { %v1719_v58 = vmax.f32 %v1687_v11, 0.0 }
 0x4c3   : > { %1825 = vmatmul.mubr.f32.gmra.mrb[48].mxu1 %v1704_v40 }
 0x4c4   : > { %1829 = vmatprep.mubr.f32.mxu1 %v1707_v25 }
 0x4c7   : > { %1830 = vmatmul.mubr.f32.gmra.mrb[50].mxu1 %v1706_v14 }
 0x4c8   : > { %1834 = vmatprep.mubr.f32.mxu1 %v1709_v28 }
 0x4cb   : > { %1835 = vmatmul.mubr.f32.gmra.mrb[52].mxu1 %v1708_v24 }
 0x4cc   : > { %1839 = vmatprep.mubr.f32.mxu1 %v1711_v12 }
 0x4cf   : > { %1840 = vmatmul.mubr.f32.gmra.mrb[54].mxu1 %v1710_v20 }
 0x4d0   : > { %1844 = vmatprep.mubr.f32.mxu1 %v1713_v39 }
 0x4d3   : > { %1845 = vmatmul.mubr.f32.gmra.mrb[56].mxu1 %v1712_v45 }
 0x4d4   : > { %1849 = vmatprep.mubr.f32.mxu1 %v1715_v57 }
 0x4d7   : > { %1850 = vmatmul.mubr.f32.gmra.mrb[58].mxu1 %v1714_v21 }
 0x4d8   : > { %1854 = vmatprep.mubr.f32.mxu1 %v1717_v23 }
 0x4db   : > { %1855 = vmatmul.mubr.f32.gmra.mrb[60].mxu1 %v1716_v19 }
 0x4dc   : > { %1859 = vmatprep.mubr.f32.mxu1 %v1719_v58 }
 0x4df   : > { %1860 = vmatmul.mubr.f32.gmra.mrb[62].mxu1 %v1718_v49 }
 0x4e0   : > { %2234 = vmatprep.mubr.f32.mxu1 %v6671_v0 }
 0x576   : > { %v3328_v10 = vpop.f32.mrb[32].mxu1 }
 0x577   : > { %v3329_v16 = vpop.f32.mrb[33].mxu1 }
 0x578   : > { %v3330_v6 = vadd.f32 %v3329_v16, %v3328_v10 }
 0x57a   : > { %v3331_v54 = vpop.f32.mrb[34].mxu1  ;;  %v5956_v56 = vadd.f32 %v3330_v6, %v5953_v61 }
 0x57b   : > { %v3332_v50 = vpop.f32.mrb[35].mxu1 }
 0x57c   : > { %v3333_v7 = vadd.f32 %v3332_v50, %v3331_v54  ;;  %v1865_v33 = vmax.f32 %v5956_v56, 0.0 }
 0x57e   : > { %v5959_v40 = vadd.f32 %v3333_v7, %v5953_v61  ;;  %v3334_v18 = vpop.f32.mrb[36].mxu1 }
 0x57f   : > { %v3335_v2 = vpop.f32.mrb[37].mxu1 }
 0x580   : > { %v1866_v25 = vmax.f32 %v5959_v40, 0.0  ;;  %v3336_v13 = vadd.f32 %v3335_v2, %v3334_v18 }
 0x582   : > { %v3337_v42 = vpop.f32.mrb[38].mxu1  ;;  %v4020_v47 = vpack.c.bf16 %v1866_v25, %v1865_v33  ;;  %v5968_v43 = vadd.f32 %v3336_v13, %v5953_v61 }
 0x583   : > { %v3338_v14 = vpop.f32.mrb[39].mxu1 }
 0x584   : > { %v3339_v52 = vadd.f32 %v3338_v14, %v3337_v42  ;;  %4021 = vmatprep.subr.bf16.mxu0 %v4020_v47  ;;  %v1867_v30 = vmax.f32 %v5968_v43, 0.0 }
 0x585   : > { %4023 = vmatpush3.bf16.msra.mxu0 %v4020_v47 }
 0x586   : > { %v5971_v31 = vadd.f32 %v3339_v52, %v5953_v61  ;;  %v3340_v28 = vpop.f32.mrb[40].mxu1 }
 0x587   : > { %v3341_v3 = vpop.f32.mrb[41].mxu1 }
 0x588   : > { %v1868_v1 = vmax.f32 %v5971_v31, 0.0  ;;  %v3342_v24 = vadd.f32 %v3341_v3, %v3340_v28 }
 0x58a   : > { %v3343_v4 = vpop.f32.mrb[42].mxu1  ;;  %v4024_v36 = vpack.c.bf16 %v1868_v1, %v1867_v30  ;;  %v5980_v12 = vadd.f32 %v3342_v24, %v5953_v61 }
 0x58b   : > { %v3344_v51 = vpop.f32.mrb[43].mxu1 }
 0x58c   : > { %v3345_v55 = vadd.f32 %v3344_v51, %v3343_v4  ;;  %4025 = vmatprep.subr.bf16.mxu0 %v4024_v36  ;;  %v1869_v46 = vmax.f32 %v5980_v12, 0.0 }
 0x58d   : > { %4027 = vmatpush3.bf16.msra.mxu0 %v4024_v36 }
 0x58e   : > { %v5983_v34 = vadd.f32 %v3345_v55, %v5953_v61  ;;  %v3346_v22 = vpop.f32.mrb[44].mxu1 }
 0x58f   : > { %v3347_v20 = vpop.f32.mrb[45].mxu1 }
 0x590   : > { %v1870_v27 = vmax.f32 %v5983_v34, 0.0  ;;  %v3348_v63 = vadd.f32 %v3347_v20, %v3346_v22 }
 0x592   : > { %v3349_v39 = vpop.f32.mrb[46].mxu1  ;;  %v4028_v15 = vpack.c.bf16 %v1870_v27, %v1869_v46  ;;  %v5992_v45 = vadd.f32 %v3348_v63, %v5953_v61 }
 0x593   : > { %v3350_v60 = vpop.f32.mrb[47].mxu1 }
 0x594   : > { %v3351_v37 = vadd.f32 %v3350_v60, %v3349_v39  ;;  %4029 = vmatprep.subr.bf16.mxu0 %v4028_v15  ;;  %v1871_v62 = vmax.f32 %v5992_v45, 0.0 }
 0x595   : > { %4031 = vmatpush3.bf16.msra.mxu0 %v4028_v15 }
 0x596   : > { %v5995_v59 = vadd.f32 %v3351_v37, %v5953_v61  ;;  %v3352_v57 = vpop.f32.mrb[48].mxu1 }
 0x597   : > { %v3353_v5 = vpop.f32.mrb[49].mxu1 }
 0x598   : > { %v1872_v21 = vmax.f32 %v5995_v59, 0.0  ;;  %v3354_v48 = vadd.f32 %v3353_v5, %v3352_v57 }
 0x59a   : > { %v3355_v53 = vpop.f32.mrb[50].mxu1  ;;  %v4032_v23 = vpack.c.bf16 %v1872_v21, %v1871_v62  ;;  %v6004_v19 = vadd.f32 %v3354_v48, %v5953_v61 }
 0x59b   : > { %v3356_v11 = vpop.f32.mrb[51].mxu1 }
 0x59c   : > { %v3357_v17 = vadd.f32 %v3356_v11, %v3355_v53  ;;  %4033 = vmatprep.subr.bf16.mxu0 %v4032_v23  ;;  %v1873_v10 = vmax.f32 %v6004_v19, 0.0 }
 0x59d   : > { %4035 = vmatpush3.bf16.msra.mxu0 %v4032_v23 }
 0x59e   : > { %v6007_v58 = vadd.f32 %v3357_v17, %v5953_v61  ;;  %v3358_v49 = vpop.f32.mrb[52].mxu1 }
 0x59f   : > { %v3359_v0 = vpop.f32.mrb[53].mxu1 }
 0x5a0   : > { %v1874_v16 = vmax.f32 %v6007_v58, 0.0  ;;  %v3360_v6 = vadd.f32 %v3359_v0, %v3358_v49  ;;  %v6672_v49 = vunpack.c.h.bf16 %v5103_v9  ;;  %v6673_v0 = vunpack.c.l.bf16 %v5149_v26 }
 0x5a1   : > { %v6679_v9 = vunpack.c.l.bf16 %v5172_v35 }
 0x5a2   : > { %v3361_v54 = vpop.f32.mrb[54].mxu1  ;;  %v4036_v50 = vpack.c.bf16 %v1874_v16, %v1873_v10  ;;  %v6016_v18 = vadd.f32 %v3360_v6, %v5953_v61  ;;  %v6675_v6 = vunpack.c.l.bf16 %v5154_v29 }
 0x5a3   : > { %v3362_v7 = vpop.f32.mrb[55].mxu1 }
 0x5a4   : > { %v3363_v2 = vadd.f32 %v3362_v7, %v3361_v54  ;;  %4037 = vmatprep.subr.bf16.mxu0 %v4036_v50  ;;  %v1875_v14 = vmax.f32 %v6016_v18, 0.0  ;;  %v6676_v54 = vunpack.c.h.bf16 %v5154_v29  ;;  %v6678_v7 = vunpack.c.h.bf16 %v5163_v32 }
 0x5a5   : > { %4039 = vmatpush3.bf16.msra.mxu0 %v4036_v50  ;;  %v6677_v50 = vunpack.c.l.bf16 %v5163_v32  ;;  %v6683_v29 = vunpack.c.l.bf16 %v5190_v41  ;;  %v6685_v32 = vunpack.c.l.bf16 %v5199_v44 }
 0x5a6   : > { %v6019_v13 = vadd.f32 %v3363_v2, %v5953_v61  ;;  %v3364_v42 = vpop.f32.mrb[56].mxu1  ;;  %v6680_v2 = vunpack.c.h.bf16 %v5172_v35  ;;  %v6687_v35 = vld [vmem:[#allocation32_spill] sm:$0xff] }
 0x5a7   : > { %v3365_v47 = vpop.f32.mrb[57].mxu1 }
 0x5a8   : > { %v1876_v52 = vmax.f32 %v6019_v13, 0.0  ;;  %v3366_v28 = vadd.f32 %v3365_v47, %v3364_v42  ;;  %v6682_v42 = vunpack.c.h.bf16 %v5181_v38  ;;  %v6684_v47 = vunpack.c.h.bf16 %v5190_v41 }
 0x5aa   : > { %v3367_v3 = vpop.f32.mrb[58].mxu1  ;;  %v4040_v24 = vpack.c.bf16 %v1876_v52, %v1875_v14  ;;  %v6028_v36 = vadd.f32 %v3366_v28, %v5953_v61  ;;  %v6686_v28 = vunpack.c.h.bf16 %v5199_v44 }
 0x5ab   : > { %v3368_v4 = vpop.f32.mrb[59].mxu1 }
 0x5ac   : > { %v3369_v51 = vadd.f32 %v3368_v4, %v3367_v3  ;;  %4041 = vmatprep.subr.bf16.mxu0 %v4040_v24  ;;  %v1877_v63 = vmax.f32 %v6028_v36, 0.0  ;;  %v6688_v3 = vunpack.c.l.bf16 %v6687_v35 }
 0x5ad   : > { %4043 = vmatpush3.bf16.msra.mxu0 %v4040_v24  ;;  %v6689_v24 = vunpack.c.h.bf16 %v6687_v35 }
 0x5ae   : > { %v6031_v55 = vadd.f32 %v3369_v51, %v5953_v61  ;;  %v3370_v22 = vpop.f32.mrb[60].mxu1  ;;  %v6693_v51 = vld [vmem:[#allocation34_spill] sm:$0xff] }
 0x5af   : > { %v3371_v20 = vpop.f32.mrb[61].mxu1  ;;  %v6695_v44 = vunpack.c.h.bf16 %v6693_v51 }
 0x5b0   : > { %v1878_v39 = vmax.f32 %v6031_v55, 0.0  ;;  %v3372_v15 = vadd.f32 %v3371_v20, %v3370_v22  ;;  %v6694_v22 = vunpack.c.l.bf16 %v6693_v51  ;;  %v6696_v20 = vld [vmem:[#allocation35_spill] sm:$0xff]  ;;  %v735_v51 = vld [vmem:[#allocation13 + $0x50] sm:$0xff]  ;;  %v6266_v55 = vld [vmem:[%s6670_s9 + $0x4] ss:$0 sm:$0xff] }
 0x5b2   : > { %v3373_v60 = vpop.f32.mrb[62].mxu1  ;;  %v4044_v37 = vpack.c.bf16 %v1878_v39, %v1877_v63  ;;  %v6040_v5 = vadd.f32 %v3372_v15, %v5953_v61  ;;  %v6697_v15 = vunpack.c.l.bf16 %v6696_v20 }
 0x5b3   : > { %v3374_v57 = vpop.f32.mrb[63].mxu1 }
 0x5b4   : > { %v3375_v48 = vadd.f32 %v3374_v57, %v3373_v60  ;;  %4045 = vmatprep.subr.bf16.mxu0 %v4044_v37  ;;  %v1879_v23 = vmax.f32 %v6040_v5, 0.0  ;;  %v6698_v60 = vunpack.c.h.bf16 %v6696_v20 }
 0x5b5   : > { %4047 = vmatpush3.bf16.msra.mxu0 %v4044_v37  ;;  %v6699_v37 = vld [vmem:[#allocation36_spill] sm:$0xff] }
 0x5b6   : > { %v6043_v53 = vadd.f32 %v3375_v48, %v5953_v61  ;;  %v6674_v61 = vunpack.c.h.bf16 %v5149_v26  ;;  %v6681_v26 = vunpack.c.l.bf16 %v5181_v38  ;;  %v6690_v38 = vld [vmem:[#allocation33_spill] sm:$0xff]  ;;  %v6700_v57 = vunpack.c.l.bf16 %v6699_v37 }
 0x5b7   : > { %v6691_v4 = vunpack.c.l.bf16 %v6690_v38  ;;  %v6692_v41 = vunpack.c.h.bf16 %v6690_v38  ;;  %v6701_v48 = vunpack.c.h.bf16 %v6699_v37 }
 0x5b8   : > { %v1880_v11 = vmax.f32 %v6043_v53, 0.0 }
 0x5ba   : > { %v4048_v17 = vpack.c.bf16 %v1880_v11, %v1879_v23 }
 0x5bc   : > { %4049 = vmatprep.subr.bf16.mxu0 %v4048_v17 }
 0x5bd   : > { %4051 = vmatpush3.bf16.msra.mxu0 %v4048_v17  ;;  %v6702_v17 = vld [vmem:[#allocation37_spill] sm:$0xff] }
 0x5c0   : > { %3698 = vmatmul.mubr.f32.vlgmr.msra.gmra.mrb[64].mxu0 %v6672_v49  ;;  %v6703_v49 = vunpack.c.l.bf16 %v6702_v17 }
 0x5c1   : > { %3700 = vmatprep.mubr.f32.mxu0 %v6673_v0  ;;  %v6704_v0 = vunpack.c.h.bf16 %v6702_v17  ;;  %v737_v17 = vld [vmem:[#allocation13 + $0x90] sm:$0xff] }
 0x5c4   : > { %3701 = vmatmul.mubr.f32.gmra.mrb[66].mxu0 %v6674_v61  ;;  %v6705_v61 = vld [vmem:[#allocation38_spill] sm:$0xff] }
 0x5c5   : > { %3703 = vmatprep.mubr.f32.mxu0 %v6675_v6  ;;  %v6706_v6 = vunpack.c.l.bf16 %v6705_v61 }
 0x5c8   : > { %3704 = vmatmul.mubr.f32.gmra.mrb[68].mxu0 %v6676_v54  ;;  %v6707_v54 = vunpack.c.h.bf16 %v6705_v61  ;;  %v1885_v61 = vld [vmem:[%s5064_s13 + $0x20] sm:$0xff] }
 0x5c9   : > { %3706 = vmatprep.mubr.f32.mxu0 %v6677_v50  ;;  %v6708_v50 = vld [vmem:[#allocation39_spill] sm:$0xff] }
 0x5cc   : > { %3707 = vmatmul.mubr.f32.gmra.mrb[70].mxu0 %v6678_v7  ;;  %v6709_v7 = vunpack.c.l.bf16 %v6708_v50 }
 0x5cd   : > { %3709 = vmatprep.mubr.f32.mxu0 %v6679_v9  ;;  %v6710_v9 = vunpack.c.h.bf16 %v6708_v50 }
 0x5d0   : > { %3710 = vmatmul.mubr.f32.gmra.mrb[72].mxu0 %v6680_v2  ;;  %v1882_v2 = vld [vmem:[%s5064_s13 + $0x8] sm:$0xff] }
 0x5d1   : > { %3712 = vmatprep.mubr.f32.mxu0 %v6681_v26  ;;  %v1881_v26 = vld [vmem:[%s5064_s13] sm:$0xff] }
 0x5d4   : > { %3713 = vmatmul.mubr.f32.gmra.mrb[74].mxu0 %v6682_v42 }
 0x5d5   : > { %3715 = vmatprep.mubr.f32.mxu0 %v6683_v29 }
 0x5d8   : > { %3716 = vmatmul.mubr.f32.gmra.mrb[76].mxu0 %v6684_v47 }
 0x5d9   : > { %3718 = vmatprep.mubr.f32.mxu0 %v6685_v32 }
 0x5dc   : > { %3719 = vmatmul.mubr.f32.gmra.mrb[78].mxu0 %v6686_v28  ;;  %v1884_v28 = vld [vmem:[%s5064_s13 + $0x18] sm:$0xff] }
 0x5dd   : > { %3721 = vmatprep.mubr.f32.mxu0 %v6688_v3  ;;  %v1883_v3 = vld [vmem:[%s5064_s13 + $0x10] sm:$0xff] }
 0x5e0   : > { %3722 = vmatmul.mubr.f32.gmra.mrb[80].mxu0 %v6689_v24 }
 0x5e1   : > { %3724 = vmatprep.mubr.f32.mxu0 %v6691_v4  ;;  %v733_v4 = vld [vmem:[#allocation13 + $0x10] sm:$0xff] }
 0x5e4   : > { %3725 = vmatmul.mubr.f32.gmra.mrb[82].mxu0 %v6692_v41  ;;  %v734_v41 = vld [vmem:[#allocation13 + $0x30] sm:$0xff] }
 0x5e5   : > { %3727 = vmatprep.mubr.f32.mxu0 %v6694_v22  ;;  %v4084_v20 = vpack.c.bf16 %v734_v41, %v733_v4 }
 0x5e7   : > { %4085 = vmatprep.subr.bf16.mxu0 %v4084_v20 }
 0x5e8   : > { %3728 = vmatmul.mubr.f32.gmra.mrb[84].mxu0 %v6695_v44 }
 0x5e9   : > { %3730 = vmatprep.mubr.f32.mxu0 %v6697_v15  ;;  %v736_v15 = vld [vmem:[#allocation13 + $0x70] sm:$0xff]  ;;  %4087 = vmatpush3.bf16.msra.mxu0 %v4084_v20 }
 0x5ea   : > { %v742_v20 = vld [vmem:[#allocation13 + $0x130] sm:$0xff] }
 0x5ec   : > { %3731 = vmatmul.mubr.f32.gmra.mrb[86].mxu0 %v6698_v60 }
 0x5ed   : > { %3733 = vmatprep.mubr.f32.mxu0 %v6700_v57  ;;  %v1886_v57 = vld [vmem:[%s5064_s13 + $0x28] sm:$0xff] }
 0x5f0   : > { %3734 = vmatmul.mubr.f32.gmra.mrb[88].mxu0 %v6701_v48  ;;  %v4088_v48 = vpack.c.bf16 %v736_v15, %v735_v51 }
 0x5f1   : > { %3736 = vmatprep.mubr.f32.mxu0 %v6703_v49  ;;  %v738_v49 = vld [vmem:[#allocation13 + $0xb0] sm:$0xff] }
 0x5f2   : > { %4089 = vmatprep.subr.bf16.mxu0 %v4088_v48 }
 0x5f3   : > { %4091 = vmatpush3.bf16.msra.mxu0 %v4088_v48 }
 0x5f4   : > { %3737 = vmatmul.mubr.f32.gmra.mrb[90].mxu0 %v6704_v0 }
 0x5f5   : > { %3739 = vmatprep.mubr.f32.mxu0 %v6706_v6 }
 0x5f8   : > { %3740 = vmatmul.mubr.f32.gmra.mrb[92].mxu0 %v6707_v54 }
 0x5f9   : > { %3742 = vmatprep.mubr.f32.mxu0 %v6709_v7 }
 0x5fc   : > { %3743 = vmatmul.mubr.f32.gmra.mrb[94].mxu0 %v6710_v9  ;;  %v4092_v9 = vpack.c.bf16 %v738_v49, %v737_v17 }
 0x5fe   : > { %4093 = vmatprep.subr.bf16.mxu0 %v4092_v9 }
 0x5ff   : > { %4095 = vmatpush3.bf16.msra.mxu0 %v4092_v9 }
 0x693   : > { %v3699_v42 = vpop.f32.mrb[64].mxu0 }
 0x694   : > { %v1985_v29 = vadd.f32 %v3699_v42, %v1882_v2  ;;  %v1979_v47 = vpop.f32.mrb[65].mxu0  ;;  %v1888_v42 = vld [vmem:[%s5064_s13 + $0x38] sm:$0xff] }
 0x695   : > { %v1980_v32 = vadd.f32 %v1979_v47, %v1881_v26  ;;  %v740_v47 = vld [vmem:[#allocation13 + $0xf0] sm:$0xff] }
 0x696   : > { %v2139_v35 = vmax.f32 %v1985_v29, 0.0  ;;  %v739_v29 = vld [vmem:[#allocation13 + $0xd0] sm:$0xff] }
 0x697   : > { %v2138_v24 = vmax.f32 %v1980_v32, 0.0  ;;  %v3702_v38 = vpop.f32.mrb[66].mxu0  ;;  %v4096_v4 = vpack.c.bf16 %v740_v47, %v739_v29 }
 0x698   : > { %v1995_v22 = vadd.f32 %v3702_v38, %v1884_v28  ;;  %v1989_v44 = vpop.f32.mrb[67].mxu0  ;;  %v1887_v28 = vld [vmem:[%s5064_s13 + $0x30] sm:$0xff] }
 0x699   : > { %v6117_v60 = vpack.c.bf16 %v2139_v35, %v2138_v24  ;;  %v1990_v37 = vadd.f32 %v1989_v44, %v1883_v3  ;;  %v741_v44 = vld [vmem:[#allocation13 + $0x110] sm:$0xff]  ;;  %4097 = vmatprep.subr.bf16.mxu0 %v4096_v4 }
 0x69a   : > { %v2141_v0 = vmax.f32 %v1995_v22, 0.0  ;;  %v1890_v22 = vld [vmem:[%s5064_s13 + $0x48] sm:$0xff]  ;;  %v4100_v48 = vpack.c.bf16 %v742_v20, %v741_v44  ;;  %4099 = vmatpush3.bf16.msra.mxu0 %v4096_v4 }
 0x69b   : > { %v2140_v6 = vmax.f32 %v1990_v37, 0.0  ;;  %v3705_v54 = vpop.f32.mrb[68].mxu0  ;;  %v1889_v37 = vld [vmem:[%s5064_s13 + $0x40] sm:$0xff] }
 0x69c   : > { %v2005_v50 = vadd.f32 %v3705_v54, %v1886_v57  ;;  %v1999_v7 = vpop.f32.mrb[69].mxu0  ;;  %v1892_v54 = vld [vmem:[%s5064_s13 + $0x58] sm:$0xff]  ;;  %4101 = vmatprep.subr.bf16.mxu0 %v4100_v48 }
 0x69d   : > { %v6121_v2 = vpack.c.bf16 %v2141_v0, %v2140_v6  ;;  %v2000_v26 = vadd.f32 %v1999_v7, %v1885_v61  ;;  %v744_v7 = vld [vmem:[#allocation13 + $0x170] sm:$0xff] }
 0x69e   : > { %v2143_v32 = vmax.f32 %v2005_v50, 0.0  ;;  %v743_v50 = vld [vmem:[#allocation13 + $0x150] sm:$0xff]  ;;  %4103 = vmatpush3.bf16.msra.mxu0 %v4100_v48 }
 0x69f   : > { %v2142_v35 = vmax.f32 %v2000_v26, 0.0  ;;  %v3708_v3 = vpop.f32.mrb[70].mxu0  ;;  %v4104_v9 = vpack.c.bf16 %v744_v7, %v743_v50 }
 0x6a0   : > { %v2015_v24 = vadd.f32 %v3708_v3, %v1888_v42  ;;  %v2009_v38 = vpop.f32.mrb[71].mxu0  ;;  %v1891_v42 = vld [vmem:[%s5064_s13 + $0x50] sm:$0xff] }
 0x6a1   : > { %v6125_v41 = vpack.c.bf16 %v2143_v32, %v2142_v35  ;;  %v2010_v51 = vadd.f32 %v2009_v38, %v1887_v28  ;;  %4105 = vmatprep.subr.bf16.mxu0 %v4104_v9 }
 0x6a2   : > { %v2145_v15 = vmax.f32 %v2015_v24, 0.0  ;;  %v1894_v24 = vld [vmem:[%s5064_s13 + $0x68] sm:$0xff]  ;;  %4107 = vmatpush3.bf16.msra.mxu0 %v4104_v9 }
 0x6a3   : > { %v2144_v57 = vmax.f32 %v2010_v51, 0.0  ;;  %v3711_v17 = vpop.f32.mrb[72].mxu0  ;;  %v1893_v51 = vld [vmem:[%s5064_s13 + $0x60] sm:$0xff] }
 0x6a4   : > { %v2025_v49 = vadd.f32 %v3711_v17, %v1890_v22  ;;  %v2019_v0 = vpop.f32.mrb[73].mxu0 }
 0x6a5   : > { %v6129_v61 = vpack.c.bf16 %v2145_v15, %v2144_v57  ;;  %v2020_v6 = vadd.f32 %v2019_v0, %v1889_v37  ;;  %v1896_v57 = vld [vmem:[%s5064_s13 + $0x78] sm:$0xff] }
 0x6a6   : > { %v2147_v26 = vmax.f32 %v2025_v49, 0.0  ;;  %v1895_v49 = vld [vmem:[%s5064_s13 + $0x70] sm:$0xff] }
 0x6a7   : > { %v2146_v29 = vmax.f32 %v2020_v6, 0.0  ;;  %v3714_v47 = vpop.f32.mrb[74].mxu0 }
 0x6a8   : > { %v2035_v32 = vadd.f32 %v3714_v47, %v1892_v54  ;;  %v2029_v28 = vpop.f32.mrb[75].mxu0 }
 0x6a9   : > { %v6133_v35 = vpack.c.bf16 %v2147_v26, %v2146_v29  ;;  %v2030_v3 = vadd.f32 %v2029_v28, %v1891_v42  ;;  %v1898_v26 = vld [vmem:[%s5064_s13 + $0x88] sm:$0xff]  ;;  %v1897_v29 = vld [vmem:[%s5064_s13 + $0x80] sm:$0xff] }
 0x6aa   : > { %v2149_v38 = vmax.f32 %v2035_v32, 0.0 }
 0x6ab   : > { %v2148_v22 = vmax.f32 %v2030_v3, 0.0  ;;  %v3717_v44 = vpop.f32.mrb[76].mxu0 }
 0x6ac   : > { %v2045_v20 = vadd.f32 %v3717_v44, %v1894_v24  ;;  %v2039_v15 = vpop.f32.mrb[77].mxu0 }
 0x6ad   : > { %v6137_v4 = vpack.c.bf16 %v2149_v38, %v2148_v22  ;;  %v2040_v37 = vadd.f32 %v2039_v15, %v1893_v51  ;;  %v1900_v51 = vld [vmem:[%s5064_s13 + $0x98] sm:$0xff]  ;;  %v1899_v22 = vld [vmem:[%s5064_s13 + $0x90] sm:$0xff] }
 0x6ae   : > { %v2151_v17 = vmax.f32 %v2045_v20, 0.0 }
 0x6af   : > { %v2150_v0 = vmax.f32 %v2040_v37, 0.0  ;;  %v3720_v6 = vpop.f32.mrb[78].mxu0 }
 0x6b0   : > { %v2055_v54 = vadd.f32 %v3720_v6, %v1896_v57  ;;  %v2049_v50 = vpop.f32.mrb[79].mxu0  ;;  %v1901_v6 = vld [vmem:[%s5064_s13 + $0xa0] sm:$0xff] }
 0x6b1   : > { %v6141_v7 = vpack.c.bf16 %v2151_v17, %v2150_v0  ;;  %v2050_v48 = vadd.f32 %v2049_v50, %v1895_v49  ;;  %v1902_v49 = vld [vmem:[%s5064_s13 + $0xa8] sm:$0xff] }
 0x6b2   : > { %v2153_v42 = vmax.f32 %v2055_v54, 0.0 }
 0x6b3   : > { %v2152_v47 = vmax.f32 %v2050_v48, 0.0  ;;  %v3723_v32 = vpop.f32.mrb[80].mxu0 }
 0x6b4   : > { %v2065_v28 = vadd.f32 %v3723_v32, %v1898_v26  ;;  %v2059_v3 = vpop.f32.mrb[81].mxu0 }
 0x6b5   : > { %v6145_v24 = vpack.c.bf16 %v2153_v42, %v2152_v47  ;;  %v2060_v38 = vadd.f32 %v2059_v3, %v1897_v29  ;;  %v1904_v47 = vld [vmem:[%s5064_s13 + $0xb8] sm:$0xff] }
 0x6b6   : > { %v2155_v9 = vmax.f32 %v2065_v28, 0.0  ;;  %v1903_v28 = vld [vmem:[%s5064_s13 + $0xb0] sm:$0xff] }
 0x6b7   : > { %v2154_v44 = vmax.f32 %v2060_v38, 0.0  ;;  %v3726_v20 = vpop.f32.mrb[82].mxu0 }
 0x6b8   : > { %v2075_v15 = vadd.f32 %v3726_v20, %v1900_v51  ;;  %v2069_v37 = vpop.f32.mrb[83].mxu0  ;;  %v1906_v20 = vld [vmem:[%s5064_s13 + $0xc8] sm:$0xff] }
 0x6b9   : > { %v4052_v57 = vpack.c.bf16 %v2155_v9, %v2154_v44  ;;  %v2070_v17 = vadd.f32 %v2069_v37, %v1899_v22 }
 0x6ba   : > { %v2157_v0 = vmax.f32 %v2075_v15, 0.0 }
 0x6bb   : > { %v2156_v54 = vmax.f32 %v2070_v17, 0.0  ;;  %v3729_v50 = vpop.f32.mrb[84].mxu0  ;;  %4053 = vmatprep.subr.bf16.mxu1 %v4052_v57 }
 0x6bc   : > { %v2085_v48 = vadd.f32 %v3729_v50, %v1902_v49  ;;  %v2079_v26 = vpop.f32.mrb[85].mxu0  ;;  %4055 = vmatpush3.bf16.msra.mxu1 %v6117_v60  ;;  %v1905_v60 = vld [vmem:[%s5064_s13 + $0xc0] sm:$0xff] }
 0x6bd   : > { %v4056_v42 = vpack.c.bf16 %v2157_v0, %v2156_v54  ;;  %v2080_v29 = vadd.f32 %v2079_v26, %v1901_v6  ;;  %v1908_v54 = vld [vmem:[%s5064_s13 + $0xd8] sm:$0xff] }
 0x6be   : > { %v2159_v32 = vmax.f32 %v2085_v48, 0.0 }
 0x6bf   : > { %v2158_v3 = vmax.f32 %v2080_v29, 0.0  ;;  %v3732_v38 = vpop.f32.mrb[86].mxu0  ;;  %4057 = vmatprep.subr.bf16.mxu1 %v4056_v42 }
 0x6c0   : > { %v2095_v51 = vadd.f32 %v3732_v38, %v1904_v47  ;;  %v2089_v9 = vpop.f32.mrb[87].mxu0  ;;  %4059 = vmatpush3.bf16.msra.mxu1 %v6121_v2  ;;  %v1907_v2 = vld [vmem:[%s5064_s13 + $0xd0] sm:$0xff] }
 0x6c1   : > { %v4060_v22 = vpack.c.bf16 %v2159_v32, %v2158_v3  ;;  %v2090_v44 = vadd.f32 %v2089_v9, %v1903_v28  ;;  %v1910_v28 = vld [vmem:[%s5064_s13 + $0xe8] sm:$0xff] }
 0x6c2   : > { %v2161_v15 = vmax.f32 %v2095_v51, 0.0 }
 0x6c3   : > { %v2160_v37 = vmax.f32 %v2090_v44, 0.0  ;;  %v3735_v57 = vpop.f32.mrb[88].mxu0  ;;  %4061 = vmatprep.subr.bf16.mxu1 %v4060_v22 }
 0x6c4   : > { %v2105_v17 = vadd.f32 %v3735_v57, %v1906_v20  ;;  %v2099_v49 = vpop.f32.mrb[89].mxu0  ;;  %4063 = vmatpush3.bf16.msra.mxu1 %v6125_v41  ;;  %v1909_v41 = vld [vmem:[%s5064_s13 + $0xe0] sm:$0xff] }
 0x6c5   : > { %v4064_v0 = vpack.c.bf16 %v2161_v15, %v2160_v37  ;;  %v2100_v6 = vadd.f32 %v2099_v49, %v1905_v60  ;;  %v1912_v15 = vld [vmem:[%s5064_s13 + $0xf8] sm:$0xff]  ;;  %v1911_v37 = vld [vmem:[%s5064_s13 + $0xf0] sm:$0xff]  ;;  %s570_s13 = scalar_lea.vmem [#allocation16], %s3077_s14 }
 0x6c6   : > { %v2163_v50 = vmax.f32 %v2105_v17, 0.0  ;;  %s2848_s25 = sshll.u32 %s570_s13, 4  ;;  %s6418_s25 = int_to_ptr.vmem [resolvable:$true] %s2848_s25 }
 0x6c7   : > { %v2162_v48 = vmax.f32 %v2100_v6, 0.0  ;;  %v3738_v26 = vpop.f32.mrb[90].mxu0  ;;  %4065 = vmatprep.subr.bf16.mxu1 %v4064_v0  ;;  %s4515_s16 = scalar_lea.vmem %s6418_s25, 128  ;;  %p4522_p9 = scmp.lt.s32.totalorder %s6418_s25, %s4520_s26 }
 0x6c8   : > { %v2115_v42 = vadd.f32 %v3738_v26, %v1908_v54  ;;  %v2109_v29 = vpop.f32.mrb[91].mxu0  ;;  %4067 = vmatpush3.bf16.msra.mxu1 %v6129_v61  ;;  %p4516_p13 = scmp.ne.s32.totalorder %s6418_s25, %s4515_s16  ;;  %p4523_p3 = scmp.lt.s32.totalorder %s4521_s15, %s4515_s16 }
 0x6c9   : > { %v4068_v47 = vpack.c.bf16 %v2163_v50, %v2162_v48  ;;  %v2110_v32 = vadd.f32 %v2109_v29, %v1907_v2  ;;  %v6711_v2 = vunpack.c.l.bf16 %v5287_v8  ;;  %v6712_v48 = vld [vmem:[#allocation40_spill] sm:$0xff]  ;;  %v6721_v8 = vld [vmem:[#allocation43_spill] sm:$0xff] }
 0x6ca   : > { %v2165_v3 = vmax.f32 %v2115_v42, 0.0  ;;  %v6713_v26 = vunpack.c.h.bf16 %v6712_v48  ;;  %v6714_v42 = vunpack.c.l.bf16 %v6712_v48  ;;  %p4517_p10 = pnand %p4516_p13, %p6760_p7  ;;  %p4524_p0 = por %p4523_p3, %p4522_p9 }
 0x6cb   : > { %v2164_v38 = vmax.f32 %v2110_v32, 0.0  ;;  %v3741_v51 = vpop.f32.mrb[92].mxu0  ;;  %4069 = vmatprep.subr.bf16.mxu1 %v4068_v47 }
 0x6cc   : > { %v2125_v9 = vadd.f32 %v3741_v51, %v1910_v28  ;;  %v2119_v22 = vpop.f32.mrb[93].mxu0  ;;  %4071 = vmatpush3.bf16.msra.mxu1 %v6133_v35  ;;  %v6722_v28 = vunpack.c.h.bf16 %v6721_v8  ;;  %p4518_p4 = pneg %p4517_p10 }
 0x6cd   : > { %v4072_v44 = vpack.c.bf16 %v2165_v3, %v2164_v38  ;;  %v2120_v20 = vadd.f32 %v2119_v22, %v1909_v41  ;;  %v6723_v3 = vunpack.c.l.bf16 %v6721_v8  ;;  %v6724_v41 = vld [vmem:[#allocation44_spill] sm:$0xff] }
 0x6ce   : > { %v2167_v60 = vmax.f32 %v2125_v9, 0.0  ;;  %v6725_v38 = vunpack.c.h.bf16 %v6724_v41  ;;  %v6726_v51 = vunpack.c.l.bf16 %v6724_v41  ;;  %v6727_v9 = vld [vmem:[#allocation45_spill] sm:$0xff]  ;;  %p4525_p5 = pnand %p4524_p0, %p4518_p4 }
 0x6cf   : > { %v2166_v57 = vmax.f32 %v2120_v20, 0.0  ;;  %v3744_v61 = vpop.f32.mrb[94].mxu0  ;;  %4073 = vmatprep.subr.bf16.mxu1 %v4072_v44  ;;  %v6728_v22 = vunpack.c.h.bf16 %v6727_v9  ;;  %v6729_v44 = vunpack.c.l.bf16 %v6727_v9  ;;  %v6730_v20 = vld [vmem:[#allocation46_spill] sm:$0xff] }
 0x6d0   : > { %v2135_v17 = vadd.f32 %v3744_v61, %v1912_v15  ;;  %v2129_v49 = vpop.f32.mrb[95].mxu0  ;;  %4075 = vmatpush3.bf16.msra.mxu1 %v6137_v4  ;;  %v6715_v4 = vld [vmem:[#allocation41_spill] sm:$0xff]  ;;  %v6731_v15 = vunpack.c.h.bf16 %v6730_v20 }
 0x6d1   : > { %v4076_v0 = vpack.c.bf16 %v2167_v60, %v2166_v57  ;;  %v2130_v6 = vadd.f32 %v2129_v49, %v1911_v37  ;;  %v6716_v29 = vunpack.c.h.bf16 %v6715_v4  ;;  %v6717_v47 = vunpack.c.l.bf16 %v6715_v4  ;;  %v6733_v37 = vld [vmem:[#allocation47_spill] sm:$0xff] }
 0x6d2   : > { %v2169_v54 = vmax.f32 %v2135_v17, 0.0  ;;  %v6732_v60 = vunpack.c.l.bf16 %v6730_v20  ;;  %v6734_v57 = vunpack.c.h.bf16 %v6733_v37  ;;  %v6735_v61 = vunpack.c.l.bf16 %v6733_v37  ;;  %v6736_v17 = vld [vmem:[#allocation48_spill] sm:$0xff] }
 0x6d3   : > { %v2168_v50 = vmax.f32 %v2130_v6, 0.0  ;;  %4077 = vmatprep.subr.bf16.mxu1 %v4076_v0  ;;  %v6737_v49 = vunpack.c.h.bf16 %v6736_v17  ;;  %v6738_v0 = vunpack.c.l.bf16 %v6736_v17  ;;  %v6739_v6 = vld [vmem:[#allocation49_spill] sm:$0xff] }
 0x6d4   : > { %4079 = vmatpush3.bf16.msra.mxu1 %v6141_v7  ;;  %v6718_v7 = vld [vmem:[#allocation42_spill] sm:$0xff] }
 0x6d5   : > { %v4080_v35 = vpack.c.bf16 %v2169_v54, %v2168_v50  ;;  %v6719_v32 = vunpack.c.h.bf16 %v6718_v7  ;;  %v6740_v54 = vunpack.c.h.bf16 %v6739_v6  ;;  %v6741_v50 = vunpack.c.l.bf16 %v6739_v6 }
 0x6d7   : > { %4081 = vmatprep.subr.bf16.mxu1 %v4080_v35  ;;  %v6742_v35 = vld [vmem:[#allocation50_spill] sm:$0xff] }
 0x6d8   : > { %4083 = vmatpush3.bf16.msra.mxu1 %v6145_v24  ;;  %v6720_v24 = vunpack.c.l.bf16 %v6718_v7  ;;  %v6744_v48 = vunpack.c.l.bf16 %v6742_v35 }
 0x6db   : > { %2235 = vmatmul.mubr.f32.vlgmr.msra.gmra.mrb[64].mxu1 %v6711_v2  ;;  %v6743_v2 = vunpack.c.h.bf16 %v6742_v35 }
 0x6dc   : > { %2239 = vmatprep.mubr.f32.mxu1 %v6713_v26  ;;  %v6745_v26 = vld [vmem:[#allocation51_spill] sm:$0xff] }
 0x6dd   : > { %v6747_v4 = vunpack.c.l.bf16 %v6745_v26 }
 0x6df   : > { %2240 = vmatmul.mubr.f32.gmra.mrb[66].mxu1 %v6714_v42  ;;  %v6746_v42 = vunpack.c.h.bf16 %v6745_v26 }
 0x6e0   : > { %2244 = vmatprep.mubr.f32.mxu1 %v6716_v29  ;;  %v6748_v29 = vld [vmem:[#allocation52_spill] sm:$0xff] }
 0x6e1   : > { %v6750_v7 = vunpack.c.l.bf16 %v6748_v29 }
 0x6e3   : > { %2245 = vmatmul.mubr.f32.gmra.mrb[68].mxu1 %v6717_v47  ;;  %v6749_v47 = vunpack.c.h.bf16 %v6748_v29 }
 0x6e4   : > { %2249 = vmatprep.mubr.f32.mxu1 %v6719_v32  ;;  %v6751_v32 = vld [vmem:[#allocation53_spill] sm:$0xff] }
 0x6e5   : > { %v6753_v8 = vunpack.c.l.bf16 %v6751_v32 }
 0x6e7   : > { %2250 = vmatmul.mubr.f32.gmra.mrb[70].mxu1 %v6720_v24  ;;  %v6752_v24 = vunpack.c.h.bf16 %v6751_v32 }
 0x6e8   : > { %2254 = vmatprep.mubr.f32.mxu1 %v6722_v28  ;;  %v6754_v28 = vld [vmem:[#allocation54_spill] sm:$0xff] }
 0x6e9   : > { %v6756_v41 = vunpack.c.l.bf16 %v6754_v28 }
 0x6eb   : > { %2255 = vmatmul.mubr.f32.gmra.mrb[72].mxu1 %v6723_v3  ;;  %v6755_v3 = vunpack.c.h.bf16 %v6754_v28 }
 0x6ec   : > { %2259 = vmatprep.mubr.f32.mxu1 %v6725_v38  ;;  %v745_v38 = vld [vmem:[#allocation13 + $0x190] sm:$0xff] }
 0x6ef   : > { %2260 = vmatmul.mubr.f32.gmra.mrb[74].mxu1 %v6726_v51  ;;  %v746_v51 = vld [vmem:[#allocation13 + $0x1b0] sm:$0xff] }
 0x6f0   : > { %2264 = vmatprep.mubr.f32.mxu1 %v6728_v22  ;;  %v4108_v9 = vpack.c.bf16 %v746_v51, %v745_v38  ;;  %v747_v22 = vld [vmem:[#allocation13 + $0x1d0] sm:$0xff] }
 0x6f2   : > { %4109 = vmatprep.subr.bf16.mxu0 %v4108_v9 }
 0x6f3   : > { %2265 = vmatmul.mubr.f32.gmra.mrb[76].mxu1 %v6729_v44  ;;  %4111 = vmatpush3.bf16.msra.mxu0 %v4108_v9  ;;  %v748_v44 = vld [vmem:[#allocation13 + $0x1f0] sm:$0xff] }
 0x6f4   : > { %2269 = vmatprep.mubr.f32.mxu1 %v6731_v15  ;;  %v4112_v20 = vpack.c.bf16 %v748_v44, %v747_v22 }
 0x6f6   : > { %4113 = vmatprep.subr.bf16.mxu0 %v4112_v20 }
 0x6f7   : > { %2270 = vmatmul.mubr.f32.gmra.mrb[78].mxu1 %v6732_v60  ;;  %4115 = vmatpush3.bf16.msra.mxu0 %v4112_v20 }
 0x6f8   : > { %2274 = vmatprep.mubr.f32.mxu1 %v6734_v57 }
 0x6fb   : > { %2275 = vmatmul.mubr.f32.gmra.mrb[80].mxu1 %v6735_v61 }
 0x6fc   : > { %2279 = vmatprep.mubr.f32.mxu1 %v6737_v49 }
 0x6ff   : > { %2280 = vmatmul.mubr.f32.gmra.mrb[82].mxu1 %v6738_v0 }
 0x700   : > { %2284 = vmatprep.mubr.f32.mxu1 %v6740_v54 }
 0x703   : > { %2285 = vmatmul.mubr.f32.gmra.mrb[84].mxu1 %v6741_v50 }
 0x704   : > { %2289 = vmatprep.mubr.f32.mxu1 %v6743_v2 }
 0x707   : > { %2290 = vmatmul.mubr.f32.gmra.mrb[86].mxu1 %v6744_v48 }
 0x708   : > { %2294 = vmatprep.mubr.f32.mxu1 %v6746_v42 }
 0x70b   : > { %2295 = vmatmul.mubr.f32.gmra.mrb[88].mxu1 %v6747_v4 }
 0x70c   : > { %2299 = vmatprep.mubr.f32.mxu1 %v6749_v47 }
 0x70f   : > { %2300 = vmatmul.mubr.f32.gmra.mrb[90].mxu1 %v6750_v7 }
 0x710   : > { %2304 = vmatprep.mubr.f32.mxu1 %v6752_v24 }
 0x713   : > { %2305 = vmatmul.mubr.f32.gmra.mrb[92].mxu1 %v6753_v8 }
 0x714   : > { %2309 = vmatprep.mubr.f32.mxu1 %v6755_v3 }
 0x717   : > { %2310 = vmatmul.mubr.f32.gmra.mrb[94].mxu1 %v6756_v41 }
 0x7ae   : > { %v3456_v15 = vpop.f32.mrb[64].mxu1 }
 0x7af   : > { %v3457_v60 = vpop.f32.mrb[65].mxu1 }
 0x7b0   : > { %v3458_v37 = vadd.f32 %v3457_v60, %v3456_v15 }
 0x7b2   : > { %v2237_v57 = vadd.f32 %v3458_v37, %v1865_v33  ;;  %v3459_v61 = vpop.f32.mrb[66].mxu1 }
 0x7b3   : > { %v3460_v17 = vpop.f32.mrb[67].mxu1 }
 0x7b4   : > { %v3461_v49 = vadd.f32 %v3460_v17, %v3459_v61  ;;  %3777 = vmatprep.mubr.f32.mxu0 %v2237_v57 }
 0x7b6   : > { %v2242_v0 = vadd.f32 %v3461_v49, %v1866_v25  ;;  %v3462_v6 = vpop.f32.mrb[68].mxu1 }
 0x7b7   : > { %v3463_v54 = vpop.f32.mrb[69].mxu1 }
 0x7b8   : > { %v3464_v50 = vadd.f32 %v3463_v54, %v3462_v6  ;;  %3778 = vmatmul.mubr.f32.vlgmr.msra.gmra.mrb[96].mxu0 %v2242_v0  ;;  %v750_v6 = vld [vmem:[#allocation13 + $0x38] sm:$0xff] }
 0x7b9   : > { %v751_v54 = vld [vmem:[#allocation13 + $0x58] sm:$0xff] }
 0x7ba   : > { %v2247_v35 = vadd.f32 %v3464_v50, %v1867_v30  ;;  %v3465_v2 = vpop.f32.mrb[70].mxu1  ;;  %v752_v50 = vld [vmem:[#allocation13 + $0x78] sm:$0xff] }
 0x7bb   : > { %v3466_v48 = vpop.f32.mrb[71].mxu1 }
 0x7bc   : > { %v3467_v26 = vadd.f32 %v3466_v48, %v3465_v2  ;;  %3780 = vmatprep.mubr.f32.mxu0 %v2247_v35  ;;  %v4120_v2 = vpack.c.bf16 %v752_v50, %v751_v54 }
 0x7be   : > { %v2252_v56 = vadd.f32 %v3467_v26, %v1868_v1  ;;  %v3468_v33 = vpop.f32.mrb[72].mxu1 }
 0x7bf   : > { %v3469_v42 = vpop.f32.mrb[73].mxu1 }
 0x7c0   : > { %v3470_v4 = vadd.f32 %v3469_v42, %v3468_v33  ;;  %3781 = vmatmul.mubr.f32.gmra.mrb[98].mxu0 %v2252_v56  ;;  %v753_v56 = vld [vmem:[#allocation13 + $0x98] sm:$0xff] }
 0x7c1   : > { %v754_v33 = vld [vmem:[#allocation13 + $0xb8] sm:$0xff] }
 0x7c2   : > { %v2257_v40 = vadd.f32 %v3470_v4, %v1869_v46  ;;  %v3471_v25 = vpop.f32.mrb[74].mxu1 }
 0x7c3   : > { %v3472_v29 = vpop.f32.mrb[75].mxu1 }
 0x7c4   : > { %v3473_v47 = vadd.f32 %v3472_v29, %v3471_v25  ;;  %3783 = vmatprep.mubr.f32.mxu0 %v2257_v40  ;;  %v4124_v40 = vpack.c.bf16 %v754_v33, %v753_v56  ;;  %v755_v29 = vld [vmem:[#allocation13 + $0xd8] sm:$0xff] }
 0x7c6   : > { %v2262_v43 = vadd.f32 %v3473_v47, %v1870_v27  ;;  %v3474_v30 = vpop.f32.mrb[76].mxu1  ;;  %v756_v47 = vld [vmem:[#allocation13 + $0xf8] sm:$0xff] }
 0x7c7   : > { %v3475_v7 = vpop.f32.mrb[77].mxu1 }
 0x7c8   : > { %v3476_v32 = vadd.f32 %v3475_v7, %v3474_v30  ;;  %3784 = vmatmul.mubr.f32.gmra.mrb[100].mxu0 %v2262_v43  ;;  %v757_v43 = vld [vmem:[#allocation13 + $0x118] sm:$0xff]  ;;  %v4128_v7 = vpack.c.bf16 %v756_v47, %v755_v29 }
 0x7ca   : > { %v2267_v31 = vadd.f32 %v3476_v32, %v1871_v62  ;;  %v3477_v1 = vpop.f32.mrb[78].mxu1  ;;  %v758_v32 = vld [vmem:[#allocation13 + $0x138] sm:$0xff] }
 0x7cb   : > { %v3478_v24 = vpop.f32.mrb[79].mxu1 }
 0x7cc   : > { %v3479_v8 = vadd.f32 %v3478_v24, %v3477_v1  ;;  %3786 = vmatprep.mubr.f32.mxu0 %v2267_v31  ;;  %v4132_v1 = vpack.c.bf16 %v758_v32, %v757_v43  ;;  %v759_v24 = vld [vmem:[#allocation13 + $0x158] sm:$0xff] }
 0x7ce   : > { %v2272_v12 = vadd.f32 %v3479_v8, %v1872_v21  ;;  %v3480_v46 = vpop.f32.mrb[80].mxu1  ;;  %v760_v8 = vld [vmem:[#allocation13 + $0x178] sm:$0xff] }
 0x7cf   : > { %v3481_v28 = vpop.f32.mrb[81].mxu1 }
 0x7d0   : > { %v3482_v3 = vadd.f32 %v3481_v28, %v3480_v46  ;;  %3787 = vmatmul.mubr.f32.gmra.mrb[102].mxu0 %v2272_v12 }
 0x7d2   : > { %v2277_v34 = vadd.f32 %v3482_v3, %v1873_v10  ;;  %v3483_v27 = vpop.f32.mrb[82].mxu1  ;;  %v4136_v3 = vpack.c.bf16 %v760_v8, %v759_v24 }
 0x7d3   : > { %v3484_v41 = vpop.f32.mrb[83].mxu1 }
 0x7d4   : > { %v3485_v38 = vadd.f32 %v3484_v41, %v3483_v27  ;;  %3789 = vmatprep.mubr.f32.mxu0 %v2277_v34  ;;  %v761_v34 = vld [vmem:[#allocation13 + $0x198] sm:$0xff] }
 0x7d5   : > { %v762_v27 = vld [vmem:[#allocation13 + $0x1b8] sm:$0xff] }
 0x7d6   : > { %v2282_v45 = vadd.f32 %v3485_v38, %v1874_v16  ;;  %v3486_v62 = vpop.f32.mrb[84].mxu1 }
 0x7d7   : > { %v3487_v51 = vpop.f32.mrb[85].mxu1 }
 0x7d8   : > { %v3488_v9 = vadd.f32 %v3487_v51, %v3486_v62  ;;  %3790 = vmatmul.mubr.f32.gmra.mrb[104].mxu0 %v2282_v45  ;;  %v4140_v45 = vpack.c.bf16 %v762_v27, %v761_v34  ;;  %v763_v51 = vld [vmem:[#allocation13 + $0x1d8] sm:$0xff] }
 0x7da   : > { %v2287_v59 = vadd.f32 %v3488_v9, %v1875_v14  ;;  %v3489_v21 = vpop.f32.mrb[86].mxu1  ;;  %v764_v9 = vld [vmem:[#allocation13 + $0x1f8] sm:$0xff] }
 0x7db   : > { %v3490_v22 = vpop.f32.mrb[87].mxu1 }
 0x7dc   : > { %v3491_v44 = vadd.f32 %v3490_v22, %v3489_v21  ;;  %3792 = vmatprep.mubr.f32.mxu0 %v2287_v59 }
 0x7de   : > { %v2292_v19 = vadd.f32 %v3491_v44, %v1876_v52  ;;  %v3492_v10 = vpop.f32.mrb[88].mxu1  ;;  %v4144_v44 = vpack.c.bf16 %v764_v9, %v763_v51 }
 0x7df   : > { %v3493_v20 = vpop.f32.mrb[89].mxu1 }
 0x7e0   : > { %v3494_v15 = vadd.f32 %v3493_v20, %v3492_v10  ;;  %3793 = vmatmul.mubr.f32.gmra.mrb[106].mxu0 %v2292_v19 }
 0x7e2   : > { %v2297_v58 = vadd.f32 %v3494_v15, %v1877_v63  ;;  %v3495_v16 = vpop.f32.mrb[90].mxu1 }
 0x7e3   : > { %v3496_v60 = vpop.f32.mrb[91].mxu1 }
 0x7e4   : > { %v3497_v37 = vadd.f32 %v3496_v60, %v3495_v16  ;;  %3795 = vmatprep.mubr.f32.mxu0 %v2297_v58 }
 0x7e6   : > { %v2302_v18 = vadd.f32 %v3497_v37, %v1878_v39  ;;  %v3498_v14 = vpop.f32.mrb[92].mxu1 }
 0x7e7   : > { %v3499_v57 = vpop.f32.mrb[93].mxu1 }
 0x7e8   : > { %v3500_v61 = vadd.f32 %v3499_v57, %v3498_v14  ;;  %3796 = vmatmul.mubr.f32.gmra.mrb[108].mxu0 %v2302_v18 }
 0x7ea   : > { %v2307_v13 = vadd.f32 %v3500_v61, %v1879_v23  ;;  %v3501_v52 = vpop.f32.mrb[94].mxu1  ;;  %v749_v23 = vld [vmem:[#allocation13 + $0x18] sm:$0xff] }
 0x7eb   : > { %v3502_v17 = vpop.f32.mrb[95].mxu1 }
 0x7ec   : > { %v3503_v49 = vadd.f32 %v3502_v17, %v3501_v52  ;;  %3798 = vmatprep.mubr.f32.mxu0 %v2307_v13 }
 0x7ee   : > { %v2312_v36 = vadd.f32 %v3503_v49, %v1880_v11  ;;  %v4116_v11 = vpack.c.bf16 %v750_v6, %v749_v23 }
 0x7f0   : > { %3799 = vmatmul.mubr.f32.gmra.mrb[110].mxu0 %v2312_v36  ;;  %4117 = vmatprep.subr.bf16.mxu1 %v4116_v11 }
 0x7f1   : > { %4119 = vmatpush3.bf16.msra.mxu1 %v4116_v11 }
 0x7f2   : > { %4121 = vmatprep.subr.bf16.mxu1 %v4120_v2 }
 0x7f5   : > { %4123 = vmatpush3.bf16.msra.mxu1 %v4120_v2 }
 0x7f6   : > { %4125 = vmatprep.subr.bf16.mxu1 %v4124_v40 }
 0x7f9   : > { %4127 = vmatpush3.bf16.msra.mxu1 %v4124_v40 }
 0x7fa   : > { %4129 = vmatprep.subr.bf16.mxu1 %v4128_v7 }
 0x7fd   : > { %4131 = vmatpush3.bf16.msra.mxu1 %v4128_v7 }
 0x7fe   : > { %4133 = vmatprep.subr.bf16.mxu1 %v4132_v1 }
 0x801   : > { %4135 = vmatpush3.bf16.msra.mxu1 %v4132_v1 }
 0x802   : > { %4137 = vmatprep.subr.bf16.mxu1 %v4136_v3 }
 0x805   : > { %4139 = vmatpush3.bf16.msra.mxu1 %v4136_v3 }
 0x806   : > { %4141 = vmatprep.subr.bf16.mxu1 %v4140_v45 }
 0x809   : > { %4143 = vmatpush3.bf16.msra.mxu1 %v4140_v45 }
 0x80a   : > { %4145 = vmatprep.subr.bf16.mxu1 %v4144_v44 }
 0x80d   : > { %4147 = vmatpush3.bf16.msra.mxu1 %v4144_v44 }
 0x88b   : > { %v3779_v63 = vpop.f32.mrb[96].mxu0 }
 0x88c   : > { %v6269_v39 = vadd.f32 %v3779_v63, %v6266_v55  ;;  %v2381_v0 = vpop.f32.mrb[97].mxu0 }
 0x88d   : > { %v6272_v5 = vadd.f32 %v2381_v0, %v6266_v55 }
 0x88f   : > { %v2460_v53 = vadd.f32 %v6269_v39, %v6272_v5 }
 0x893   : > { %v3782_v35 = vpop.f32.mrb[98].mxu0 }
 0x894   : > { %v2391_v48 = vpop.f32.mrb[99].mxu0  ;;  %v6280_v42 = vadd.f32 %v3782_v35, %v6266_v55 }
 0x895   : > { %v6277_v26 = vadd.f32 %v2391_v48, %v6266_v55 }
 0x897   : > { %v2461_v4 = vadd.f32 %v2460_v53, %v6277_v26 }
 0x899   : > { %v2462_v25 = vadd.f32 %v2461_v4, %v6280_v42 }
 0x89b   : > { %v3785_v30 = vpop.f32.mrb[100].mxu0 }
 0x89c   : > { %v2401_v31 = vpop.f32.mrb[101].mxu0  ;;  %v2407_v46 = vadd.f32 %v3785_v30, %v6266_v55 }
 0x89d   : > { %v2402_v12 = vadd.f32 %v2401_v31, %v6266_v55 }
 0x89f   : > { %v2463_v28 = vadd.f32 %v2462_v25, %v2402_v12 }
 0x8a1   : > { %v2464_v41 = vadd.f32 %v2463_v28, %v2407_v46 }
 0x8a3   : > { %v3788_v38 = vpop.f32.mrb[102].mxu0 }
 0x8a4   : > { %v2411_v62 = vpop.f32.mrb[103].mxu0  ;;  %v2417_v21 = vadd.f32 %v3788_v38, %v6266_v55 }
 0x8a5   : > { %v2412_v59 = vadd.f32 %v2411_v62, %v6266_v55 }
 0x8a7   : > { %v2465_v22 = vadd.f32 %v2464_v41, %v2412_v59 }
 0x8a9   : > { %v2466_v19 = vadd.f32 %v2465_v22, %v2417_v21 }
 0x8ab   : > { %v3791_v10 = vpop.f32.mrb[104].mxu0 }
 0x8ac   : > { %v2421_v20 = vpop.f32.mrb[105].mxu0  ;;  %v2427_v58 = vadd.f32 %v3791_v10, %v6266_v55 }
 0x8ad   : > { %v2422_v15 = vadd.f32 %v2421_v20, %v6266_v55 }
 0x8af   : > { %v2467_v16 = vadd.f32 %v2466_v19, %v2422_v15 }
 0x8b1   : > { %v2468_v60 = vadd.f32 %v2467_v16, %v2427_v58 }
 0x8b3   : > { %v3794_v37 = vpop.f32.mrb[106].mxu0 }
 0x8b4   : > { %v2431_v18 = vpop.f32.mrb[107].mxu0  ;;  %v2437_v57 = vadd.f32 %v3794_v37, %v6266_v55 }
 0x8b5   : > { %v2432_v14 = vadd.f32 %v2431_v18, %v6266_v55 }
 0x8b7   : > { %v2469_v61 = vadd.f32 %v2468_v60, %v2432_v14 }
 0x8b9   : > { %v2470_v13 = vadd.f32 %v2469_v61, %v2437_v57 }
 0x8bb   : > { %v3797_v52 = vpop.f32.mrb[108].mxu0 }
 0x8bc   : > { %v2441_v17 = vpop.f32.mrb[109].mxu0  ;;  %v2447_v36 = vadd.f32 %v3797_v52, %v6266_v55 }
 0x8bd   : > { %v2442_v49 = vadd.f32 %v2441_v17, %v6266_v55 }
 0x8bf   : > { %v2471_v63 = vadd.f32 %v2470_v13, %v2442_v49 }
 0x8c1   : > { %v2472_v0 = vadd.f32 %v2471_v63, %v2447_v36 }
 0x8c3   : > { %v3800_v23 = vpop.f32.mrb[110].mxu0 }
 0x8c4   : > { %v2451_v6 = vpop.f32.mrb[111].mxu0  ;;  %v2457_v11 = vadd.f32 %v3800_v23, %v6266_v55 }
 0x8c5   : > { %v2452_v53 = vadd.f32 %v2451_v6, %v6266_v55 }
 0x8c7   : > { %v2473_v54 = vadd.f32 %v2472_v0, %v2452_v53 }
 0x8c9   : > { %v2474_v50 = vadd.f32 %v2473_v54, %v2457_v11 }
 0x8cb   : > { %v2475_v35 = vrot.slane %v2474_v50, 4 }
 0x8cd   : > { %v2476_v2 = vadd.f32 %v2475_v35, %v2474_v50  ;;  %v6335_v50 = vld [vmem:[%s6670_s9 + $0x5] ss:$0 sm:$0xff] }
 0x8cf   : > { %v2477_v48 = vrot.slane %v2476_v2, 2 }
 0x8d1   : > { %v2478_v56 = vadd.f32 %v2477_v48, %v2476_v2 }
 0x8d3   : > { %v2479_v33 = vrot.slane %v2478_v56, 1 }
 0x8d5   : > { %v2480_v4 = vadd.f32 %v2479_v33, %v2478_v56  ;;  %v6342_v33 = vld [vmem:[%s6670_s9 + $0x6] ss:$0 sm:$0xff] }
 0x8d7   : > { %v2481_v40 = vmul.f32 0.0078125, %v2480_v4 }
 0x8d9   : > { %v2482_v25 = vsub.f32 %v6272_v5, %v2481_v40  ;;  %v2483_v29 = vsub.f32 %v6269_v39, %v2481_v40  ;;  %v2484_v47 = vsub.f32 %v6277_v26, %v2481_v40  ;;  %v2485_v43 = vsub.f32 %v6280_v42, %v2481_v40 }
 0x8da   : > { %v2486_v30 = vsub.f32 %v2402_v12, %v2481_v40  ;;  %v2487_v7 = vsub.f32 %v2407_v46, %v2481_v40  ;;  %v2488_v55 = vsub.f32 %v2412_v59, %v2481_v40  ;;  %v6300_v32 = vsub.f32 %v2417_v21, %v2481_v40 }
 0x8db   : > { %v6302_v31 = vsub.f32 %v2422_v15, %v2481_v40  ;;  %v6304_v1 = vsub.f32 %v2427_v58, %v2481_v40  ;;  %v6306_v24 = vsub.f32 %v2432_v14, %v2481_v40  ;;  %v6308_v8 = vsub.f32 %v2437_v57, %v2481_v40 }
 0x8dc   : > { %v6310_v5 = vsub.f32 %v2442_v49, %v2481_v40  ;;  %v6312_v39 = vsub.f32 %v2447_v36, %v2481_v40  ;;  %v2496_v26 = vsub.f32 %v2452_v53, %v2481_v40  ;;  %v6314_v28 = vsub.f32 %v2457_v11, %v2481_v40 }
 0x8dd   : > { %v2498_v42 = vmul.f32 %v2482_v25, %v2482_v25  ;;  %v2499_v12 = vmul.f32 %v2483_v29, %v2483_v29  ;;  %v2500_v46 = vmul.f32 %v2484_v47, %v2484_v47  ;;  %v2501_v34 = vmul.f32 %v2485_v43, %v2485_v43 }
 0x8de   : > { %v2502_v41 = vmul.f32 %v2486_v30, %v2486_v30  ;;  %v2503_v45 = vmul.f32 %v2487_v7, %v2487_v7  ;;  %v2504_v51 = vmul.f32 %v2488_v55, %v2488_v55  ;;  %v2505_v59 = vmul.f32 %v6300_v32, %v6300_v32 }
 0x8df   : > { %v2514_v3 = vadd.f32 %v2499_v12, %v2498_v42  ;;  %v2506_v22 = vmul.f32 %v6302_v31, %v6302_v31  ;;  %v2507_v19 = vmul.f32 %v6304_v1, %v6304_v1  ;;  %v2508_v20 = vmul.f32 %v6306_v24, %v6306_v24 }
 0x8e0   : > { %v2509_v58 = vmul.f32 %v6308_v8, %v6308_v8  ;;  %v2510_v60 = vmul.f32 %v6310_v5, %v6310_v5  ;;  %v2511_v18 = vmul.f32 %v6312_v39, %v6312_v39  ;;  %v2512_v57 = vmul.f32 %v2496_v26, %v2496_v26 }
 0x8e1   : > { %v2515_v27 = vadd.f32 %v2514_v3, %v2500_v46  ;;  %v2513_v13 = vmul.f32 %v6314_v28, %v6314_v28 }
 0x8e3   : > { %v2516_v38 = vadd.f32 %v2515_v27, %v2501_v34 }
 0x8e5   : > { %v2517_v62 = vadd.f32 %v2516_v38, %v2502_v41 }
 0x8e7   : > { %v2518_v9 = vadd.f32 %v2517_v62, %v2503_v45 }
 0x8e9   : > { %v2519_v21 = vadd.f32 %v2518_v9, %v2504_v51 }
 0x8eb   : > { %v2520_v44 = vadd.f32 %v2519_v21, %v2505_v59 }
 0x8ed   : > { %v2521_v10 = vadd.f32 %v2520_v44, %v2506_v22 }
 0x8ef   : > { %v2522_v15 = vadd.f32 %v2521_v10, %v2507_v19 }
 0x8f1   : > { %v2523_v16 = vadd.f32 %v2522_v15, %v2508_v20 }
 0x8f3   : > { %v2524_v37 = vadd.f32 %v2523_v16, %v2509_v58 }
 0x8f5   : > { %v2525_v14 = vadd.f32 %v2524_v37, %v2510_v60 }
 0x8f7   : > { %v2526_v61 = vadd.f32 %v2525_v14, %v2511_v18 }
 0x8f9   : > { %v2527_v52 = vadd.f32 %v2526_v61, %v2512_v57 }
 0x8fb   : > { %v2528_v17 = vadd.f32 %v2527_v52, %v2513_v13 }
 0x8fd   : > { %v2529_v49 = vrot.slane %v2528_v17, 4 }
 0x8ff   : > { %v2530_v36 = vadd.f32 %v2529_v49, %v2528_v17 }
 0x901   : > { %v2531_v63 = vrot.slane %v2530_v36, 2 }
 0x903   : > { %v2532_v0 = vadd.f32 %v2531_v63, %v2530_v36 }
 0x905   : > { %v2533_v23 = vrot.slane %v2532_v0, 1 }
 0x907   : > { %v2534_v6 = vadd.f32 %v2533_v23, %v2532_v0 }
 0x909   : > { %v2535_v53 = vmul.f32 0.0078125, %v2534_v6 }
 0x90b   : > { %v2536_v11 = vadd.f32 1e-05, %v2535_v53 }
 0x90d   : > { %4277 = vrsqrt.f32 %v2536_v11 }
 0x917   : > { %v4278_v54 = vpop.eup %4277 }
 0x918   : > { %v6337_v35 = vmul.f32 %v4278_v54, %v2496_v26  ;;  %v2538_v2 = vmul.f32 %v4278_v54, %v2482_v25  ;;  %v2539_v48 = vmul.f32 %v4278_v54, %v2483_v29  ;;  %v2540_v56 = vmul.f32 %v4278_v54, %v2484_v47 }
 0x919   : > { %v2541_v4 = vmul.f32 %v4278_v54, %v2485_v43  ;;  %v2542_v40 = vmul.f32 %v4278_v54, %v2486_v30  ;;  %v2543_v42 = vmul.f32 %v4278_v54, %v2487_v7  ;;  %v2544_v12 = vmul.f32 %v4278_v54, %v2488_v55 }
 0x91a   : > { %v2554_v46 = vmul.f32 %v2538_v2, %v6335_v50  ;;  %v2555_v3 = vmul.f32 %v2539_v48, %v6335_v50  ;;  %v2556_v34 = vmul.f32 %v2540_v56, %v6335_v50  ;;  %v2545_v26 = vmul.f32 %v4278_v54, %v6300_v32 }
 0x91b   : > { %v2557_v25 = vmul.f32 %v2541_v4, %v6335_v50  ;;  %v2558_v29 = vmul.f32 %v2542_v40, %v6335_v50  ;;  %v2559_v38 = vmul.f32 %v2543_v42, %v6335_v50  ;;  %v2560_v32 = vmul.f32 %v2544_v12, %v6335_v50 }
 0x91c   : > { %v2570_v47 = vadd.f32 %v2554_v46, %v6342_v33  ;;  %v2571_v27 = vadd.f32 %v2555_v3, %v6342_v33  ;;  %v2572_v43 = vadd.f32 %v2556_v34, %v6342_v33  ;;  %v2546_v62 = vmul.f32 %v4278_v54, %v6302_v31 }
 0x91d   : > { %v2573_v55 = vadd.f32 %v2557_v25, %v6342_v33  ;;  %v2574_v41 = vadd.f32 %v2558_v29, %v6342_v33  ;;  %v2547_v51 = vmul.f32 %v4278_v54, %v6304_v1  ;;  %v2548_v9 = vmul.f32 %v4278_v54, %v6306_v24 }
 0x91e   : > { %v2586_v30 = vmax.f32 %v2570_v47, 0.0  ;;  %v2587_v7 = vmax.f32 %v2571_v27, 0.0  ;;  %v2588_v45 = vmax.f32 %v2572_v43, 0.0  ;;  %v2549_v59 = vmul.f32 %v4278_v54, %v6308_v8 }
 0x91f   : > { %v2550_v21 = vmul.f32 %v4278_v54, %v6310_v5  ;;  %v2551_v22 = vmul.f32 %v4278_v54, %v6312_v39  ;;  %v2553_v44 = vmul.f32 %v4278_v54, %v6314_v28  ;;  %v2589_v19 = vmax.f32 %v2573_v55, 0.0 }
 0x920   : > { %3833 = vmatprep.mubr.f32.mxu1 %v2586_v30  ;;  %v2575_v10 = vadd.f32 %v2559_v38, %v6342_v33  ;;  %v2561_v20 = vmul.f32 %v2545_v26, %v6335_v50  ;;  %v2590_v31 = vmax.f32 %v2574_v41, 0.0  ;;  %v2576_v1 = vadd.f32 %v2560_v32, %v6342_v33 }
 0x921   : > { %3834 = vmatmul.mubr.f32.vlgmr.msra.gmra.mrb[96].mxu1 %v2587_v7  ;;  %v2562_v24 = vmul.f32 %v2546_v62, %v6335_v50  ;;  %v2563_v39 = vmul.f32 %v2547_v51, %v6335_v50  ;;  %v2564_v58 = vmul.f32 %v2548_v9, %v6335_v50  ;;  %v2565_v37 = vmul.f32 %v2549_v59, %v6335_v50 }
 0x922   : > { %3836 = vmatprep.mubr.f32.mxu1 %v2588_v45  ;;  %v2591_v8 = vmax.f32 %v2575_v10, 0.0  ;;  %v2577_v5 = vadd.f32 %v2561_v20, %v6342_v33  ;;  %v2592_v15 = vmax.f32 %v2576_v1, 0.0  ;;  %v2566_v57 = vmul.f32 %v2550_v21, %v6335_v50 }
 0x923   : > { %v2578_v28 = vadd.f32 %v2562_v24, %v6342_v33  ;;  %v2579_v60 = vadd.f32 %v2563_v39, %v6342_v33  ;;  %v2580_v14 = vadd.f32 %v2564_v58, %v6342_v33  ;;  %v2581_v13 = vadd.f32 %v2565_v37, %v6342_v33 }
 0x924   : > { %v2593_v16 = vmax.f32 %v2577_v5, 0.0  ;;  %v2567_v52 = vmul.f32 %v2551_v22, %v6335_v50  ;;  %v2582_v49 = vadd.f32 %v2566_v57, %v6342_v33  ;;  %v2568_v36 = vmul.f32 %v6337_v35, %v6335_v50 }
 0x925   : > { %3837 = vmatmul.mubr.f32.gmra.mrb[98].mxu1 %v2589_v19  ;;  %v2594_v18 = vmax.f32 %v2578_v28, 0.0  ;;  %v2595_v61 = vmax.f32 %v2579_v60, 0.0  ;;  %v2596_v17 = vmax.f32 %v2580_v14, 0.0  ;;  %v2597_v63 = vmax.f32 %v2581_v13, 0.0 }
 0x926   : > { %3839 = vmatprep.mubr.f32.mxu1 %v2590_v31  ;;  %v2583_v0 = vadd.f32 %v2567_v52, %v6342_v33  ;;  %v2569_v23 = vmul.f32 %v2553_v44, %v6335_v50  ;;  %v2598_v6 = vmax.f32 %v2582_v49, 0.0  ;;  %v2584_v53 = vadd.f32 %v2568_v36, %v6342_v33  ;;  %v6390_v50 = vld [vmem:[%s6670_s9 + $0x7] ss:$0 sm:$0xff] }
 0x927   : > { %v4618_v35 = vmov 0.0|0.0   ;;  %v6757_v56 = vmov 0.0  }
 0x928   : > { %v2599_v11 = vmax.f32 %v2583_v0, 0.0  ;;  %v2585_v54 = vadd.f32 %v2569_v23, %v6342_v33  ;;  %v2600_v2 = vmax.f32 %v2584_v53, 0.0  ;;  %4148 = vmatprep.subr.bf16.mxu0 %v4618_v35  ;;  %3889 = vmatprep.mubr.msk.f32.mxu0 %vm4619_vm0, %v6757_v56 }
 0x929   : > { %3840 = vmatmul.mubr.f32.gmra.mrb[100].mxu1 %v2591_v8 }
 0x92a   : > { %3842 = vmatprep.mubr.f32.mxu1 %v2592_v15  ;;  %v2601_v48 = vmax.f32 %v2585_v54, 0.0 }
 0x92d   : > { %3843 = vmatmul.mubr.f32.gmra.mrb[102].mxu1 %v2593_v16 }
 0x92e   : > { %3845 = vmatprep.mubr.f32.mxu1 %v2594_v18 }
 0x931   : > { %3846 = vmatmul.mubr.f32.gmra.mrb[104].mxu1 %v2595_v61 }
 0x932   : > { %3848 = vmatprep.mubr.f32.mxu1 %v2596_v17 }
 0x935   : > { %3849 = vmatmul.mubr.f32.gmra.mrb[106].mxu1 %v2597_v63 }
 0x936   : > { %3851 = vmatprep.mubr.f32.mxu1 %v2598_v6  ;;  %v699_v6 = vld [vmem:[%s5055_s30] sm:$0xf]  ;;  %s6423_s30 = scalar_lea.hbm %s6759_s22, %s3081_s27 }
 0x939   : > { %3852 = vmatmul.mubr.f32.gmra.mrb[108].mxu1 %v2599_v11  ;;  %v700_v11 = vunpack.c.l.bf16 %v699_v6 }
 0x93a   : > { %3854 = vmatprep.mubr.f32.mxu1 %v2600_v2 }
 0x93d   : > { %3855 = vmatmul.mubr.f32.gmra.mrb[110].mxu1 %v2601_v48 }
 0x9f4   : > { %v3835_v4 = vpop.f32.mrb[96].mxu1 }
 0x9f5   : > { %v2674_v40 = vadd.f32 %v3835_v4, %v6390_v50  ;;  %v2668_v33 = vpop.f32.mrb[97].mxu1 }
 0x9f6   : > { %v2669_v42 = vadd.f32 %v2668_v33, %v6390_v50 }
 0x9f7   : > { %v2748_v12 = vmax.f32 %v2674_v40, 0.0 }
 0x9f8   : > { %v2747_v46 = vmax.f32 %v2669_v42, 0.0  ;;  %v3838_v3 = vpop.f32.mrb[98].mxu1 }
 0x9f9   : > { %v2684_v34 = vadd.f32 %v3838_v3, %v6390_v50  ;;  %v2678_v26 = vpop.f32.mrb[99].mxu1 }
 0x9fa   : > { %v4149_v25 = vpack.c.bf16 %v2748_v12, %v2747_v46  ;;  %v2679_v29 = vadd.f32 %v2678_v26, %v6390_v50 }
 0x9fb   : > { %v2750_v47 = vmax.f32 %v2684_v34, 0.0 }
 0x9fc   : > { %v2749_v27 = vmax.f32 %v2679_v29, 0.0  ;;  %v3841_v43 = vpop.f32.mrb[100].mxu1  ;;  %4150 = vmatpush3.bf16.msra.mxu0 %v4149_v25 }
 0x9fd   : > { %v2694_v30 = vadd.f32 %v3841_v43, %v6390_v50  ;;  %v2688_v7 = vpop.f32.mrb[101].mxu1  ;;  %4151 = vmatprep.subr.bf16.mxu0 %v4618_v35 }
 0x9fe   : > { %v4152_v55 = vpack.c.bf16 %v2750_v47, %v2749_v27  ;;  %v2689_v41 = vadd.f32 %v2688_v7, %v6390_v50 }
 0x9ff   : > { %v2752_v38 = vmax.f32 %v2694_v30, 0.0 }
 0xa00   : > { %v2751_v32 = vmax.f32 %v2689_v41, 0.0  ;;  %v3844_v45 = vpop.f32.mrb[102].mxu1  ;;  %4153 = vmatpush3.bf16.msra.mxu0 %v4152_v55 }
 0xa01   : > { %v2704_v62 = vadd.f32 %v3844_v45, %v6390_v50  ;;  %v2698_v51 = vpop.f32.mrb[103].mxu1  ;;  %4154 = vmatprep.subr.bf16.mxu0 %v4618_v35 }
 0xa02   : > { %v4155_v9 = vpack.c.bf16 %v2752_v38, %v2751_v32  ;;  %v2699_v59 = vadd.f32 %v2698_v51, %v6390_v50 }
 0xa03   : > { %v2754_v21 = vmax.f32 %v2704_v62, 0.0 }
 0xa04   : > { %v2753_v22 = vmax.f32 %v2699_v59, 0.0  ;;  %v3847_v44 = vpop.f32.mrb[104].mxu1  ;;  %4156 = vmatpush3.bf16.msra.mxu0 %v4155_v9 }
 0xa05   : > { %v2714_v19 = vadd.f32 %v3847_v44, %v6390_v50  ;;  %v2708_v10 = vpop.f32.mrb[105].mxu1  ;;  %4157 = vmatprep.subr.bf16.mxu0 %v4618_v35 }
 0xa06   : > { %v4158_v20 = vpack.c.bf16 %v2754_v21, %v2753_v22  ;;  %v2709_v31 = vadd.f32 %v2708_v10, %v6390_v50 }
 0xa07   : > { %v2756_v1 = vmax.f32 %v2714_v19, 0.0 }
 0xa08   : > { %v2755_v24 = vmax.f32 %v2709_v31, 0.0  ;;  %v3850_v8 = vpop.f32.mrb[106].mxu1  ;;  %4159 = vmatpush3.bf16.msra.mxu0 %v4158_v20 }
 0xa09   : > { %v2724_v5 = vadd.f32 %v3850_v8, %v6390_v50  ;;  %v2718_v39 = vpop.f32.mrb[107].mxu1  ;;  %4160 = vmatprep.subr.bf16.mxu0 %v4618_v35 }
 0xa0a   : > { %v4161_v15 = vpack.c.bf16 %v2756_v1, %v2755_v24  ;;  %v2719_v28 = vadd.f32 %v2718_v39, %v6390_v50 }
 0xa0b   : > { %v2758_v58 = vmax.f32 %v2724_v5, 0.0 }
 0xa0c   : > { %v2757_v16 = vmax.f32 %v2719_v28, 0.0  ;;  %v3853_v60 = vpop.f32.mrb[108].mxu1  ;;  %4162 = vmatpush3.bf16.msra.mxu0 %v4161_v15 }
 0xa0d   : > { %v2734_v37 = vadd.f32 %v3853_v60, %v6390_v50  ;;  %v2728_v18 = vpop.f32.mrb[109].mxu1  ;;  %4163 = vmatprep.subr.bf16.mxu0 %v4618_v35 }
 0xa0e   : > { %v4164_v14 = vpack.c.bf16 %v2758_v58, %v2757_v16  ;;  %v2729_v57 = vadd.f32 %v2728_v18, %v6390_v50 }
 0xa0f   : > { %v2760_v61 = vmax.f32 %v2734_v37, 0.0 }
 0xa10   : > { %v2759_v13 = vmax.f32 %v2729_v57, 0.0  ;;  %v3856_v52 = vpop.f32.mrb[110].mxu1  ;;  %4165 = vmatpush3.bf16.msra.mxu0 %v4164_v14 }
 0xa11   : > { %v2744_v17 = vadd.f32 %v3856_v52, %v6390_v50  ;;  %v2738_v49 = vpop.f32.mrb[111].mxu1  ;;  %4166 = vmatprep.subr.bf16.mxu0 %v4618_v35 }
 0xa12   : > { %v4167_v36 = vpack.c.bf16 %v2760_v61, %v2759_v13  ;;  %v2739_v63 = vadd.f32 %v2738_v49, %v6390_v50 }
 0xa13   : > { %v2762_v0 = vmax.f32 %v2744_v17, 0.0 }
 0xa14   : > { %v2761_v23 = vmax.f32 %v2739_v63, 0.0  ;;  %4168 = vmatpush3.bf16.msra.mxu0 %v4167_v36 }
 0xa15   : > { %4169 = vmatprep.subr.bf16.mxu0 %v4618_v35 }
 0xa16   : > { %v4170_v53 = vpack.c.bf16 %v2762_v0, %v2761_v23 }
 0xa18   : > { %4171 = vmatpush3.bf16.msra.mxu0 %v4170_v53 }
 0xa1b   : > { %3890 = vmatmul.mubr.f32.vlgmr.msra.gmra.mrb[112].mxu0 %v700_v11 }
 0xaee   : > { %v2829_v54 = vpop.f32.mrb[112].mxu0 }
 0xaef   : > { %2833 = vst [vmem:[%s570_s13] sm:$0xff] %v2829_v54  ;;  %v3891_v2 = vpop.f32.mrb[113].mxu0 }
 0xaf0   : > { %4528 = shalt.err (!%p4525_p5)
}
 0xaf1   : > { %s4529_s29 = scalar_lea.hbm %s6423_s30, 128  ;;  %s4533_s8 = scalar_lea.hbm %s6759_s22, 512 }
 0xaf2   : > { %p4530_p6 = scmp.ne.s32.totalorder %s6423_s30, %s4529_s29  ;;  %p4534_p11 = scmp.lt.u32.totalorder %s6423_s30, %s6759_s22 }
 0xaf3   : > { %p4535_p8 = scmp.lt.u32.totalorder %s4533_s8, %s4529_s29  ;;  %p4537_p13 = scmp.lt.u32.totalorder %s4529_s29, %s6423_s30 }
 0xaf4   : > { %p4531_p12 = pnand %p4530_p6, %p6760_p7 }
 0xaf5   : > { %p4536_p2 = por %p4535_p8, %p4534_p11 }
 0xaf6   : > { %p4532_p1 = pneg %p4531_p12 }
 0xaf7   : > { %p4538_p10 = por %p4537_p13, %p4536_p2 }
 0xaf9   : > { %p4539_p4 = pnand %p4538_p10, %p4532_p1 }
 0xafb   : > { %4542 = shalt.err (!%p4539_p4)
}
 0xafc   : > { %4192 = dma.vmem_to_hbm [thread:$0]  (%p6760_p7), %s6418_s25, 128, %s6423_s30, %s2835_s18  }
 0xafd PF: > { %s6761_s28 = sld [smem:[#allocation24_spill]]  ;;  %s6762_s1 = sld [smem:[#allocation31_spill]] }
 0xafe   : > { %p4229_p9 = scmp.ge.s32.totalorder %s4601_s12, 2 }
 0xb03   : > { %s2860_s14 = sand.u32 1, %s6761_s28   ;;  %p6763_p3 = scmp.ne.s32.totalorder %s6762_s1, 0 }
 0xb04   : > { %s2861_s13 = scalar_lea.sflag [#allocation4], %s2860_s14 }
 0xb05   : > { %p4221_p0 = pnand %p4229_p9, %p6763_p3 }
 0xb07   : > { %4584 = dma.done.wait (!%p4221_p0), %s2861_s13, 128  }
 0xb08   : > { %4586 = vsyncadd (!%p4221_p0), %s2861_s13, 4294967168  ;;  %s6764_s12 = sld [smem:[#allocation27_spill]]  ;;  %s6765_s27 = sld [smem:[#allocation25_spill]] }
 0xb09   : > { %s6766_s11 = sld [smem:[#allocation28_spill]]  ;;  %s6767_s30 = smov %s4593_s10 }
 0xb0e   : > { %p32_p5 = scmp.ge.s32.totalorder %s6764_s12, 6   ;;  %s6768_s10 = smov %s6765_s27 }
 0xb10   :  { %34 = sbr.rel (!%p32_p5) target bundleno = 17 (0x11), region = 172 }
 0xb17   :  { %2866 = vsyncpa [#allocation3], 1 }
 0xb18   :  { %2868 = vsyncpa [#allocation3 + $0x1], 1 }
 0xb19   :  { %2869 = vsyncpa [#allocation6], 1 }
 0xb1a   :  { %2871 = vsyncpa [#allocation6 + $0x1], 1 }
 0xb1b   :  { %2872 = vsyncpa [#allocation9], 1 }
 0xb1c   :  { %2874 = vsyncpa [#allocation9 + $0x1], 1 }
 0xb1d   :  { %2875 = vsyncpa [#allocation12], 1 }
 0xb1e   :  { %2877 = vsyncpa [#allocation12 + $0x1], 1 }
 0xb1f   :  { %2878 = vsyncpa [#allocation15], 1 }
 0xb20   :  { %2879 = vsyncpa [#allocation4], 1 }
 0xb21   :  { %2881 = vsyncpa [#allocation4 + $0x1], 1 }

</bundles_post_ra>
